<compile_context>
chip_gen: v6e
topology: v6e:2x2x1
jax: 0.10.0
libtpu: 0.0.40
codegen_flags: <defaults>
</compile_context>

<pallas_src>
import functools
import math

import jax
import jax.numpy as jnp
from jax import lax
from jax.experimental import pallas as pl
from jax.experimental.pallas import tpu as pltpu


# ----------------------------- in-kernel helpers -----------------------------

def _layernorm(x, gamma, beta, eps=1e-5):
    """PyTorch-style LayerNorm over the last dim (biased variance)."""
    mu = jnp.mean(x, axis=-1, keepdims=True)
    xc = x - mu
    var = jnp.mean(xc * xc, axis=-1, keepdims=True)
    return xc * lax.rsqrt(var + eps) * gamma + beta


_PI = math.pi
_PI_2 = math.pi / 2.0
_PI_4 = math.pi / 4.0
_TAN_PI_8 = 0.4142135623730950


def _atan_01(a):
    """arctan for a in [0, 1]: Cephes atanf range reduction + odd polynomial."""
    red = a > _TAN_PI_8
    x = jnp.where(red, (a - 1.0) / (a + 1.0), a)
    z = x * x
    p = ((((8.05374449538e-2 * z - 1.38776856032e-1) * z
           + 1.99777106478e-1) * z - 3.33329491539e-1) * z) * x + x
    return jnp.where(red, _PI_4 + p, p)


def _atan2(y, x):
    """Elementwise atan2(y, x) from VPU ops only (matches torch.atan2 incl.
    atan2(0, 0) == 0 and atan2(0, x<0) == pi)."""
    ax = jnp.abs(x)
    ay = jnp.abs(y)
    mx = jnp.maximum(ax, ay)
    mn = jnp.minimum(ax, ay)
    a = mn / jnp.maximum(mx, 1e-30)            # in [0, 1]
    r = _atan_01(a)
    r = jnp.where(ay > ax, _PI_2 - r, r)
    r = jnp.where(x < 0.0, _PI - r, r)
    return jnp.where(y < 0.0, -r, r)


# ------------------------------- fused kernel --------------------------------

def _gfe_kernel(q_ref, pts_ref, w1_ref, w2_ref, w3_ref, w4_ref, w5_ref,
                v1_ref, v2_ref, vd_ref, out_ref, *, k_neighbors, mxu_dtype):
    q = q_ref[0]                               # [TN, 3] query point tile
    pts = pts_ref[0]                           # [N, 3]  full point set
    tn = q.shape[0]
    n = pts.shape[0]

    # ---- unpack packed params (loads once, static value slices) -------------
    w1 = w1_ref[...]                                           # [10, D/4]
    v1 = v1_ref[...]                                           # [3, D/4]
    v2 = v2_ref[...]                                           # [3, D/2]
    vd = vd_ref[...]                                           # [7, D]
    b1, g1, be1 = v1[0:1, :], v1[1:2, :], v1[2:3, :]
    b2, g2, be2 = v2[0:1, :], v2[1:2, :], v2[2:3, :]
    b3, g3, be3 = vd[0:1, :], vd[1:2, :], vd[2:3, :]
    b4, g4, be4 = vd[3:4, :], vd[4:5, :], vd[5:6, :]
    b5 = vd[6:7, :]
    w1_rows = [w1[c:c + 1, :] for c in range(10)]              # hoisted [1, D/4]

    def mdot(a, b):
        return jnp.dot(a.astype(mxu_dtype), b.astype(mxu_dtype),
                       preferred_element_type=jnp.float32)

    # ---- pairwise distance scores on the MXU --------------------------------
    # d2[i,j] = |q_i|^2 + |p_j|^2 - 2 q_i.p_j ; |q_i|^2 is constant per row so
    # neighbour ordering only needs score = |p_j|^2 - 2 q_i.p_j (lane-dense).
    p2 = jnp.sum(pts * pts, axis=-1, keepdims=True)                         # [N, 1]
    a_aug = jnp.concatenate([-2.0 * q, jnp.ones((tn, 1), jnp.float32)], axis=1)  # [TN, 4]
    b_aug = jnp.concatenate([pts, p2], axis=1)                              # [N, 4]
    score = lax.dot_general(a_aug, b_aug, (((1,), (1,)), ((), ())),
                            preferred_element_type=jnp.float32)             # [TN, N]

    col = lax.broadcasted_iota(jnp.int32, (tn, n), 1)                       # hoisted
    big = jnp.float32(1e30)
    masked = score

    # ---- iterative top-K (smallest) + geometry + first Linear per neighbour --
    h1_blocks = []
    for _ in range(k_neighbors):
        minv = jnp.min(masked, axis=-1, keepdims=True)                      # [TN, 1]
        is_min = masked == minv
        idx = jnp.min(jnp.where(is_min, col, n), axis=-1, keepdims=True)    # first hit
        sel = col == idx                                                    # [TN, N]
        masked = jnp.where(sel, big, masked)

        # gather neighbour coords with a one-hot matmul (MXU, exact)
        neigh = jnp.dot(sel.astype(jnp.float32), pts,
                        preferred_element_type=jnp.float32)                 # [TN, 3]
        rel = neigh - q
        rx, ry, rz = rel[:, 0:1], rel[:, 1:2], rel[:, 2:3]
        dist = jnp.sqrt(rx * rx + ry * ry + rz * rz)                        # [TN, 1]
        inv = 1.0 / (dist + 1e-6)
        rnx, rny, rnz = rx * inv, ry * inv, rz * inv
        a_xy = _atan2(rny, rnx)
        a_xz = _atan2(rnz, rnx)
        a_yz = _atan2(rnz, rny)

        # First encoder Linear (10 -> D/4) as broadcast FMAs (channel order:
        # [dist, rel(3), a_xy, a_xz, a_yz, reln(3)] as in the PyTorch module).
        h1 = (b1
              + dist * w1_rows[0]
              + rx * w1_rows[1] + ry * w1_rows[2] + rz * w1_rows[3]
              + a_xy * w1_rows[4] + a_xz * w1_rows[5] + a_yz * w1_rows[6]
              + rnx * w1_rows[7] + rny * w1_rows[8] + rnz * w1_rows[9])     # [TN, D/4]
        h1_blocks.append(h1)

    # ---- rest of the encoder on all K*TN rows at once ------------------------
    h = jnp.concatenate(h1_blocks, axis=0)                                  # [K*TN, D/4]
    h = jnp.maximum(_layernorm(h, g1, be1), 0.0)
    h = mdot(h, w2_ref[...]) + b2
    h = jnp.maximum(_layernorm(h, g2, be2), 0.0)
    h = mdot(h, w3_ref[...]) + b3
    enc = _layernorm(h, g3, be3)                                            # [K*TN, D]

    # ---- mean over the K neighbours: K-term sum of sublane slices ------------
    agg = enc[0:tn, :]
    for k in range(1, k_neighbors):
        agg = agg + enc[k * tn:(k + 1) * tn, :]
    agg = agg * jnp.float32(1.0 / k_neighbors)                              # [TN, D]

    # ---- aggregator -----------------------------------------------------------
    y = mdot(agg, w4_ref[...]) + b4
    y = jnp.maximum(_layernorm(y, g4, be4), 0.0)
    y = mdot(y, w5_ref[...]) + b5
    out_ref[0] = y


# ----------------------------------- wrapper -----------------------------------

def _pack_params(params):
    (w1, b1, g1, be1, w2, b2, g2, be2, w3, b3, g3, be3,
     w4, b4, g4, be4, w5, b5) = params
    v1 = jnp.concatenate([b1, g1, be1], axis=0)                    # [3, D/4]
    v2 = jnp.concatenate([b2, g2, be2], axis=0)                    # [3, D/2]
    vd = jnp.concatenate([b3, g3, be3, b4, g4, be4, b5], axis=0)   # [7, D]
    return [w1, w2, w3, w4, w5, v1, v2, vd]


def geometric_feature_extractor(coords, params, k_neighbors, output_dim,
                                point_tile=128, mxu_dtype=jnp.float32):
    """Fused forward pass. coords: [B, N, 3] float32 -> [B, N, output_dim]."""
    B, N, _ = coords.shape
    tn = min(point_tile, N)
    assert N % tn == 0, "N must be divisible by the point tile"
    assert k_neighbors <= N
    packed = _pack_params(params)

    kernel = functools.partial(_gfe_kernel, k_neighbors=k_neighbors,
                               mxu_dtype=mxu_dtype)
    in_specs = [
        pl.BlockSpec((1, tn, 3), lambda b, t: (b, t, 0)),   # query point tile
        pl.BlockSpec((1, N, 3), lambda b, t: (b, 0, 0)),    # full point set
    ] + [pl.BlockSpec(p.shape, lambda b, t: (0, 0)) for p in packed]

    return pl.pallas_call(
        kernel,
        grid=(B, N // tn),
        in_specs=in_specs,
        out_specs=pl.BlockSpec((1, tn, output_dim), lambda b, t: (b, t, 0)),
        out_shape=jax.ShapeDtypeStruct((B, N, output_dim), jnp.float32),
        compiler_params=pltpu.CompilerParams(
            dimension_semantics=("parallel", "parallel")),
    )(coords, coords, *packed)


# ----------------------------- deterministic params ----------------------------

def init_params(key, input_dim, output_dim):
    d4, d2, d = output_dim // 4, output_dim // 2, output_dim
    keys = jax.random.split(key, 5)

    def linear(k, fan_in, fan_out):
        w = jax.random.normal(k, (fan_in, fan_out), jnp.float32) / jnp.sqrt(
            jnp.float32(fan_in))
        b = jnp.zeros((1, fan_out), jnp.float32)
        return w, b

    def ln(dim):
        return jnp.ones((1, dim), jnp.float32), jnp.zeros((1, dim), jnp.float32)

    W1, b1 = linear(keys[0], input_dim, d4); g1, be1 = ln(d4)
    W2, b2 = linear(keys[1], d4, d2);        g2, be2 = ln(d2)
    W3, b3 = linear(keys[2], d2, d);         g3, be3 = ln(d)
    W4, b4 = linear(keys[3], d, d);          g4, be4 = ln(d)
    W5, b5 = linear(keys[4], d, d)
    return [W1, b1, g1, be1, W2, b2, g2, be2, W3, b3, g3, be3,
            W4, b4, g4, be4, W5, b5]


# ------------------------------ pure-JAX reference ------------------------------

def _reference_forward(coords, params, k_neighbors):
    (w1, b1, g1, be1, w2, b2, g2, be2, w3, b3, g3, be3,
     w4, b4, g4, be4, w5, b5) = params
    B, N, _ = coords.shape
    hp = lax.Precision.HIGHEST

    def ln(x, g, b, eps=1e-5):
        mu = jnp.mean(x, axis=-1, keepdims=True)
        var = jnp.mean((x - mu) ** 2, axis=-1, keepdims=True)
        return (x - mu) * lax.rsqrt(var + eps) * g + b

    diff = coords[:, :, None, :] - coords[:, None, :, :]
    d2 = jnp.sum(diff * diff, axis=-1)                                  # [B, N, N]
    _, idx = lax.top_k(-d2, k_neighbors)                                # [B, N, K]
    neigh = jax.vmap(lambda c, i: c[i])(coords, idx)                    # [B, N, K, 3]
    rel = neigh - coords[:, :, None, :]
    dist = jnp.sqrt(jnp.sum(rel * rel, axis=-1, keepdims=True))
    reln = rel / (dist + 1e-6)
    a_xy = jnp.arctan2(reln[..., 1], reln[..., 0])[..., None]
    a_xz = jnp.arctan2(reln[..., 2], reln[..., 0])[..., None]
    a_yz = jnp.arctan2(reln[..., 2], reln[..., 1])[..., None]
    geom = jnp.concatenate([dist, rel, a_xy, a_xz, a_yz, reln], axis=-1)
    x = geom.reshape(-1, 10)
    h = jnp.maximum(ln(jnp.dot(x, w1, precision=hp) + b1, g1, be1), 0.0)
    h = jnp.maximum(ln(jnp.dot(h, w2, precision=hp) + b2, g2, be2), 0.0)
    enc = ln(jnp.dot(h, w3, precision=hp) + b3, g3, be3)
    agg = jnp.mean(enc.reshape(B, N, k_neighbors, -1), axis=2)
    y = jnp.maximum(ln(jnp.dot(agg, w4, precision=hp) + b4, g4, be4), 0.0)
    return jnp.dot(y, w5, precision=hp) + b5


# ------------------------------------ main -------------------------------------

if __name__ == "__main__":
    B, N, K, D = 2, 16, 4, 32          # batch, points, k_neighbors, output_dim
    key = jax.random.PRNGKey(0)
    k_coords, k_params = jax.random.split(key)
    coords = jax.random.normal(k_coords, (B, N, 3), jnp.float32)
    params = init_params(k_params, input_dim=10, output_dim=D)

    out = geometric_feature_extractor(coords, params, k_neighbors=K, output_dim=D)
    out = jax.block_until_ready(out)

    assert out.shape == (B, N, D) and out.dtype == jnp.float32
    assert bool(jnp.all(jnp.isfinite(out)))

    ref = _reference_forward(coords, params, K)
    err = float(jnp.max(jnp.abs(out - ref)))
    assert err < 5e-3, f"max |kernel - reference| = {err}"
    print("KERNEL_OK")
</pallas_src>

<mosaic_0001>
module attributes {stable_mosaic.version = 11 : i64} {
  func.func @_gfe_kernel(%arg0: i32, %arg1: i32, %arg2: memref<1x16x3xf32, #tpu.memory_space<vmem>>, %arg3: memref<1x16x3xf32, #tpu.memory_space<vmem>>, %arg4: memref<10x8xf32, #tpu.memory_space<vmem>>, %arg5: memref<8x16xf32, #tpu.memory_space<vmem>>, %arg6: memref<16x32xf32, #tpu.memory_space<vmem>>, %arg7: memref<32x32xf32, #tpu.memory_space<vmem>>, %arg8: memref<32x32xf32, #tpu.memory_space<vmem>>, %arg9: memref<3x8xf32, #tpu.memory_space<vmem>>, %arg10: memref<3x16xf32, #tpu.memory_space<vmem>>, %arg11: memref<7x32xf32, #tpu.memory_space<vmem>>, %arg12: memref<1x16x32xf32, #tpu.memory_space<vmem>>) attributes {dimension_semantics = [#tpu.dimension_semantics<parallel>, #tpu.dimension_semantics<parallel>], iteration_bounds = array<i64: 2, 1>, scalar_prefetch = 0 : i64, scratch_operands = 0 : i64, tpu.core_type = #tpu.core_type<tc>, window_params = [{transform_indices = @transform_0, window_bounds = array<i64: 1, 16, 3>}, {transform_indices = @transform_1, window_bounds = array<i64: 1, 16, 3>}, {pipeline_mode = #tpu.pipeline_mode<synchronous>, transform_indices = @transform_2, window_bounds = array<i64: 10, 8>}, {pipeline_mode = #tpu.pipeline_mode<synchronous>, transform_indices = @transform_3, window_bounds = array<i64: 8, 16>}, {pipeline_mode = #tpu.pipeline_mode<synchronous>, transform_indices = @transform_4, window_bounds = array<i64: 16, 32>}, {pipeline_mode = #tpu.pipeline_mode<synchronous>, transform_indices = @transform_5, window_bounds = array<i64: 32, 32>}, {pipeline_mode = #tpu.pipeline_mode<synchronous>, transform_indices = @transform_6, window_bounds = array<i64: 32, 32>}, {pipeline_mode = #tpu.pipeline_mode<synchronous>, transform_indices = @transform_7, window_bounds = array<i64: 3, 8>}, {pipeline_mode = #tpu.pipeline_mode<synchronous>, transform_indices = @transform_8, window_bounds = array<i64: 3, 16>}, {pipeline_mode = #tpu.pipeline_mode<synchronous>, transform_indices = @transform_9, window_bounds = array<i64: 7, 32>}, {transform_indices = @transform_10, window_bounds = array<i64: 1, 16, 32>}]} {
    %c0 = arith.constant 0 : index
    %c0_0 = arith.constant 0 : index
    %c0_1 = arith.constant 0 : index
    %0 = vector.load %arg2[%c0, %c0_0, %c0_1] : memref<1x16x3xf32, #tpu.memory_space<vmem>>, vector<1x16x3xf32>
    %1 = vector.shape_cast %0 : vector<1x16x3xf32> to vector<16x3xf32>
    %c0_2 = arith.constant 0 : index
    %c0_3 = arith.constant 0 : index
    %c0_4 = arith.constant 0 : index
    %2 = vector.load %arg3[%c0_2, %c0_3, %c0_4] : memref<1x16x3xf32, #tpu.memory_space<vmem>>, vector<1x16x3xf32>
    %3 = vector.shape_cast %2 : vector<1x16x3xf32> to vector<16x3xf32>
    %c0_5 = arith.constant 0 : index
    %c0_6 = arith.constant 0 : index
    %4 = vector.load %arg4[%c0_5, %c0_6] : memref<10x8xf32, #tpu.memory_space<vmem>>, vector<10x8xf32>
    %c0_7 = arith.constant 0 : index
    %c0_8 = arith.constant 0 : index
    %5 = vector.load %arg9[%c0_7, %c0_8] : memref<3x8xf32, #tpu.memory_space<vmem>>, vector<3x8xf32>
    %c0_9 = arith.constant 0 : index
    %c0_10 = arith.constant 0 : index
    %6 = vector.load %arg10[%c0_9, %c0_10] : memref<3x16xf32, #tpu.memory_space<vmem>>, vector<3x16xf32>
    %c0_11 = arith.constant 0 : index
    %c0_12 = arith.constant 0 : index
    %7 = vector.load %arg11[%c0_11, %c0_12] : memref<7x32xf32, #tpu.memory_space<vmem>>, vector<7x32xf32>
    %8 = vector.extract_strided_slice %5 {offsets = [0, 0], sizes = [1, 8], strides = [1, 1]} : vector<3x8xf32> to vector<1x8xf32>
    %9 = vector.extract_strided_slice %5 {offsets = [1, 0], sizes = [1, 8], strides = [1, 1]} : vector<3x8xf32> to vector<1x8xf32>
    %10 = vector.extract_strided_slice %5 {offsets = [2, 0], sizes = [1, 8], strides = [1, 1]} : vector<3x8xf32> to vector<1x8xf32>
    %11 = vector.extract_strided_slice %6 {offsets = [0, 0], sizes = [1, 16], strides = [1, 1]} : vector<3x16xf32> to vector<1x16xf32>
    %12 = vector.extract_strided_slice %6 {offsets = [1, 0], sizes = [1, 16], strides = [1, 1]} : vector<3x16xf32> to vector<1x16xf32>
    %13 = vector.extract_strided_slice %6 {offsets = [2, 0], sizes = [1, 16], strides = [1, 1]} : vector<3x16xf32> to vector<1x16xf32>
    %14 = vector.extract_strided_slice %7 {offsets = [0, 0], sizes = [1, 32], strides = [1, 1]} : vector<7x32xf32> to vector<1x32xf32>
    %15 = vector.extract_strided_slice %7 {offsets = [1, 0], sizes = [1, 32], strides = [1, 1]} : vector<7x32xf32> to vector<1x32xf32>
    %16 = vector.extract_strided_slice %7 {offsets = [2, 0], sizes = [1, 32], strides = [1, 1]} : vector<7x32xf32> to vector<1x32xf32>
    %17 = vector.extract_strided_slice %7 {offsets = [3, 0], sizes = [1, 32], strides = [1, 1]} : vector<7x32xf32> to vector<1x32xf32>
    %18 = vector.extract_strided_slice %7 {offsets = [4, 0], sizes = [1, 32], strides = [1, 1]} : vector<7x32xf32> to vector<1x32xf32>
    %19 = vector.extract_strided_slice %7 {offsets = [5, 0], sizes = [1, 32], strides = [1, 1]} : vector<7x32xf32> to vector<1x32xf32>
    %20 = vector.extract_strided_slice %7 {offsets = [6, 0], sizes = [1, 32], strides = [1, 1]} : vector<7x32xf32> to vector<1x32xf32>
    %21 = vector.extract_strided_slice %4 {offsets = [0, 0], sizes = [1, 8], strides = [1, 1]} : vector<10x8xf32> to vector<1x8xf32>
    %22 = vector.extract_strided_slice %4 {offsets = [1, 0], sizes = [1, 8], strides = [1, 1]} : vector<10x8xf32> to vector<1x8xf32>
    %23 = vector.extract_strided_slice %4 {offsets = [2, 0], sizes = [1, 8], strides = [1, 1]} : vector<10x8xf32> to vector<1x8xf32>
    %24 = vector.extract_strided_slice %4 {offsets = [3, 0], sizes = [1, 8], strides = [1, 1]} : vector<10x8xf32> to vector<1x8xf32>
    %25 = vector.extract_strided_slice %4 {offsets = [4, 0], sizes = [1, 8], strides = [1, 1]} : vector<10x8xf32> to vector<1x8xf32>
    %26 = vector.extract_strided_slice %4 {offsets = [5, 0], sizes = [1, 8], strides = [1, 1]} : vector<10x8xf32> to vector<1x8xf32>
    %27 = vector.extract_strided_slice %4 {offsets = [6, 0], sizes = [1, 8], strides = [1, 1]} : vector<10x8xf32> to vector<1x8xf32>
    %28 = vector.extract_strided_slice %4 {offsets = [7, 0], sizes = [1, 8], strides = [1, 1]} : vector<10x8xf32> to vector<1x8xf32>
    %29 = vector.extract_strided_slice %4 {offsets = [8, 0], sizes = [1, 8], strides = [1, 1]} : vector<10x8xf32> to vector<1x8xf32>
    %30 = vector.extract_strided_slice %4 {offsets = [9, 0], sizes = [1, 8], strides = [1, 1]} : vector<10x8xf32> to vector<1x8xf32>
    %31 = arith.mulf %3, %3 : vector<16x3xf32>
    %cst = arith.constant dense<0.000000e+00> : vector<16xf32>
    %32 = vector.multi_reduction <add>, %31, %cst [1] : vector<16x3xf32> to vector<16xf32>
    %33 = vector.shape_cast %32 : vector<16xf32> to vector<16x1xf32>
    %cst_13 = arith.constant -2.000000e+00 : f32
    %34 = vector.broadcast %cst_13 : f32 to vector<16x3xf32>
    %35 = arith.mulf %34, %1 : vector<16x3xf32>
    %cst_14 = arith.constant 1.000000e+00 : f32
    %36 = vector.broadcast %cst_14 : f32 to vector<16x1xf32>
    %37 = tpu.concatenate %35, %36 in 1 : vector<16x3xf32>, vector<16x1xf32> -> vector<16x4xf32>
    %38 = tpu.concatenate %3, %33 in 1 : vector<16x3xf32>, vector<16x1xf32> -> vector<16x4xf32>
    %cst_15 = arith.constant dense<0.000000e+00> : vector<16x16xf32>
    %39 = tpu.matmul %37, %38, %cst_15 {dimension_numbers = #tpu.dot_dimension_numbers<[1], [1], [0], [0], [0, 0, 1, 0], [], []>} : vector<16x4xf32>, vector<16x4xf32>, vector<16x16xf32> -> vector<16x16xf32>
    %40 = tpu.iota {dimensions = array<i32: 1>} : vector<16x16xi32>
    %cst_16 = arith.constant dense<0x7F800000> : vector<16xf32>
    %41 = vector.multi_reduction <minimumf>, %39, %cst_16 [1] : vector<16x16xf32> to vector<16xf32>
    %42 = vector.shape_cast %41 : vector<16xf32> to vector<16x1xf32>
    %43 = vector.broadcast %42 : vector<16x1xf32> to vector<16x16xf32>
    %44 = arith.cmpf oeq, %39, %43 : vector<16x16xf32>
    %c16_i32 = arith.constant 16 : i32
    %45 = vector.broadcast %c16_i32 : i32 to vector<16x16xi32>
    %46 = arith.select %44, %40, %45 : vector<16x16xi1>, vector<16x16xi32>
    %cst_17 = arith.constant dense<2147483647> : vector<16xi32>
    %47 = vector.multi_reduction <minsi>, %46, %cst_17 [1] : vector<16x16xi32> to vector<16xi32>
    %48 = vector.shape_cast %47 : vector<16xi32> to vector<16x1xi32>
    %49 = vector.broadcast %48 : vector<16x1xi32> to vector<16x16xi32>
    %50 = arith.cmpi eq, %40, %49 : vector<16x16xi32>
    %cst_18 = arith.constant 1.000000e+30 : f32
    %51 = vector.broadcast %cst_18 : f32 to vector<16x16xf32>
    %52 = arith.select %50, %51, %39 : vector<16x16xi1>, vector<16x16xf32>
    %53 = arith.extui %50 : vector<16x16xi1> to vector<16x16xi32>
    %54 = arith.sitofp %53 : vector<16x16xi32> to vector<16x16xf32>
    %cst_19 = arith.constant dense<0.000000e+00> : vector<16x3xf32>
    %55 = tpu.matmul %54, %3, %cst_19 {dimension_numbers = #tpu.dot_dimension_numbers<[1], [0], [0], [1], [0, 0, 1, 1], [], []>} : vector<16x16xf32>, vector<16x3xf32>, vector<16x3xf32> -> vector<16x3xf32>
    %56 = arith.subf %55, %1 : vector<16x3xf32>
    %57 = vector.extract_strided_slice %56 {offsets = [0, 0], sizes = [16, 1], strides = [1, 1]} : vector<16x3xf32> to vector<16x1xf32>
    %58 = vector.extract_strided_slice %56 {offsets = [0, 1], sizes = [16, 1], strides = [1, 1]} : vector<16x3xf32> to vector<16x1xf32>
    %59 = vector.extract_strided_slice %56 {offsets = [0, 2], sizes = [16, 1], strides = [1, 1]} : vector<16x3xf32> to vector<16x1xf32>
    %60 = arith.mulf %57, %57 : vector<16x1xf32>
    %61 = arith.mulf %58, %58 : vector<16x1xf32>
    %62 = arith.addf %60, %61 : vector<16x1xf32>
    %63 = arith.mulf %59, %59 : vector<16x1xf32>
    %64 = arith.addf %62, %63 : vector<16x1xf32>
    %65 = math.sqrt %64 : vector<16x1xf32>
    %cst_20 = arith.constant 9.99999997E-7 : f32
    %66 = vector.broadcast %cst_20 : f32 to vector<16x1xf32>
    %67 = arith.addf %65, %66 : vector<16x1xf32>
    %cst_21 = arith.constant 1.000000e+00 : f32
    %68 = vector.broadcast %cst_21 : f32 to vector<16x1xf32>
    %69 = arith.divf %68, %67 : vector<16x1xf32>
    %70 = arith.mulf %57, %69 : vector<16x1xf32>
    %71 = arith.mulf %58, %69 : vector<16x1xf32>
    %72 = arith.mulf %59, %69 : vector<16x1xf32>
    %73 = math.absf %70 : vector<16x1xf32>
    %74 = math.absf %71 : vector<16x1xf32>
    %75 = arith.maximumf %73, %74 : vector<16x1xf32>
    %76 = arith.minimumf %73, %74 : vector<16x1xf32>
    %cst_22 = arith.constant 1.000000e-30 : f32
    %77 = vector.broadcast %cst_22 : f32 to vector<16x1xf32>
    %78 = arith.maximumf %75, %77 : vector<16x1xf32>
    %79 = arith.divf %76, %78 : vector<16x1xf32>
    %cst_23 = arith.constant 0.414213568 : f32
    %80 = vector.broadcast %cst_23 : f32 to vector<16x1xf32>
    %81 = arith.cmpf ogt, %79, %80 : vector<16x1xf32>
    %cst_24 = arith.constant 1.000000e+00 : f32
    %82 = vector.broadcast %cst_24 : f32 to vector<16x1xf32>
    %83 = arith.subf %79, %82 : vector<16x1xf32>
    %cst_25 = arith.constant 1.000000e+00 : f32
    %84 = vector.broadcast %cst_25 : f32 to vector<16x1xf32>
    %85 = arith.addf %79, %84 : vector<16x1xf32>
    %86 = arith.divf %83, %85 : vector<16x1xf32>
    %87 = arith.select %81, %86, %79 : vector<16x1xi1>, vector<16x1xf32>
    %88 = arith.mulf %87, %87 : vector<16x1xf32>
    %cst_26 = arith.constant 0.0805374458 : f32
    %89 = vector.broadcast %cst_26 : f32 to vector<16x1xf32>
    %90 = arith.mulf %89, %88 : vector<16x1xf32>
    %cst_27 = arith.constant 0.138776854 : f32
    %91 = vector.broadcast %cst_27 : f32 to vector<16x1xf32>
    %92 = arith.subf %90, %91 : vector<16x1xf32>
    %93 = arith.mulf %92, %88 : vector<16x1xf32>
    %cst_28 = arith.constant 0.199777111 : f32
    %94 = vector.broadcast %cst_28 : f32 to vector<16x1xf32>
    %95 = arith.addf %93, %94 : vector<16x1xf32>
    %96 = arith.mulf %95, %88 : vector<16x1xf32>
    %cst_29 = arith.constant 0.333329499 : f32
    %97 = vector.broadcast %cst_29 : f32 to vector<16x1xf32>
    %98 = arith.subf %96, %97 : vector<16x1xf32>
    %99 = arith.mulf %98, %88 : vector<16x1xf32>
    %100 = arith.mulf %99, %87 : vector<16x1xf32>
    %101 = arith.addf %100, %87 : vector<16x1xf32>
    %cst_30 = arith.constant 0.785398185 : f32
    %102 = vector.broadcast %cst_30 : f32 to vector<16x1xf32>
    %103 = arith.addf %102, %101 : vector<16x1xf32>
    %104 = arith.select %81, %103, %101 : vector<16x1xi1>, vector<16x1xf32>
    %105 = arith.cmpf ogt, %74, %73 : vector<16x1xf32>
    %cst_31 = arith.constant 1.57079637 : f32
    %106 = vector.broadcast %cst_31 : f32 to vector<16x1xf32>
    %107 = arith.subf %106, %104 : vector<16x1xf32>
    %108 = arith.select %105, %107, %104 : vector<16x1xi1>, vector<16x1xf32>
    %cst_32 = arith.constant 0.000000e+00 : f32
    %109 = vector.broadcast %cst_32 : f32 to vector<16x1xf32>
    %110 = arith.cmpf olt, %70, %109 : vector<16x1xf32>
    %cst_33 = arith.constant 3.14159274 : f32
    %111 = vector.broadcast %cst_33 : f32 to vector<16x1xf32>
    %112 = arith.subf %111, %108 : vector<16x1xf32>
    %113 = arith.select %110, %112, %108 : vector<16x1xi1>, vector<16x1xf32>
    %cst_34 = arith.constant 0.000000e+00 : f32
    %114 = vector.broadcast %cst_34 : f32 to vector<16x1xf32>
    %115 = arith.cmpf olt, %71, %114 : vector<16x1xf32>
    %cst_35 = arith.constant 0.000000e+00 : f32
    %116 = vector.broadcast %cst_35 : f32 to vector<16x1xf32>
    %117 = arith.subf %116, %113 : vector<16x1xf32>
    %118 = arith.select %115, %117, %113 : vector<16x1xi1>, vector<16x1xf32>
    %119 = math.absf %70 : vector<16x1xf32>
    %120 = math.absf %72 : vector<16x1xf32>
    %121 = arith.maximumf %119, %120 : vector<16x1xf32>
    %122 = arith.minimumf %119, %120 : vector<16x1xf32>
    %cst_36 = arith.constant 1.000000e-30 : f32
    %123 = vector.broadcast %cst_36 : f32 to vector<16x1xf32>
    %124 = arith.maximumf %121, %123 : vector<16x1xf32>
    %125 = arith.divf %122, %124 : vector<16x1xf32>
    %cst_37 = arith.constant 0.414213568 : f32
    %126 = vector.broadcast %cst_37 : f32 to vector<16x1xf32>
    %127 = arith.cmpf ogt, %125, %126 : vector<16x1xf32>
    %cst_38 = arith.constant 1.000000e+00 : f32
    %128 = vector.broadcast %cst_38 : f32 to vector<16x1xf32>
    %129 = arith.subf %125, %128 : vector<16x1xf32>
    %cst_39 = arith.constant 1.000000e+00 : f32
    %130 = vector.broadcast %cst_39 : f32 to vector<16x1xf32>
    %131 = arith.addf %125, %130 : vector<16x1xf32>
    %132 = arith.divf %129, %131 : vector<16x1xf32>
    %133 = arith.select %127, %132, %125 : vector<16x1xi1>, vector<16x1xf32>
    %134 = arith.mulf %133, %133 : vector<16x1xf32>
    %cst_40 = arith.constant 0.0805374458 : f32
    %135 = vector.broadcast %cst_40 : f32 to vector<16x1xf32>
    %136 = arith.mulf %135, %134 : vector<16x1xf32>
    %cst_41 = arith.constant 0.138776854 : f32
    %137 = vector.broadcast %cst_41 : f32 to vector<16x1xf32>
    %138 = arith.subf %136, %137 : vector<16x1xf32>
    %139 = arith.mulf %138, %134 : vector<16x1xf32>
    %cst_42 = arith.constant 0.199777111 : f32
    %140 = vector.broadcast %cst_42 : f32 to vector<16x1xf32>
    %141 = arith.addf %139, %140 : vector<16x1xf32>
    %142 = arith.mulf %141, %134 : vector<16x1xf32>
    %cst_43 = arith.constant 0.333329499 : f32
    %143 = vector.broadcast %cst_43 : f32 to vector<16x1xf32>
    %144 = arith.subf %142, %143 : vector<16x1xf32>
    %145 = arith.mulf %144, %134 : vector<16x1xf32>
    %146 = arith.mulf %145, %133 : vector<16x1xf32>
    %147 = arith.addf %146, %133 : vector<16x1xf32>
    %cst_44 = arith.constant 0.785398185 : f32
    %148 = vector.broadcast %cst_44 : f32 to vector<16x1xf32>
    %149 = arith.addf %148, %147 : vector<16x1xf32>
    %150 = arith.select %127, %149, %147 : vector<16x1xi1>, vector<16x1xf32>
    %151 = arith.cmpf ogt, %120, %119 : vector<16x1xf32>
    %cst_45 = arith.constant 1.57079637 : f32
    %152 = vector.broadcast %cst_45 : f32 to vector<16x1xf32>
    %153 = arith.subf %152, %150 : vector<16x1xf32>
    %154 = arith.select %151, %153, %150 : vector<16x1xi1>, vector<16x1xf32>
    %cst_46 = arith.constant 0.000000e+00 : f32
    %155 = vector.broadcast %cst_46 : f32 to vector<16x1xf32>
    %156 = arith.cmpf olt, %70, %155 : vector<16x1xf32>
    %cst_47 = arith.constant 3.14159274 : f32
    %157 = vector.broadcast %cst_47 : f32 to vector<16x1xf32>
    %158 = arith.subf %157, %154 : vector<16x1xf32>
    %159 = arith.select %156, %158, %154 : vector<16x1xi1>, vector<16x1xf32>
    %cst_48 = arith.constant 0.000000e+00 : f32
    %160 = vector.broadcast %cst_48 : f32 to vector<16x1xf32>
    %161 = arith.cmpf olt, %72, %160 : vector<16x1xf32>
    %cst_49 = arith.constant 0.000000e+00 : f32
    %162 = vector.broadcast %cst_49 : f32 to vector<16x1xf32>
    %163 = arith.subf %162, %159 : vector<16x1xf32>
    %164 = arith.select %161, %163, %159 : vector<16x1xi1>, vector<16x1xf32>
    %165 = math.absf %71 : vector<16x1xf32>
    %166 = math.absf %72 : vector<16x1xf32>
    %167 = arith.maximumf %165, %166 : vector<16x1xf32>
    %168 = arith.minimumf %165, %166 : vector<16x1xf32>
    %cst_50 = arith.constant 1.000000e-30 : f32
    %169 = vector.broadcast %cst_50 : f32 to vector<16x1xf32>
    %170 = arith.maximumf %167, %169 : vector<16x1xf32>
    %171 = arith.divf %168, %170 : vector<16x1xf32>
    %cst_51 = arith.constant 0.414213568 : f32
    %172 = vector.broadcast %cst_51 : f32 to vector<16x1xf32>
    %173 = arith.cmpf ogt, %171, %172 : vector<16x1xf32>
    %cst_52 = arith.constant 1.000000e+00 : f32
    %174 = vector.broadcast %cst_52 : f32 to vector<16x1xf32>
    %175 = arith.subf %171, %174 : vector<16x1xf32>
    %cst_53 = arith.constant 1.000000e+00 : f32
    %176 = vector.broadcast %cst_53 : f32 to vector<16x1xf32>
    %177 = arith.addf %171, %176 : vector<16x1xf32>
    %178 = arith.divf %175, %177 : vector<16x1xf32>
    %179 = arith.select %173, %178, %171 : vector<16x1xi1>, vector<16x1xf32>
    %180 = arith.mulf %179, %179 : vector<16x1xf32>
    %cst_54 = arith.constant 0.0805374458 : f32
    %181 = vector.broadcast %cst_54 : f32 to vector<16x1xf32>
    %182 = arith.mulf %181, %180 : vector<16x1xf32>
    %cst_55 = arith.constant 0.138776854 : f32
    %183 = vector.broadcast %cst_55 : f32 to vector<16x1xf32>
    %184 = arith.subf %182, %183 : vector<16x1xf32>
    %185 = arith.mulf %184, %180 : vector<16x1xf32>
    %cst_56 = arith.constant 0.199777111 : f32
    %186 = vector.broadcast %cst_56 : f32 to vector<16x1xf32>
    %187 = arith.addf %185, %186 : vector<16x1xf32>
    %188 = arith.mulf %187, %180 : vector<16x1xf32>
    %cst_57 = arith.constant 0.333329499 : f32
    %189 = vector.broadcast %cst_57 : f32 to vector<16x1xf32>
    %190 = arith.subf %188, %189 : vector<16x1xf32>
    %191 = arith.mulf %190, %180 : vector<16x1xf32>
    %192 = arith.mulf %191, %179 : vector<16x1xf32>
    %193 = arith.addf %192, %179 : vector<16x1xf32>
    %cst_58 = arith.constant 0.785398185 : f32
    %194 = vector.broadcast %cst_58 : f32 to vector<16x1xf32>
    %195 = arith.addf %194, %193 : vector<16x1xf32>
    %196 = arith.select %173, %195, %193 : vector<16x1xi1>, vector<16x1xf32>
    %197 = arith.cmpf ogt, %166, %165 : vector<16x1xf32>
    %cst_59 = arith.constant 1.57079637 : f32
    %198 = vector.broadcast %cst_59 : f32 to vector<16x1xf32>
    %199 = arith.subf %198, %196 : vector<16x1xf32>
    %200 = arith.select %197, %199, %196 : vector<16x1xi1>, vector<16x1xf32>
    %cst_60 = arith.constant 0.000000e+00 : f32
    %201 = vector.broadcast %cst_60 : f32 to vector<16x1xf32>
    %202 = arith.cmpf olt, %71, %201 : vector<16x1xf32>
    %cst_61 = arith.constant 3.14159274 : f32
    %203 = vector.broadcast %cst_61 : f32 to vector<16x1xf32>
    %204 = arith.subf %203, %200 : vector<16x1xf32>
    %205 = arith.select %202, %204, %200 : vector<16x1xi1>, vector<16x1xf32>
    %cst_62 = arith.constant 0.000000e+00 : f32
    %206 = vector.broadcast %cst_62 : f32 to vector<16x1xf32>
    %207 = arith.cmpf olt, %72, %206 : vector<16x1xf32>
    %cst_63 = arith.constant 0.000000e+00 : f32
    %208 = vector.broadcast %cst_63 : f32 to vector<16x1xf32>
    %209 = arith.subf %208, %205 : vector<16x1xf32>
    %210 = arith.select %207, %209, %205 : vector<16x1xi1>, vector<16x1xf32>
    %211 = vector.broadcast %65 : vector<16x1xf32> to vector<16x8xf32>
    %212 = vector.broadcast %21 : vector<1x8xf32> to vector<16x8xf32>
    %213 = arith.mulf %211, %212 : vector<16x8xf32>
    %214 = vector.broadcast %8 : vector<1x8xf32> to vector<16x8xf32>
    %215 = arith.addf %214, %213 : vector<16x8xf32>
    %216 = vector.broadcast %57 : vector<16x1xf32> to vector<16x8xf32>
    %217 = vector.broadcast %22 : vector<1x8xf32> to vector<16x8xf32>
    %218 = arith.mulf %216, %217 : vector<16x8xf32>
    %219 = arith.addf %215, %218 : vector<16x8xf32>
    %220 = vector.broadcast %58 : vector<16x1xf32> to vector<16x8xf32>
    %221 = vector.broadcast %23 : vector<1x8xf32> to vector<16x8xf32>
    %222 = arith.mulf %220, %221 : vector<16x8xf32>
    %223 = arith.addf %219, %222 : vector<16x8xf32>
    %224 = vector.broadcast %59 : vector<16x1xf32> to vector<16x8xf32>
    %225 = vector.broadcast %24 : vector<1x8xf32> to vector<16x8xf32>
    %226 = arith.mulf %224, %225 : vector<16x8xf32>
    %227 = arith.addf %223, %226 : vector<16x8xf32>
    %228 = vector.broadcast %118 : vector<16x1xf32> to vector<16x8xf32>
    %229 = vector.broadcast %25 : vector<1x8xf32> to vector<16x8xf32>
    %230 = arith.mulf %228, %229 : vector<16x8xf32>
    %231 = arith.addf %227, %230 : vector<16x8xf32>
    %232 = vector.broadcast %164 : vector<16x1xf32> to vector<16x8xf32>
    %233 = vector.broadcast %26 : vector<1x8xf32> to vector<16x8xf32>
    %234 = arith.mulf %232, %233 : vector<16x8xf32>
    %235 = arith.addf %231, %234 : vector<16x8xf32>
    %236 = vector.broadcast %210 : vector<16x1xf32> to vector<16x8xf32>
    %237 = vector.broadcast %27 : vector<1x8xf32> to vector<16x8xf32>
    %238 = arith.mulf %236, %237 : vector<16x8xf32>
    %239 = arith.addf %235, %238 : vector<16x8xf32>
    %240 = vector.broadcast %70 : vector<16x1xf32> to vector<16x8xf32>
    %241 = vector.broadcast %28 : vector<1x8xf32> to vector<16x8xf32>
    %242 = arith.mulf %240, %241 : vector<16x8xf32>
    %243 = arith.addf %239, %242 : vector<16x8xf32>
    %244 = vector.broadcast %71 : vector<16x1xf32> to vector<16x8xf32>
    %245 = vector.broadcast %29 : vector<1x8xf32> to vector<16x8xf32>
    %246 = arith.mulf %244, %245 : vector<16x8xf32>
    %247 = arith.addf %243, %246 : vector<16x8xf32>
    %248 = vector.broadcast %72 : vector<16x1xf32> to vector<16x8xf32>
    %249 = vector.broadcast %30 : vector<1x8xf32> to vector<16x8xf32>
    %250 = arith.mulf %248, %249 : vector<16x8xf32>
    %251 = arith.addf %247, %250 : vector<16x8xf32>
    %cst_64 = arith.constant dense<0x7F800000> : vector<16xf32>
    %252 = vector.multi_reduction <minimumf>, %52, %cst_64 [1] : vector<16x16xf32> to vector<16xf32>
    %253 = vector.shape_cast %252 : vector<16xf32> to vector<16x1xf32>
    %254 = vector.broadcast %253 : vector<16x1xf32> to vector<16x16xf32>
    %255 = arith.cmpf oeq, %52, %254 : vector<16x16xf32>
    %c16_i32_65 = arith.constant 16 : i32
    %256 = vector.broadcast %c16_i32_65 : i32 to vector<16x16xi32>
    %257 = arith.select %255, %40, %256 : vector<16x16xi1>, vector<16x16xi32>
    %cst_66 = arith.constant dense<2147483647> : vector<16xi32>
    %258 = vector.multi_reduction <minsi>, %257, %cst_66 [1] : vector<16x16xi32> to vector<16xi32>
    %259 = vector.shape_cast %258 : vector<16xi32> to vector<16x1xi32>
    %260 = vector.broadcast %259 : vector<16x1xi32> to vector<16x16xi32>
    %261 = arith.cmpi eq, %40, %260 : vector<16x16xi32>
    %cst_67 = arith.constant 1.000000e+30 : f32
    %262 = vector.broadcast %cst_67 : f32 to vector<16x16xf32>
    %263 = arith.select %261, %262, %52 : vector<16x16xi1>, vector<16x16xf32>
    %264 = arith.extui %261 : vector<16x16xi1> to vector<16x16xi32>
    %265 = arith.sitofp %264 : vector<16x16xi32> to vector<16x16xf32>
    %cst_68 = arith.constant dense<0.000000e+00> : vector<16x3xf32>
    %266 = tpu.matmul %265, %3, %cst_68 {dimension_numbers = #tpu.dot_dimension_numbers<[1], [0], [0], [1], [0, 0, 1, 1], [], []>} : vector<16x16xf32>, vector<16x3xf32>, vector<16x3xf32> -> vector<16x3xf32>
    %267 = arith.subf %266, %1 : vector<16x3xf32>
    %268 = vector.extract_strided_slice %267 {offsets = [0, 0], sizes = [16, 1], strides = [1, 1]} : vector<16x3xf32> to vector<16x1xf32>
    %269 = vector.extract_strided_slice %267 {offsets = [0, 1], sizes = [16, 1], strides = [1, 1]} : vector<16x3xf32> to vector<16x1xf32>
    %270 = vector.extract_strided_slice %267 {offsets = [0, 2], sizes = [16, 1], strides = [1, 1]} : vector<16x3xf32> to vector<16x1xf32>
    %271 = arith.mulf %268, %268 : vector<16x1xf32>
    %272 = arith.mulf %269, %269 : vector<16x1xf32>
    %273 = arith.addf %271, %272 : vector<16x1xf32>
    %274 = arith.mulf %270, %270 : vector<16x1xf32>
    %275 = arith.addf %273, %274 : vector<16x1xf32>
    %276 = math.sqrt %275 : vector<16x1xf32>
    %cst_69 = arith.constant 9.99999997E-7 : f32
    %277 = vector.broadcast %cst_69 : f32 to vector<16x1xf32>
    %278 = arith.addf %276, %277 : vector<16x1xf32>
    %cst_70 = arith.constant 1.000000e+00 : f32
    %279 = vector.broadcast %cst_70 : f32 to vector<16x1xf32>
    %280 = arith.divf %279, %278 : vector<16x1xf32>
    %281 = arith.mulf %268, %280 : vector<16x1xf32>
    %282 = arith.mulf %269, %280 : vector<16x1xf32>
    %283 = arith.mulf %270, %280 : vector<16x1xf32>
    %284 = math.absf %281 : vector<16x1xf32>
    %285 = math.absf %282 : vector<16x1xf32>
    %286 = arith.maximumf %284, %285 : vector<16x1xf32>
    %287 = arith.minimumf %284, %285 : vector<16x1xf32>
    %cst_71 = arith.constant 1.000000e-30 : f32
    %288 = vector.broadcast %cst_71 : f32 to vector<16x1xf32>
    %289 = arith.maximumf %286, %288 : vector<16x1xf32>
    %290 = arith.divf %287, %289 : vector<16x1xf32>
    %cst_72 = arith.constant 0.414213568 : f32
    %291 = vector.broadcast %cst_72 : f32 to vector<16x1xf32>
    %292 = arith.cmpf ogt, %290, %291 : vector<16x1xf32>
    %cst_73 = arith.constant 1.000000e+00 : f32
    %293 = vector.broadcast %cst_73 : f32 to vector<16x1xf32>
    %294 = arith.subf %290, %293 : vector<16x1xf32>
    %cst_74 = arith.constant 1.000000e+00 : f32
    %295 = vector.broadcast %cst_74 : f32 to vector<16x1xf32>
    %296 = arith.addf %290, %295 : vector<16x1xf32>
    %297 = arith.divf %294, %296 : vector<16x1xf32>
    %298 = arith.select %292, %297, %290 : vector<16x1xi1>, vector<16x1xf32>
    %299 = arith.mulf %298, %298 : vector<16x1xf32>
    %cst_75 = arith.constant 0.0805374458 : f32
    %300 = vector.broadcast %cst_75 : f32 to vector<16x1xf32>
    %301 = arith.mulf %300, %299 : vector<16x1xf32>
    %cst_76 = arith.constant 0.138776854 : f32
    %302 = vector.broadcast %cst_76 : f32 to vector<16x1xf32>
    %303 = arith.subf %301, %302 : vector<16x1xf32>
    %304 = arith.mulf %303, %299 : vector<16x1xf32>
    %cst_77 = arith.constant 0.199777111 : f32
    %305 = vector.broadcast %cst_77 : f32 to vector<16x1xf32>
    %306 = arith.addf %304, %305 : vector<16x1xf32>
    %307 = arith.mulf %306, %299 : vector<16x1xf32>
    %cst_78 = arith.constant 0.333329499 : f32
    %308 = vector.broadcast %cst_78 : f32 to vector<16x1xf32>
    %309 = arith.subf %307, %308 : vector<16x1xf32>
    %310 = arith.mulf %309, %299 : vector<16x1xf32>
    %311 = arith.mulf %310, %298 : vector<16x1xf32>
    %312 = arith.addf %311, %298 : vector<16x1xf32>
    %cst_79 = arith.constant 0.785398185 : f32
    %313 = vector.broadcast %cst_79 : f32 to vector<16x1xf32>
    %314 = arith.addf %313, %312 : vector<16x1xf32>
    %315 = arith.select %292, %314, %312 : vector<16x1xi1>, vector<16x1xf32>
    %316 = arith.cmpf ogt, %285, %284 : vector<16x1xf32>
    %cst_80 = arith.constant 1.57079637 : f32
    %317 = vector.broadcast %cst_80 : f32 to vector<16x1xf32>
    %318 = arith.subf %317, %315 : vector<16x1xf32>
    %319 = arith.select %316, %318, %315 : vector<16x1xi1>, vector<16x1xf32>
    %cst_81 = arith.constant 0.000000e+00 : f32
    %320 = vector.broadcast %cst_81 : f32 to vector<16x1xf32>
    %321 = arith.cmpf olt, %281, %320 : vector<16x1xf32>
    %cst_82 = arith.constant 3.14159274 : f32
    %322 = vector.broadcast %cst_82 : f32 to vector<16x1xf32>
    %323 = arith.subf %322, %319 : vector<16x1xf32>
    %324 = arith.select %321, %323, %319 : vector<16x1xi1>, vector<16x1xf32>
    %cst_83 = arith.constant 0.000000e+00 : f32
    %325 = vector.broadcast %cst_83 : f32 to vector<16x1xf32>
    %326 = arith.cmpf olt, %282, %325 : vector<16x1xf32>
    %cst_84 = arith.constant 0.000000e+00 : f32
    %327 = vector.broadcast %cst_84 : f32 to vector<16x1xf32>
    %328 = arith.subf %327, %324 : vector<16x1xf32>
    %329 = arith.select %326, %328, %324 : vector<16x1xi1>, vector<16x1xf32>
    %330 = math.absf %281 : vector<16x1xf32>
    %331 = math.absf %283 : vector<16x1xf32>
    %332 = arith.maximumf %330, %331 : vector<16x1xf32>
    %333 = arith.minimumf %330, %331 : vector<16x1xf32>
    %cst_85 = arith.constant 1.000000e-30 : f32
    %334 = vector.broadcast %cst_85 : f32 to vector<16x1xf32>
    %335 = arith.maximumf %332, %334 : vector<16x1xf32>
    %336 = arith.divf %333, %335 : vector<16x1xf32>
    %cst_86 = arith.constant 0.414213568 : f32
    %337 = vector.broadcast %cst_86 : f32 to vector<16x1xf32>
    %338 = arith.cmpf ogt, %336, %337 : vector<16x1xf32>
    %cst_87 = arith.constant 1.000000e+00 : f32
    %339 = vector.broadcast %cst_87 : f32 to vector<16x1xf32>
    %340 = arith.subf %336, %339 : vector<16x1xf32>
    %cst_88 = arith.constant 1.000000e+00 : f32
    %341 = vector.broadcast %cst_88 : f32 to vector<16x1xf32>
    %342 = arith.addf %336, %341 : vector<16x1xf32>
    %343 = arith.divf %340, %342 : vector<16x1xf32>
    %344 = arith.select %338, %343, %336 : vector<16x1xi1>, vector<16x1xf32>
    %345 = arith.mulf %344, %344 : vector<16x1xf32>
    %cst_89 = arith.constant 0.0805374458 : f32
    %346 = vector.broadcast %cst_89 : f32 to vector<16x1xf32>
    %347 = arith.mulf %346, %345 : vector<16x1xf32>
    %cst_90 = arith.constant 0.138776854 : f32
    %348 = vector.broadcast %cst_90 : f32 to vector<16x1xf32>
    %349 = arith.subf %347, %348 : vector<16x1xf32>
    %350 = arith.mulf %349, %345 : vector<16x1xf32>
    %cst_91 = arith.constant 0.199777111 : f32
    %351 = vector.broadcast %cst_91 : f32 to vector<16x1xf32>
    %352 = arith.addf %350, %351 : vector<16x1xf32>
    %353 = arith.mulf %352, %345 : vector<16x1xf32>
    %cst_92 = arith.constant 0.333329499 : f32
    %354 = vector.broadcast %cst_92 : f32 to vector<16x1xf32>
    %355 = arith.subf %353, %354 : vector<16x1xf32>
    %356 = arith.mulf %355, %345 : vector<16x1xf32>
    %357 = arith.mulf %356, %344 : vector<16x1xf32>
    %358 = arith.addf %357, %344 : vector<16x1xf32>
    %cst_93 = arith.constant 0.785398185 : f32
    %359 = vector.broadcast %cst_93 : f32 to vector<16x1xf32>
    %360 = arith.addf %359, %358 : vector<16x1xf32>
    %361 = arith.select %338, %360, %358 : vector<16x1xi1>, vector<16x1xf32>
    %362 = arith.cmpf ogt, %331, %330 : vector<16x1xf32>
    %cst_94 = arith.constant 1.57079637 : f32
    %363 = vector.broadcast %cst_94 : f32 to vector<16x1xf32>
    %364 = arith.subf %363, %361 : vector<16x1xf32>
    %365 = arith.select %362, %364, %361 : vector<16x1xi1>, vector<16x1xf32>
    %cst_95 = arith.constant 0.000000e+00 : f32
    %366 = vector.broadcast %cst_95 : f32 to vector<16x1xf32>
    %367 = arith.cmpf olt, %281, %366 : vector<16x1xf32>
    %cst_96 = arith.constant 3.14159274 : f32
    %368 = vector.broadcast %cst_96 : f32 to vector<16x1xf32>
    %369 = arith.subf %368, %365 : vector<16x1xf32>
    %370 = arith.select %367, %369, %365 : vector<16x1xi1>, vector<16x1xf32>
    %cst_97 = arith.constant 0.000000e+00 : f32
    %371 = vector.broadcast %cst_97 : f32 to vector<16x1xf32>
    %372 = arith.cmpf olt, %283, %371 : vector<16x1xf32>
    %cst_98 = arith.constant 0.000000e+00 : f32
    %373 = vector.broadcast %cst_98 : f32 to vector<16x1xf32>
    %374 = arith.subf %373, %370 : vector<16x1xf32>
    %375 = arith.select %372, %374, %370 : vector<16x1xi1>, vector<16x1xf32>
    %376 = math.absf %282 : vector<16x1xf32>
    %377 = math.absf %283 : vector<16x1xf32>
    %378 = arith.maximumf %376, %377 : vector<16x1xf32>
    %379 = arith.minimumf %376, %377 : vector<16x1xf32>
    %cst_99 = arith.constant 1.000000e-30 : f32
    %380 = vector.broadcast %cst_99 : f32 to vector<16x1xf32>
    %381 = arith.maximumf %378, %380 : vector<16x1xf32>
    %382 = arith.divf %379, %381 : vector<16x1xf32>
    %cst_100 = arith.constant 0.414213568 : f32
    %383 = vector.broadcast %cst_100 : f32 to vector<16x1xf32>
    %384 = arith.cmpf ogt, %382, %383 : vector<16x1xf32>
    %cst_101 = arith.constant 1.000000e+00 : f32
    %385 = vector.broadcast %cst_101 : f32 to vector<16x1xf32>
    %386 = arith.subf %382, %385 : vector<16x1xf32>
    %cst_102 = arith.constant 1.000000e+00 : f32
    %387 = vector.broadcast %cst_102 : f32 to vector<16x1xf32>
    %388 = arith.addf %382, %387 : vector<16x1xf32>
    %389 = arith.divf %386, %388 : vector<16x1xf32>
    %390 = arith.select %384, %389, %382 : vector<16x1xi1>, vector<16x1xf32>
    %391 = arith.mulf %390, %390 : vector<16x1xf32>
    %cst_103 = arith.constant 0.0805374458 : f32
    %392 = vector.broadcast %cst_103 : f32 to vector<16x1xf32>
    %393 = arith.mulf %392, %391 : vector<16x1xf32>
    %cst_104 = arith.constant 0.138776854 : f32
    %394 = vector.broadcast %cst_104 : f32 to vector<16x1xf32>
    %395 = arith.subf %393, %394 : vector<16x1xf32>
    %396 = arith.mulf %395, %391 : vector<16x1xf32>
    %cst_105 = arith.constant 0.199777111 : f32
    %397 = vector.broadcast %cst_105 : f32 to vector<16x1xf32>
    %398 = arith.addf %396, %397 : vector<16x1xf32>
    %399 = arith.mulf %398, %391 : vector<16x1xf32>
    %cst_106 = arith.constant 0.333329499 : f32
    %400 = vector.broadcast %cst_106 : f32 to vector<16x1xf32>
    %401 = arith.subf %399, %400 : vector<16x1xf32>
    %402 = arith.mulf %401, %391 : vector<16x1xf32>
    %403 = arith.mulf %402, %390 : vector<16x1xf32>
    %404 = arith.addf %403, %390 : vector<16x1xf32>
    %cst_107 = arith.constant 0.785398185 : f32
    %405 = vector.broadcast %cst_107 : f32 to vector<16x1xf32>
    %406 = arith.addf %405, %404 : vector<16x1xf32>
    %407 = arith.select %384, %406, %404 : vector<16x1xi1>, vector<16x1xf32>
    %408 = arith.cmpf ogt, %377, %376 : vector<16x1xf32>
    %cst_108 = arith.constant 1.57079637 : f32
    %409 = vector.broadcast %cst_108 : f32 to vector<16x1xf32>
    %410 = arith.subf %409, %407 : vector<16x1xf32>
    %411 = arith.select %408, %410, %407 : vector<16x1xi1>, vector<16x1xf32>
    %cst_109 = arith.constant 0.000000e+00 : f32
    %412 = vector.broadcast %cst_109 : f32 to vector<16x1xf32>
    %413 = arith.cmpf olt, %282, %412 : vector<16x1xf32>
    %cst_110 = arith.constant 3.14159274 : f32
    %414 = vector.broadcast %cst_110 : f32 to vector<16x1xf32>
    %415 = arith.subf %414, %411 : vector<16x1xf32>
    %416 = arith.select %413, %415, %411 : vector<16x1xi1>, vector<16x1xf32>
    %cst_111 = arith.constant 0.000000e+00 : f32
    %417 = vector.broadcast %cst_111 : f32 to vector<16x1xf32>
    %418 = arith.cmpf olt, %283, %417 : vector<16x1xf32>
    %cst_112 = arith.constant 0.000000e+00 : f32
    %419 = vector.broadcast %cst_112 : f32 to vector<16x1xf32>
    %420 = arith.subf %419, %416 : vector<16x1xf32>
    %421 = arith.select %418, %420, %416 : vector<16x1xi1>, vector<16x1xf32>
    %422 = vector.broadcast %276 : vector<16x1xf32> to vector<16x8xf32>
    %423 = vector.broadcast %21 : vector<1x8xf32> to vector<16x8xf32>
    %424 = arith.mulf %422, %423 : vector<16x8xf32>
    %425 = vector.broadcast %8 : vector<1x8xf32> to vector<16x8xf32>
    %426 = arith.addf %425, %424 : vector<16x8xf32>
    %427 = vector.broadcast %268 : vector<16x1xf32> to vector<16x8xf32>
    %428 = vector.broadcast %22 : vector<1x8xf32> to vector<16x8xf32>
    %429 = arith.mulf %427, %428 : vector<16x8xf32>
    %430 = arith.addf %426, %429 : vector<16x8xf32>
    %431 = vector.broadcast %269 : vector<16x1xf32> to vector<16x8xf32>
    %432 = vector.broadcast %23 : vector<1x8xf32> to vector<16x8xf32>
    %433 = arith.mulf %431, %432 : vector<16x8xf32>
    %434 = arith.addf %430, %433 : vector<16x8xf32>
    %435 = vector.broadcast %270 : vector<16x1xf32> to vector<16x8xf32>
    %436 = vector.broadcast %24 : vector<1x8xf32> to vector<16x8xf32>
    %437 = arith.mulf %435, %436 : vector<16x8xf32>
    %438 = arith.addf %434, %437 : vector<16x8xf32>
    %439 = vector.broadcast %329 : vector<16x1xf32> to vector<16x8xf32>
    %440 = vector.broadcast %25 : vector<1x8xf32> to vector<16x8xf32>
    %441 = arith.mulf %439, %440 : vector<16x8xf32>
    %442 = arith.addf %438, %441 : vector<16x8xf32>
    %443 = vector.broadcast %375 : vector<16x1xf32> to vector<16x8xf32>
    %444 = vector.broadcast %26 : vector<1x8xf32> to vector<16x8xf32>
    %445 = arith.mulf %443, %444 : vector<16x8xf32>
    %446 = arith.addf %442, %445 : vector<16x8xf32>
    %447 = vector.broadcast %421 : vector<16x1xf32> to vector<16x8xf32>
    %448 = vector.broadcast %27 : vector<1x8xf32> to vector<16x8xf32>
    %449 = arith.mulf %447, %448 : vector<16x8xf32>
    %450 = arith.addf %446, %449 : vector<16x8xf32>
    %451 = vector.broadcast %281 : vector<16x1xf32> to vector<16x8xf32>
    %452 = vector.broadcast %28 : vector<1x8xf32> to vector<16x8xf32>
    %453 = arith.mulf %451, %452 : vector<16x8xf32>
    %454 = arith.addf %450, %453 : vector<16x8xf32>
    %455 = vector.broadcast %282 : vector<16x1xf32> to vector<16x8xf32>
    %456 = vector.broadcast %29 : vector<1x8xf32> to vector<16x8xf32>
    %457 = arith.mulf %455, %456 : vector<16x8xf32>
    %458 = arith.addf %454, %457 : vector<16x8xf32>
    %459 = vector.broadcast %283 : vector<16x1xf32> to vector<16x8xf32>
    %460 = vector.broadcast %30 : vector<1x8xf32> to vector<16x8xf32>
    %461 = arith.mulf %459, %460 : vector<16x8xf32>
    %462 = arith.addf %458, %461 : vector<16x8xf32>
    %cst_113 = arith.constant dense<0x7F800000> : vector<16xf32>
    %463 = vector.multi_reduction <minimumf>, %263, %cst_113 [1] : vector<16x16xf32> to vector<16xf32>
    %464 = vector.shape_cast %463 : vector<16xf32> to vector<16x1xf32>
    %465 = vector.broadcast %464 : vector<16x1xf32> to vector<16x16xf32>
    %466 = arith.cmpf oeq, %263, %465 : vector<16x16xf32>
    %c16_i32_114 = arith.constant 16 : i32
    %467 = vector.broadcast %c16_i32_114 : i32 to vector<16x16xi32>
    %468 = arith.select %466, %40, %467 : vector<16x16xi1>, vector<16x16xi32>
    %cst_115 = arith.constant dense<2147483647> : vector<16xi32>
    %469 = vector.multi_reduction <minsi>, %468, %cst_115 [1] : vector<16x16xi32> to vector<16xi32>
    %470 = vector.shape_cast %469 : vector<16xi32> to vector<16x1xi32>
    %471 = vector.broadcast %470 : vector<16x1xi32> to vector<16x16xi32>
    %472 = arith.cmpi eq, %40, %471 : vector<16x16xi32>
    %cst_116 = arith.constant 1.000000e+30 : f32
    %473 = vector.broadcast %cst_116 : f32 to vector<16x16xf32>
    %474 = arith.select %472, %473, %263 : vector<16x16xi1>, vector<16x16xf32>
    %475 = arith.extui %472 : vector<16x16xi1> to vector<16x16xi32>
    %476 = arith.sitofp %475 : vector<16x16xi32> to vector<16x16xf32>
    %cst_117 = arith.constant dense<0.000000e+00> : vector<16x3xf32>
    %477 = tpu.matmul %476, %3, %cst_117 {dimension_numbers = #tpu.dot_dimension_numbers<[1], [0], [0], [1], [0, 0, 1, 1], [], []>} : vector<16x16xf32>, vector<16x3xf32>, vector<16x3xf32> -> vector<16x3xf32>
    %478 = arith.subf %477, %1 : vector<16x3xf32>
    %479 = vector.extract_strided_slice %478 {offsets = [0, 0], sizes = [16, 1], strides = [1, 1]} : vector<16x3xf32> to vector<16x1xf32>
    %480 = vector.extract_strided_slice %478 {offsets = [0, 1], sizes = [16, 1], strides = [1, 1]} : vector<16x3xf32> to vector<16x1xf32>
    %481 = vector.extract_strided_slice %478 {offsets = [0, 2], sizes = [16, 1], strides = [1, 1]} : vector<16x3xf32> to vector<16x1xf32>
    %482 = arith.mulf %479, %479 : vector<16x1xf32>
    %483 = arith.mulf %480, %480 : vector<16x1xf32>
    %484 = arith.addf %482, %483 : vector<16x1xf32>
    %485 = arith.mulf %481, %481 : vector<16x1xf32>
    %486 = arith.addf %484, %485 : vector<16x1xf32>
    %487 = math.sqrt %486 : vector<16x1xf32>
    %cst_118 = arith.constant 9.99999997E-7 : f32
    %488 = vector.broadcast %cst_118 : f32 to vector<16x1xf32>
    %489 = arith.addf %487, %488 : vector<16x1xf32>
    %cst_119 = arith.constant 1.000000e+00 : f32
    %490 = vector.broadcast %cst_119 : f32 to vector<16x1xf32>
    %491 = arith.divf %490, %489 : vector<16x1xf32>
    %492 = arith.mulf %479, %491 : vector<16x1xf32>
    %493 = arith.mulf %480, %491 : vector<16x1xf32>
    %494 = arith.mulf %481, %491 : vector<16x1xf32>
    %495 = math.absf %492 : vector<16x1xf32>
    %496 = math.absf %493 : vector<16x1xf32>
    %497 = arith.maximumf %495, %496 : vector<16x1xf32>
    %498 = arith.minimumf %495, %496 : vector<16x1xf32>
    %cst_120 = arith.constant 1.000000e-30 : f32
    %499 = vector.broadcast %cst_120 : f32 to vector<16x1xf32>
    %500 = arith.maximumf %497, %499 : vector<16x1xf32>
    %501 = arith.divf %498, %500 : vector<16x1xf32>
    %cst_121 = arith.constant 0.414213568 : f32
    %502 = vector.broadcast %cst_121 : f32 to vector<16x1xf32>
    %503 = arith.cmpf ogt, %501, %502 : vector<16x1xf32>
    %cst_122 = arith.constant 1.000000e+00 : f32
    %504 = vector.broadcast %cst_122 : f32 to vector<16x1xf32>
    %505 = arith.subf %501, %504 : vector<16x1xf32>
    %cst_123 = arith.constant 1.000000e+00 : f32
    %506 = vector.broadcast %cst_123 : f32 to vector<16x1xf32>
    %507 = arith.addf %501, %506 : vector<16x1xf32>
    %508 = arith.divf %505, %507 : vector<16x1xf32>
    %509 = arith.select %503, %508, %501 : vector<16x1xi1>, vector<16x1xf32>
    %510 = arith.mulf %509, %509 : vector<16x1xf32>
    %cst_124 = arith.constant 0.0805374458 : f32
    %511 = vector.broadcast %cst_124 : f32 to vector<16x1xf32>
    %512 = arith.mulf %511, %510 : vector<16x1xf32>
    %cst_125 = arith.constant 0.138776854 : f32
    %513 = vector.broadcast %cst_125 : f32 to vector<16x1xf32>
    %514 = arith.subf %512, %513 : vector<16x1xf32>
    %515 = arith.mulf %514, %510 : vector<16x1xf32>
    %cst_126 = arith.constant 0.199777111 : f32
    %516 = vector.broadcast %cst_126 : f32 to vector<16x1xf32>
    %517 = arith.addf %515, %516 : vector<16x1xf32>
    %518 = arith.mulf %517, %510 : vector<16x1xf32>
    %cst_127 = arith.constant 0.333329499 : f32
    %519 = vector.broadcast %cst_127 : f32 to vector<16x1xf32>
    %520 = arith.subf %518, %519 : vector<16x1xf32>
    %521 = arith.mulf %520, %510 : vector<16x1xf32>
    %522 = arith.mulf %521, %509 : vector<16x1xf32>
    %523 = arith.addf %522, %509 : vector<16x1xf32>
    %cst_128 = arith.constant 0.785398185 : f32
    %524 = vector.broadcast %cst_128 : f32 to vector<16x1xf32>
    %525 = arith.addf %524, %523 : vector<16x1xf32>
    %526 = arith.select %503, %525, %523 : vector<16x1xi1>, vector<16x1xf32>
    %527 = arith.cmpf ogt, %496, %495 : vector<16x1xf32>
    %cst_129 = arith.constant 1.57079637 : f32
    %528 = vector.broadcast %cst_129 : f32 to vector<16x1xf32>
    %529 = arith.subf %528, %526 : vector<16x1xf32>
    %530 = arith.select %527, %529, %526 : vector<16x1xi1>, vector<16x1xf32>
    %cst_130 = arith.constant 0.000000e+00 : f32
    %531 = vector.broadcast %cst_130 : f32 to vector<16x1xf32>
    %532 = arith.cmpf olt, %492, %531 : vector<16x1xf32>
    %cst_131 = arith.constant 3.14159274 : f32
    %533 = vector.broadcast %cst_131 : f32 to vector<16x1xf32>
    %534 = arith.subf %533, %530 : vector<16x1xf32>
    %535 = arith.select %532, %534, %530 : vector<16x1xi1>, vector<16x1xf32>
    %cst_132 = arith.constant 0.000000e+00 : f32
    %536 = vector.broadcast %cst_132 : f32 to vector<16x1xf32>
    %537 = arith.cmpf olt, %493, %536 : vector<16x1xf32>
    %cst_133 = arith.constant 0.000000e+00 : f32
    %538 = vector.broadcast %cst_133 : f32 to vector<16x1xf32>
    %539 = arith.subf %538, %535 : vector<16x1xf32>
    %540 = arith.select %537, %539, %535 : vector<16x1xi1>, vector<16x1xf32>
    %541 = math.absf %492 : vector<16x1xf32>
    %542 = math.absf %494 : vector<16x1xf32>
    %543 = arith.maximumf %541, %542 : vector<16x1xf32>
    %544 = arith.minimumf %541, %542 : vector<16x1xf32>
    %cst_134 = arith.constant 1.000000e-30 : f32
    %545 = vector.broadcast %cst_134 : f32 to vector<16x1xf32>
    %546 = arith.maximumf %543, %545 : vector<16x1xf32>
    %547 = arith.divf %544, %546 : vector<16x1xf32>
    %cst_135 = arith.constant 0.414213568 : f32
    %548 = vector.broadcast %cst_135 : f32 to vector<16x1xf32>
    %549 = arith.cmpf ogt, %547, %548 : vector<16x1xf32>
    %cst_136 = arith.constant 1.000000e+00 : f32
    %550 = vector.broadcast %cst_136 : f32 to vector<16x1xf32>
    %551 = arith.subf %547, %550 : vector<16x1xf32>
    %cst_137 = arith.constant 1.000000e+00 : f32
    %552 = vector.broadcast %cst_137 : f32 to vector<16x1xf32>
    %553 = arith.addf %547, %552 : vector<16x1xf32>
    %554 = arith.divf %551, %553 : vector<16x1xf32>
    %555 = arith.select %549, %554, %547 : vector<16x1xi1>, vector<16x1xf32>
    %556 = arith.mulf %555, %555 : vector<16x1xf32>
    %cst_138 = arith.constant 0.0805374458 : f32
    %557 = vector.broadcast %cst_138 : f32 to vector<16x1xf32>
    %558 = arith.mulf %557, %556 : vector<16x1xf32>
    %cst_139 = arith.constant 0.138776854 : f32
    %559 = vector.broadcast %cst_139 : f32 to vector<16x1xf32>
    %560 = arith.subf %558, %559 : vector<16x1xf32>
    %561 = arith.mulf %560, %556 : vector<16x1xf32>
    %cst_140 = arith.constant 0.199777111 : f32
    %562 = vector.broadcast %cst_140 : f32 to vector<16x1xf32>
    %563 = arith.addf %561, %562 : vector<16x1xf32>
    %564 = arith.mulf %563, %556 : vector<16x1xf32>
    %cst_141 = arith.constant 0.333329499 : f32
    %565 = vector.broadcast %cst_141 : f32 to vector<16x1xf32>
    %566 = arith.subf %564, %565 : vector<16x1xf32>
    %567 = arith.mulf %566, %556 : vector<16x1xf32>
    %568 = arith.mulf %567, %555 : vector<16x1xf32>
    %569 = arith.addf %568, %555 : vector<16x1xf32>
    %cst_142 = arith.constant 0.785398185 : f32
    %570 = vector.broadcast %cst_142 : f32 to vector<16x1xf32>
    %571 = arith.addf %570, %569 : vector<16x1xf32>
    %572 = arith.select %549, %571, %569 : vector<16x1xi1>, vector<16x1xf32>
    %573 = arith.cmpf ogt, %542, %541 : vector<16x1xf32>
    %cst_143 = arith.constant 1.57079637 : f32
    %574 = vector.broadcast %cst_143 : f32 to vector<16x1xf32>
    %575 = arith.subf %574, %572 : vector<16x1xf32>
    %576 = arith.select %573, %575, %572 : vector<16x1xi1>, vector<16x1xf32>
    %cst_144 = arith.constant 0.000000e+00 : f32
    %577 = vector.broadcast %cst_144 : f32 to vector<16x1xf32>
    %578 = arith.cmpf olt, %492, %577 : vector<16x1xf32>
    %cst_145 = arith.constant 3.14159274 : f32
    %579 = vector.broadcast %cst_145 : f32 to vector<16x1xf32>
    %580 = arith.subf %579, %576 : vector<16x1xf32>
    %581 = arith.select %578, %580, %576 : vector<16x1xi1>, vector<16x1xf32>
    %cst_146 = arith.constant 0.000000e+00 : f32
    %582 = vector.broadcast %cst_146 : f32 to vector<16x1xf32>
    %583 = arith.cmpf olt, %494, %582 : vector<16x1xf32>
    %cst_147 = arith.constant 0.000000e+00 : f32
    %584 = vector.broadcast %cst_147 : f32 to vector<16x1xf32>
    %585 = arith.subf %584, %581 : vector<16x1xf32>
    %586 = arith.select %583, %585, %581 : vector<16x1xi1>, vector<16x1xf32>
    %587 = math.absf %493 : vector<16x1xf32>
    %588 = math.absf %494 : vector<16x1xf32>
    %589 = arith.maximumf %587, %588 : vector<16x1xf32>
    %590 = arith.minimumf %587, %588 : vector<16x1xf32>
    %cst_148 = arith.constant 1.000000e-30 : f32
    %591 = vector.broadcast %cst_148 : f32 to vector<16x1xf32>
    %592 = arith.maximumf %589, %591 : vector<16x1xf32>
    %593 = arith.divf %590, %592 : vector<16x1xf32>
    %cst_149 = arith.constant 0.414213568 : f32
    %594 = vector.broadcast %cst_149 : f32 to vector<16x1xf32>
    %595 = arith.cmpf ogt, %593, %594 : vector<16x1xf32>
    %cst_150 = arith.constant 1.000000e+00 : f32
    %596 = vector.broadcast %cst_150 : f32 to vector<16x1xf32>
    %597 = arith.subf %593, %596 : vector<16x1xf32>
    %cst_151 = arith.constant 1.000000e+00 : f32
    %598 = vector.broadcast %cst_151 : f32 to vector<16x1xf32>
    %599 = arith.addf %593, %598 : vector<16x1xf32>
    %600 = arith.divf %597, %599 : vector<16x1xf32>
    %601 = arith.select %595, %600, %593 : vector<16x1xi1>, vector<16x1xf32>
    %602 = arith.mulf %601, %601 : vector<16x1xf32>
    %cst_152 = arith.constant 0.0805374458 : f32
    %603 = vector.broadcast %cst_152 : f32 to vector<16x1xf32>
    %604 = arith.mulf %603, %602 : vector<16x1xf32>
    %cst_153 = arith.constant 0.138776854 : f32
    %605 = vector.broadcast %cst_153 : f32 to vector<16x1xf32>
    %606 = arith.subf %604, %605 : vector<16x1xf32>
    %607 = arith.mulf %606, %602 : vector<16x1xf32>
    %cst_154 = arith.constant 0.199777111 : f32
    %608 = vector.broadcast %cst_154 : f32 to vector<16x1xf32>
    %609 = arith.addf %607, %608 : vector<16x1xf32>
    %610 = arith.mulf %609, %602 : vector<16x1xf32>
    %cst_155 = arith.constant 0.333329499 : f32
    %611 = vector.broadcast %cst_155 : f32 to vector<16x1xf32>
    %612 = arith.subf %610, %611 : vector<16x1xf32>
    %613 = arith.mulf %612, %602 : vector<16x1xf32>
    %614 = arith.mulf %613, %601 : vector<16x1xf32>
    %615 = arith.addf %614, %601 : vector<16x1xf32>
    %cst_156 = arith.constant 0.785398185 : f32
    %616 = vector.broadcast %cst_156 : f32 to vector<16x1xf32>
    %617 = arith.addf %616, %615 : vector<16x1xf32>
    %618 = arith.select %595, %617, %615 : vector<16x1xi1>, vector<16x1xf32>
    %619 = arith.cmpf ogt, %588, %587 : vector<16x1xf32>
    %cst_157 = arith.constant 1.57079637 : f32
    %620 = vector.broadcast %cst_157 : f32 to vector<16x1xf32>
    %621 = arith.subf %620, %618 : vector<16x1xf32>
    %622 = arith.select %619, %621, %618 : vector<16x1xi1>, vector<16x1xf32>
    %cst_158 = arith.constant 0.000000e+00 : f32
    %623 = vector.broadcast %cst_158 : f32 to vector<16x1xf32>
    %624 = arith.cmpf olt, %493, %623 : vector<16x1xf32>
    %cst_159 = arith.constant 3.14159274 : f32
    %625 = vector.broadcast %cst_159 : f32 to vector<16x1xf32>
    %626 = arith.subf %625, %622 : vector<16x1xf32>
    %627 = arith.select %624, %626, %622 : vector<16x1xi1>, vector<16x1xf32>
    %cst_160 = arith.constant 0.000000e+00 : f32
    %628 = vector.broadcast %cst_160 : f32 to vector<16x1xf32>
    %629 = arith.cmpf olt, %494, %628 : vector<16x1xf32>
    %cst_161 = arith.constant 0.000000e+00 : f32
    %630 = vector.broadcast %cst_161 : f32 to vector<16x1xf32>
    %631 = arith.subf %630, %627 : vector<16x1xf32>
    %632 = arith.select %629, %631, %627 : vector<16x1xi1>, vector<16x1xf32>
    %633 = vector.broadcast %487 : vector<16x1xf32> to vector<16x8xf32>
    %634 = vector.broadcast %21 : vector<1x8xf32> to vector<16x8xf32>
    %635 = arith.mulf %633, %634 : vector<16x8xf32>
    %636 = vector.broadcast %8 : vector<1x8xf32> to vector<16x8xf32>
    %637 = arith.addf %636, %635 : vector<16x8xf32>
    %638 = vector.broadcast %479 : vector<16x1xf32> to vector<16x8xf32>
    %639 = vector.broadcast %22 : vector<1x8xf32> to vector<16x8xf32>
    %640 = arith.mulf %638, %639 : vector<16x8xf32>
    %641 = arith.addf %637, %640 : vector<16x8xf32>
    %642 = vector.broadcast %480 : vector<16x1xf32> to vector<16x8xf32>
    %643 = vector.broadcast %23 : vector<1x8xf32> to vector<16x8xf32>
    %644 = arith.mulf %642, %643 : vector<16x8xf32>
    %645 = arith.addf %641, %644 : vector<16x8xf32>
    %646 = vector.broadcast %481 : vector<16x1xf32> to vector<16x8xf32>
    %647 = vector.broadcast %24 : vector<1x8xf32> to vector<16x8xf32>
    %648 = arith.mulf %646, %647 : vector<16x8xf32>
    %649 = arith.addf %645, %648 : vector<16x8xf32>
    %650 = vector.broadcast %540 : vector<16x1xf32> to vector<16x8xf32>
    %651 = vector.broadcast %25 : vector<1x8xf32> to vector<16x8xf32>
    %652 = arith.mulf %650, %651 : vector<16x8xf32>
    %653 = arith.addf %649, %652 : vector<16x8xf32>
    %654 = vector.broadcast %586 : vector<16x1xf32> to vector<16x8xf32>
    %655 = vector.broadcast %26 : vector<1x8xf32> to vector<16x8xf32>
    %656 = arith.mulf %654, %655 : vector<16x8xf32>
    %657 = arith.addf %653, %656 : vector<16x8xf32>
    %658 = vector.broadcast %632 : vector<16x1xf32> to vector<16x8xf32>
    %659 = vector.broadcast %27 : vector<1x8xf32> to vector<16x8xf32>
    %660 = arith.mulf %658, %659 : vector<16x8xf32>
    %661 = arith.addf %657, %660 : vector<16x8xf32>
    %662 = vector.broadcast %492 : vector<16x1xf32> to vector<16x8xf32>
    %663 = vector.broadcast %28 : vector<1x8xf32> to vector<16x8xf32>
    %664 = arith.mulf %662, %663 : vector<16x8xf32>
    %665 = arith.addf %661, %664 : vector<16x8xf32>
    %666 = vector.broadcast %493 : vector<16x1xf32> to vector<16x8xf32>
    %667 = vector.broadcast %29 : vector<1x8xf32> to vector<16x8xf32>
    %668 = arith.mulf %666, %667 : vector<16x8xf32>
    %669 = arith.addf %665, %668 : vector<16x8xf32>
    %670 = vector.broadcast %494 : vector<16x1xf32> to vector<16x8xf32>
    %671 = vector.broadcast %30 : vector<1x8xf32> to vector<16x8xf32>
    %672 = arith.mulf %670, %671 : vector<16x8xf32>
    %673 = arith.addf %669, %672 : vector<16x8xf32>
    %cst_162 = arith.constant dense<0x7F800000> : vector<16xf32>
    %674 = vector.multi_reduction <minimumf>, %474, %cst_162 [1] : vector<16x16xf32> to vector<16xf32>
    %675 = vector.shape_cast %674 : vector<16xf32> to vector<16x1xf32>
    %676 = vector.broadcast %675 : vector<16x1xf32> to vector<16x16xf32>
    %677 = arith.cmpf oeq, %474, %676 : vector<16x16xf32>
    %c16_i32_163 = arith.constant 16 : i32
    %678 = vector.broadcast %c16_i32_163 : i32 to vector<16x16xi32>
    %679 = arith.select %677, %40, %678 : vector<16x16xi1>, vector<16x16xi32>
    %cst_164 = arith.constant dense<2147483647> : vector<16xi32>
    %680 = vector.multi_reduction <minsi>, %679, %cst_164 [1] : vector<16x16xi32> to vector<16xi32>
    %681 = vector.shape_cast %680 : vector<16xi32> to vector<16x1xi32>
    %682 = vector.broadcast %681 : vector<16x1xi32> to vector<16x16xi32>
    %683 = arith.cmpi eq, %40, %682 : vector<16x16xi32>
    %684 = arith.extui %683 : vector<16x16xi1> to vector<16x16xi32>
    %685 = arith.sitofp %684 : vector<16x16xi32> to vector<16x16xf32>
    %cst_165 = arith.constant dense<0.000000e+00> : vector<16x3xf32>
    %686 = tpu.matmul %685, %3, %cst_165 {dimension_numbers = #tpu.dot_dimension_numbers<[1], [0], [0], [1], [0, 0, 1, 1], [], []>} : vector<16x16xf32>, vector<16x3xf32>, vector<16x3xf32> -> vector<16x3xf32>
    %687 = arith.subf %686, %1 : vector<16x3xf32>
    %688 = vector.extract_strided_slice %687 {offsets = [0, 0], sizes = [16, 1], strides = [1, 1]} : vector<16x3xf32> to vector<16x1xf32>
    %689 = vector.extract_strided_slice %687 {offsets = [0, 1], sizes = [16, 1], strides = [1, 1]} : vector<16x3xf32> to vector<16x1xf32>
    %690 = vector.extract_strided_slice %687 {offsets = [0, 2], sizes = [16, 1], strides = [1, 1]} : vector<16x3xf32> to vector<16x1xf32>
    %691 = arith.mulf %688, %688 : vector<16x1xf32>
    %692 = arith.mulf %689, %689 : vector<16x1xf32>
    %693 = arith.addf %691, %692 : vector<16x1xf32>
    %694 = arith.mulf %690, %690 : vector<16x1xf32>
    %695 = arith.addf %693, %694 : vector<16x1xf32>
    %696 = math.sqrt %695 : vector<16x1xf32>
    %cst_166 = arith.constant 9.99999997E-7 : f32
    %697 = vector.broadcast %cst_166 : f32 to vector<16x1xf32>
    %698 = arith.addf %696, %697 : vector<16x1xf32>
    %cst_167 = arith.constant 1.000000e+00 : f32
    %699 = vector.broadcast %cst_167 : f32 to vector<16x1xf32>
    %700 = arith.divf %699, %698 : vector<16x1xf32>
    %701 = arith.mulf %688, %700 : vector<16x1xf32>
    %702 = arith.mulf %689, %700 : vector<16x1xf32>
    %703 = arith.mulf %690, %700 : vector<16x1xf32>
    %704 = math.absf %701 : vector<16x1xf32>
    %705 = math.absf %702 : vector<16x1xf32>
    %706 = arith.maximumf %704, %705 : vector<16x1xf32>
    %707 = arith.minimumf %704, %705 : vector<16x1xf32>
    %cst_168 = arith.constant 1.000000e-30 : f32
    %708 = vector.broadcast %cst_168 : f32 to vector<16x1xf32>
    %709 = arith.maximumf %706, %708 : vector<16x1xf32>
    %710 = arith.divf %707, %709 : vector<16x1xf32>
    %cst_169 = arith.constant 0.414213568 : f32
    %711 = vector.broadcast %cst_169 : f32 to vector<16x1xf32>
    %712 = arith.cmpf ogt, %710, %711 : vector<16x1xf32>
    %cst_170 = arith.constant 1.000000e+00 : f32
    %713 = vector.broadcast %cst_170 : f32 to vector<16x1xf32>
    %714 = arith.subf %710, %713 : vector<16x1xf32>
    %cst_171 = arith.constant 1.000000e+00 : f32
    %715 = vector.broadcast %cst_171 : f32 to vector<16x1xf32>
    %716 = arith.addf %710, %715 : vector<16x1xf32>
    %717 = arith.divf %714, %716 : vector<16x1xf32>
    %718 = arith.select %712, %717, %710 : vector<16x1xi1>, vector<16x1xf32>
    %719 = arith.mulf %718, %718 : vector<16x1xf32>
    %cst_172 = arith.constant 0.0805374458 : f32
    %720 = vector.broadcast %cst_172 : f32 to vector<16x1xf32>
    %721 = arith.mulf %720, %719 : vector<16x1xf32>
    %cst_173 = arith.constant 0.138776854 : f32
    %722 = vector.broadcast %cst_173 : f32 to vector<16x1xf32>
    %723 = arith.subf %721, %722 : vector<16x1xf32>
    %724 = arith.mulf %723, %719 : vector<16x1xf32>
    %cst_174 = arith.constant 0.199777111 : f32
    %725 = vector.broadcast %cst_174 : f32 to vector<16x1xf32>
    %726 = arith.addf %724, %725 : vector<16x1xf32>
    %727 = arith.mulf %726, %719 : vector<16x1xf32>
    %cst_175 = arith.constant 0.333329499 : f32
    %728 = vector.broadcast %cst_175 : f32 to vector<16x1xf32>
    %729 = arith.subf %727, %728 : vector<16x1xf32>
    %730 = arith.mulf %729, %719 : vector<16x1xf32>
    %731 = arith.mulf %730, %718 : vector<16x1xf32>
    %732 = arith.addf %731, %718 : vector<16x1xf32>
    %cst_176 = arith.constant 0.785398185 : f32
    %733 = vector.broadcast %cst_176 : f32 to vector<16x1xf32>
    %734 = arith.addf %733, %732 : vector<16x1xf32>
    %735 = arith.select %712, %734, %732 : vector<16x1xi1>, vector<16x1xf32>
    %736 = arith.cmpf ogt, %705, %704 : vector<16x1xf32>
    %cst_177 = arith.constant 1.57079637 : f32
    %737 = vector.broadcast %cst_177 : f32 to vector<16x1xf32>
    %738 = arith.subf %737, %735 : vector<16x1xf32>
    %739 = arith.select %736, %738, %735 : vector<16x1xi1>, vector<16x1xf32>
    %cst_178 = arith.constant 0.000000e+00 : f32
    %740 = vector.broadcast %cst_178 : f32 to vector<16x1xf32>
    %741 = arith.cmpf olt, %701, %740 : vector<16x1xf32>
    %cst_179 = arith.constant 3.14159274 : f32
    %742 = vector.broadcast %cst_179 : f32 to vector<16x1xf32>
    %743 = arith.subf %742, %739 : vector<16x1xf32>
    %744 = arith.select %741, %743, %739 : vector<16x1xi1>, vector<16x1xf32>
    %cst_180 = arith.constant 0.000000e+00 : f32
    %745 = vector.broadcast %cst_180 : f32 to vector<16x1xf32>
    %746 = arith.cmpf olt, %702, %745 : vector<16x1xf32>
    %cst_181 = arith.constant 0.000000e+00 : f32
    %747 = vector.broadcast %cst_181 : f32 to vector<16x1xf32>
    %748 = arith.subf %747, %744 : vector<16x1xf32>
    %749 = arith.select %746, %748, %744 : vector<16x1xi1>, vector<16x1xf32>
    %750 = math.absf %701 : vector<16x1xf32>
    %751 = math.absf %703 : vector<16x1xf32>
    %752 = arith.maximumf %750, %751 : vector<16x1xf32>
    %753 = arith.minimumf %750, %751 : vector<16x1xf32>
    %cst_182 = arith.constant 1.000000e-30 : f32
    %754 = vector.broadcast %cst_182 : f32 to vector<16x1xf32>
    %755 = arith.maximumf %752, %754 : vector<16x1xf32>
    %756 = arith.divf %753, %755 : vector<16x1xf32>
    %cst_183 = arith.constant 0.414213568 : f32
    %757 = vector.broadcast %cst_183 : f32 to vector<16x1xf32>
    %758 = arith.cmpf ogt, %756, %757 : vector<16x1xf32>
    %cst_184 = arith.constant 1.000000e+00 : f32
    %759 = vector.broadcast %cst_184 : f32 to vector<16x1xf32>
    %760 = arith.subf %756, %759 : vector<16x1xf32>
    %cst_185 = arith.constant 1.000000e+00 : f32
    %761 = vector.broadcast %cst_185 : f32 to vector<16x1xf32>
    %762 = arith.addf %756, %761 : vector<16x1xf32>
    %763 = arith.divf %760, %762 : vector<16x1xf32>
    %764 = arith.select %758, %763, %756 : vector<16x1xi1>, vector<16x1xf32>
    %765 = arith.mulf %764, %764 : vector<16x1xf32>
    %cst_186 = arith.constant 0.0805374458 : f32
    %766 = vector.broadcast %cst_186 : f32 to vector<16x1xf32>
    %767 = arith.mulf %766, %765 : vector<16x1xf32>
    %cst_187 = arith.constant 0.138776854 : f32
    %768 = vector.broadcast %cst_187 : f32 to vector<16x1xf32>
    %769 = arith.subf %767, %768 : vector<16x1xf32>
    %770 = arith.mulf %769, %765 : vector<16x1xf32>
    %cst_188 = arith.constant 0.199777111 : f32
    %771 = vector.broadcast %cst_188 : f32 to vector<16x1xf32>
    %772 = arith.addf %770, %771 : vector<16x1xf32>
    %773 = arith.mulf %772, %765 : vector<16x1xf32>
    %cst_189 = arith.constant 0.333329499 : f32
    %774 = vector.broadcast %cst_189 : f32 to vector<16x1xf32>
    %775 = arith.subf %773, %774 : vector<16x1xf32>
    %776 = arith.mulf %775, %765 : vector<16x1xf32>
    %777 = arith.mulf %776, %764 : vector<16x1xf32>
    %778 = arith.addf %777, %764 : vector<16x1xf32>
    %cst_190 = arith.constant 0.785398185 : f32
    %779 = vector.broadcast %cst_190 : f32 to vector<16x1xf32>
    %780 = arith.addf %779, %778 : vector<16x1xf32>
    %781 = arith.select %758, %780, %778 : vector<16x1xi1>, vector<16x1xf32>
    %782 = arith.cmpf ogt, %751, %750 : vector<16x1xf32>
    %cst_191 = arith.constant 1.57079637 : f32
    %783 = vector.broadcast %cst_191 : f32 to vector<16x1xf32>
    %784 = arith.subf %783, %781 : vector<16x1xf32>
    %785 = arith.select %782, %784, %781 : vector<16x1xi1>, vector<16x1xf32>
    %cst_192 = arith.constant 0.000000e+00 : f32
    %786 = vector.broadcast %cst_192 : f32 to vector<16x1xf32>
    %787 = arith.cmpf olt, %701, %786 : vector<16x1xf32>
    %cst_193 = arith.constant 3.14159274 : f32
    %788 = vector.broadcast %cst_193 : f32 to vector<16x1xf32>
    %789 = arith.subf %788, %785 : vector<16x1xf32>
    %790 = arith.select %787, %789, %785 : vector<16x1xi1>, vector<16x1xf32>
    %cst_194 = arith.constant 0.000000e+00 : f32
    %791 = vector.broadcast %cst_194 : f32 to vector<16x1xf32>
    %792 = arith.cmpf olt, %703, %791 : vector<16x1xf32>
    %cst_195 = arith.constant 0.000000e+00 : f32
    %793 = vector.broadcast %cst_195 : f32 to vector<16x1xf32>
    %794 = arith.subf %793, %790 : vector<16x1xf32>
    %795 = arith.select %792, %794, %790 : vector<16x1xi1>, vector<16x1xf32>
    %796 = math.absf %702 : vector<16x1xf32>
    %797 = math.absf %703 : vector<16x1xf32>
    %798 = arith.maximumf %796, %797 : vector<16x1xf32>
    %799 = arith.minimumf %796, %797 : vector<16x1xf32>
    %cst_196 = arith.constant 1.000000e-30 : f32
    %800 = vector.broadcast %cst_196 : f32 to vector<16x1xf32>
    %801 = arith.maximumf %798, %800 : vector<16x1xf32>
    %802 = arith.divf %799, %801 : vector<16x1xf32>
    %cst_197 = arith.constant 0.414213568 : f32
    %803 = vector.broadcast %cst_197 : f32 to vector<16x1xf32>
    %804 = arith.cmpf ogt, %802, %803 : vector<16x1xf32>
    %cst_198 = arith.constant 1.000000e+00 : f32
    %805 = vector.broadcast %cst_198 : f32 to vector<16x1xf32>
    %806 = arith.subf %802, %805 : vector<16x1xf32>
    %cst_199 = arith.constant 1.000000e+00 : f32
    %807 = vector.broadcast %cst_199 : f32 to vector<16x1xf32>
    %808 = arith.addf %802, %807 : vector<16x1xf32>
    %809 = arith.divf %806, %808 : vector<16x1xf32>
    %810 = arith.select %804, %809, %802 : vector<16x1xi1>, vector<16x1xf32>
    %811 = arith.mulf %810, %810 : vector<16x1xf32>
    %cst_200 = arith.constant 0.0805374458 : f32
    %812 = vector.broadcast %cst_200 : f32 to vector<16x1xf32>
    %813 = arith.mulf %812, %811 : vector<16x1xf32>
    %cst_201 = arith.constant 0.138776854 : f32
    %814 = vector.broadcast %cst_201 : f32 to vector<16x1xf32>
    %815 = arith.subf %813, %814 : vector<16x1xf32>
    %816 = arith.mulf %815, %811 : vector<16x1xf32>
    %cst_202 = arith.constant 0.199777111 : f32
    %817 = vector.broadcast %cst_202 : f32 to vector<16x1xf32>
    %818 = arith.addf %816, %817 : vector<16x1xf32>
    %819 = arith.mulf %818, %811 : vector<16x1xf32>
    %cst_203 = arith.constant 0.333329499 : f32
    %820 = vector.broadcast %cst_203 : f32 to vector<16x1xf32>
    %821 = arith.subf %819, %820 : vector<16x1xf32>
    %822 = arith.mulf %821, %811 : vector<16x1xf32>
    %823 = arith.mulf %822, %810 : vector<16x1xf32>
    %824 = arith.addf %823, %810 : vector<16x1xf32>
    %cst_204 = arith.constant 0.785398185 : f32
    %825 = vector.broadcast %cst_204 : f32 to vector<16x1xf32>
    %826 = arith.addf %825, %824 : vector<16x1xf32>
    %827 = arith.select %804, %826, %824 : vector<16x1xi1>, vector<16x1xf32>
    %828 = arith.cmpf ogt, %797, %796 : vector<16x1xf32>
    %cst_205 = arith.constant 1.57079637 : f32
    %829 = vector.broadcast %cst_205 : f32 to vector<16x1xf32>
    %830 = arith.subf %829, %827 : vector<16x1xf32>
    %831 = arith.select %828, %830, %827 : vector<16x1xi1>, vector<16x1xf32>
    %cst_206 = arith.constant 0.000000e+00 : f32
    %832 = vector.broadcast %cst_206 : f32 to vector<16x1xf32>
    %833 = arith.cmpf olt, %702, %832 : vector<16x1xf32>
    %cst_207 = arith.constant 3.14159274 : f32
    %834 = vector.broadcast %cst_207 : f32 to vector<16x1xf32>
    %835 = arith.subf %834, %831 : vector<16x1xf32>
    %836 = arith.select %833, %835, %831 : vector<16x1xi1>, vector<16x1xf32>
    %cst_208 = arith.constant 0.000000e+00 : f32
    %837 = vector.broadcast %cst_208 : f32 to vector<16x1xf32>
    %838 = arith.cmpf olt, %703, %837 : vector<16x1xf32>
    %cst_209 = arith.constant 0.000000e+00 : f32
    %839 = vector.broadcast %cst_209 : f32 to vector<16x1xf32>
    %840 = arith.subf %839, %836 : vector<16x1xf32>
    %841 = arith.select %838, %840, %836 : vector<16x1xi1>, vector<16x1xf32>
    %842 = vector.broadcast %696 : vector<16x1xf32> to vector<16x8xf32>
    %843 = vector.broadcast %21 : vector<1x8xf32> to vector<16x8xf32>
    %844 = arith.mulf %842, %843 : vector<16x8xf32>
    %845 = vector.broadcast %8 : vector<1x8xf32> to vector<16x8xf32>
    %846 = arith.addf %845, %844 : vector<16x8xf32>
    %847 = vector.broadcast %688 : vector<16x1xf32> to vector<16x8xf32>
    %848 = vector.broadcast %22 : vector<1x8xf32> to vector<16x8xf32>
    %849 = arith.mulf %847, %848 : vector<16x8xf32>
    %850 = arith.addf %846, %849 : vector<16x8xf32>
    %851 = vector.broadcast %689 : vector<16x1xf32> to vector<16x8xf32>
    %852 = vector.broadcast %23 : vector<1x8xf32> to vector<16x8xf32>
    %853 = arith.mulf %851, %852 : vector<16x8xf32>
    %854 = arith.addf %850, %853 : vector<16x8xf32>
    %855 = vector.broadcast %690 : vector<16x1xf32> to vector<16x8xf32>
    %856 = vector.broadcast %24 : vector<1x8xf32> to vector<16x8xf32>
    %857 = arith.mulf %855, %856 : vector<16x8xf32>
    %858 = arith.addf %854, %857 : vector<16x8xf32>
    %859 = vector.broadcast %749 : vector<16x1xf32> to vector<16x8xf32>
    %860 = vector.broadcast %25 : vector<1x8xf32> to vector<16x8xf32>
    %861 = arith.mulf %859, %860 : vector<16x8xf32>
    %862 = arith.addf %858, %861 : vector<16x8xf32>
    %863 = vector.broadcast %795 : vector<16x1xf32> to vector<16x8xf32>
    %864 = vector.broadcast %26 : vector<1x8xf32> to vector<16x8xf32>
    %865 = arith.mulf %863, %864 : vector<16x8xf32>
    %866 = arith.addf %862, %865 : vector<16x8xf32>
    %867 = vector.broadcast %841 : vector<16x1xf32> to vector<16x8xf32>
    %868 = vector.broadcast %27 : vector<1x8xf32> to vector<16x8xf32>
    %869 = arith.mulf %867, %868 : vector<16x8xf32>
    %870 = arith.addf %866, %869 : vector<16x8xf32>
    %871 = vector.broadcast %701 : vector<16x1xf32> to vector<16x8xf32>
    %872 = vector.broadcast %28 : vector<1x8xf32> to vector<16x8xf32>
    %873 = arith.mulf %871, %872 : vector<16x8xf32>
    %874 = arith.addf %870, %873 : vector<16x8xf32>
    %875 = vector.broadcast %702 : vector<16x1xf32> to vector<16x8xf32>
    %876 = vector.broadcast %29 : vector<1x8xf32> to vector<16x8xf32>
    %877 = arith.mulf %875, %876 : vector<16x8xf32>
    %878 = arith.addf %874, %877 : vector<16x8xf32>
    %879 = vector.broadcast %703 : vector<16x1xf32> to vector<16x8xf32>
    %880 = vector.broadcast %30 : vector<1x8xf32> to vector<16x8xf32>
    %881 = arith.mulf %879, %880 : vector<16x8xf32>
    %882 = arith.addf %878, %881 : vector<16x8xf32>
    %883 = tpu.concatenate %251, %462, %673, %882 in 0 : vector<16x8xf32>, vector<16x8xf32>, vector<16x8xf32>, vector<16x8xf32> -> vector<64x8xf32>
    %cst_210 = arith.constant dense<0.000000e+00> : vector<64xf32>
    %884 = vector.multi_reduction <add>, %883, %cst_210 [1] : vector<64x8xf32> to vector<64xf32>
    %885 = vector.shape_cast %884 : vector<64xf32> to vector<64x1xf32>
    %cst_211 = arith.constant 8.000000e+00 : f32
    %886 = vector.broadcast %cst_211 : f32 to vector<64x1xf32>
    %887 = arith.divf %885, %886 : vector<64x1xf32>
    %888 = vector.broadcast %887 : vector<64x1xf32> to vector<64x8xf32>
    %889 = arith.subf %883, %888 : vector<64x8xf32>
    %890 = arith.mulf %889, %889 : vector<64x8xf32>
    %cst_212 = arith.constant dense<0.000000e+00> : vector<64xf32>
    %891 = vector.multi_reduction <add>, %890, %cst_212 [1] : vector<64x8xf32> to vector<64xf32>
    %892 = vector.shape_cast %891 : vector<64xf32> to vector<64x1xf32>
    %cst_213 = arith.constant 8.000000e+00 : f32
    %893 = vector.broadcast %cst_213 : f32 to vector<64x1xf32>
    %894 = arith.divf %892, %893 : vector<64x1xf32>
    %cst_214 = arith.constant 9.99999974E-6 : f32
    %895 = vector.broadcast %cst_214 : f32 to vector<64x1xf32>
    %896 = arith.addf %894, %895 : vector<64x1xf32>
    %897 = math.rsqrt %896 : vector<64x1xf32>
    %898 = vector.broadcast %897 : vector<64x1xf32> to vector<64x8xf32>
    %899 = arith.mulf %889, %898 : vector<64x8xf32>
    %900 = vector.broadcast %9 : vector<1x8xf32> to vector<64x8xf32>
    %901 = arith.mulf %899, %900 : vector<64x8xf32>
    %902 = vector.broadcast %10 : vector<1x8xf32> to vector<64x8xf32>
    %903 = arith.addf %901, %902 : vector<64x8xf32>
    %cst_215 = arith.constant 0.000000e+00 : f32
    %904 = vector.broadcast %cst_215 : f32 to vector<64x8xf32>
    %905 = arith.maximumf %903, %904 : vector<64x8xf32>
    %c0_216 = arith.constant 0 : index
    %c0_217 = arith.constant 0 : index
    %906 = vector.load %arg5[%c0_216, %c0_217] : memref<8x16xf32, #tpu.memory_space<vmem>>, vector<8x16xf32>
    %cst_218 = arith.constant dense<0.000000e+00> : vector<64x16xf32>
    %907 = tpu.matmul %905, %906, %cst_218 {dimension_numbers = #tpu.dot_dimension_numbers<[1], [0], [0], [1], [0, 0, 1, 1], [], []>} : vector<64x8xf32>, vector<8x16xf32>, vector<64x16xf32> -> vector<64x16xf32>
    %908 = vector.broadcast %11 : vector<1x16xf32> to vector<64x16xf32>
    %909 = arith.addf %907, %908 : vector<64x16xf32>
    %cst_219 = arith.constant dense<0.000000e+00> : vector<64xf32>
    %910 = vector.multi_reduction <add>, %909, %cst_219 [1] : vector<64x16xf32> to vector<64xf32>
    %911 = vector.shape_cast %910 : vector<64xf32> to vector<64x1xf32>
    %cst_220 = arith.constant 1.600000e+01 : f32
    %912 = vector.broadcast %cst_220 : f32 to vector<64x1xf32>
    %913 = arith.divf %911, %912 : vector<64x1xf32>
    %914 = vector.broadcast %913 : vector<64x1xf32> to vector<64x16xf32>
    %915 = arith.subf %909, %914 : vector<64x16xf32>
    %916 = arith.mulf %915, %915 : vector<64x16xf32>
    %cst_221 = arith.constant dense<0.000000e+00> : vector<64xf32>
    %917 = vector.multi_reduction <add>, %916, %cst_221 [1] : vector<64x16xf32> to vector<64xf32>
    %918 = vector.shape_cast %917 : vector<64xf32> to vector<64x1xf32>
    %cst_222 = arith.constant 1.600000e+01 : f32
    %919 = vector.broadcast %cst_222 : f32 to vector<64x1xf32>
    %920 = arith.divf %918, %919 : vector<64x1xf32>
    %cst_223 = arith.constant 9.99999974E-6 : f32
    %921 = vector.broadcast %cst_223 : f32 to vector<64x1xf32>
    %922 = arith.addf %920, %921 : vector<64x1xf32>
    %923 = math.rsqrt %922 : vector<64x1xf32>
    %924 = vector.broadcast %923 : vector<64x1xf32> to vector<64x16xf32>
    %925 = arith.mulf %915, %924 : vector<64x16xf32>
    %926 = vector.broadcast %12 : vector<1x16xf32> to vector<64x16xf32>
    %927 = arith.mulf %925, %926 : vector<64x16xf32>
    %928 = vector.broadcast %13 : vector<1x16xf32> to vector<64x16xf32>
    %929 = arith.addf %927, %928 : vector<64x16xf32>
    %cst_224 = arith.constant 0.000000e+00 : f32
    %930 = vector.broadcast %cst_224 : f32 to vector<64x16xf32>
    %931 = arith.maximumf %929, %930 : vector<64x16xf32>
    %c0_225 = arith.constant 0 : index
    %c0_226 = arith.constant 0 : index
    %932 = vector.load %arg6[%c0_225, %c0_226] : memref<16x32xf32, #tpu.memory_space<vmem>>, vector<16x32xf32>
    %cst_227 = arith.constant dense<0.000000e+00> : vector<64x32xf32>
    %933 = tpu.matmul %931, %932, %cst_227 {dimension_numbers = #tpu.dot_dimension_numbers<[1], [0], [0], [1], [0, 0, 1, 1], [], []>} : vector<64x16xf32>, vector<16x32xf32>, vector<64x32xf32> -> vector<64x32xf32>
    %934 = vector.broadcast %14 : vector<1x32xf32> to vector<64x32xf32>
    %935 = arith.addf %933, %934 : vector<64x32xf32>
    %cst_228 = arith.constant dense<0.000000e+00> : vector<64xf32>
    %936 = vector.multi_reduction <add>, %935, %cst_228 [1] : vector<64x32xf32> to vector<64xf32>
    %937 = vector.shape_cast %936 : vector<64xf32> to vector<64x1xf32>
    %cst_229 = arith.constant 3.200000e+01 : f32
    %938 = vector.broadcast %cst_229 : f32 to vector<64x1xf32>
    %939 = arith.divf %937, %938 : vector<64x1xf32>
    %940 = vector.broadcast %939 : vector<64x1xf32> to vector<64x32xf32>
    %941 = arith.subf %935, %940 : vector<64x32xf32>
    %942 = arith.mulf %941, %941 : vector<64x32xf32>
    %cst_230 = arith.constant dense<0.000000e+00> : vector<64xf32>
    %943 = vector.multi_reduction <add>, %942, %cst_230 [1] : vector<64x32xf32> to vector<64xf32>
    %944 = vector.shape_cast %943 : vector<64xf32> to vector<64x1xf32>
    %cst_231 = arith.constant 3.200000e+01 : f32
    %945 = vector.broadcast %cst_231 : f32 to vector<64x1xf32>
    %946 = arith.divf %944, %945 : vector<64x1xf32>
    %cst_232 = arith.constant 9.99999974E-6 : f32
    %947 = vector.broadcast %cst_232 : f32 to vector<64x1xf32>
    %948 = arith.addf %946, %947 : vector<64x1xf32>
    %949 = math.rsqrt %948 : vector<64x1xf32>
    %950 = vector.broadcast %949 : vector<64x1xf32> to vector<64x32xf32>
    %951 = arith.mulf %941, %950 : vector<64x32xf32>
    %952 = vector.broadcast %15 : vector<1x32xf32> to vector<64x32xf32>
    %953 = arith.mulf %951, %952 : vector<64x32xf32>
    %954 = vector.broadcast %16 : vector<1x32xf32> to vector<64x32xf32>
    %955 = arith.addf %953, %954 : vector<64x32xf32>
    %956 = vector.extract_strided_slice %955 {offsets = [0, 0], sizes = [16, 32], strides = [1, 1]} : vector<64x32xf32> to vector<16x32xf32>
    %957 = vector.extract_strided_slice %955 {offsets = [16, 0], sizes = [16, 32], strides = [1, 1]} : vector<64x32xf32> to vector<16x32xf32>
    %958 = arith.addf %956, %957 : vector<16x32xf32>
    %959 = vector.extract_strided_slice %955 {offsets = [32, 0], sizes = [16, 32], strides = [1, 1]} : vector<64x32xf32> to vector<16x32xf32>
    %960 = arith.addf %958, %959 : vector<16x32xf32>
    %961 = vector.extract_strided_slice %955 {offsets = [48, 0], sizes = [16, 32], strides = [1, 1]} : vector<64x32xf32> to vector<16x32xf32>
    %962 = arith.addf %960, %961 : vector<16x32xf32>
    %cst_233 = arith.constant 2.500000e-01 : f32
    %963 = vector.broadcast %cst_233 : f32 to vector<16x32xf32>
    %964 = arith.mulf %962, %963 : vector<16x32xf32>
    %c0_234 = arith.constant 0 : index
    %c0_235 = arith.constant 0 : index
    %965 = vector.load %arg7[%c0_234, %c0_235] : memref<32x32xf32, #tpu.memory_space<vmem>>, vector<32x32xf32>
    %cst_236 = arith.constant dense<0.000000e+00> : vector<16x32xf32>
    %966 = tpu.matmul %964, %965, %cst_236 {dimension_numbers = #tpu.dot_dimension_numbers<[1], [0], [0], [1], [0, 0, 1, 1], [], []>} : vector<16x32xf32>, vector<32x32xf32>, vector<16x32xf32> -> vector<16x32xf32>
    %967 = vector.broadcast %17 : vector<1x32xf32> to vector<16x32xf32>
    %968 = arith.addf %966, %967 : vector<16x32xf32>
    %cst_237 = arith.constant dense<0.000000e+00> : vector<16xf32>
    %969 = vector.multi_reduction <add>, %968, %cst_237 [1] : vector<16x32xf32> to vector<16xf32>
    %970 = vector.shape_cast %969 : vector<16xf32> to vector<16x1xf32>
    %cst_238 = arith.constant 3.200000e+01 : f32
    %971 = vector.broadcast %cst_238 : f32 to vector<16x1xf32>
    %972 = arith.divf %970, %971 : vector<16x1xf32>
    %973 = vector.broadcast %972 : vector<16x1xf32> to vector<16x32xf32>
    %974 = arith.subf %968, %973 : vector<16x32xf32>
    %975 = arith.mulf %974, %974 : vector<16x32xf32>
    %cst_239 = arith.constant dense<0.000000e+00> : vector<16xf32>
    %976 = vector.multi_reduction <add>, %975, %cst_239 [1] : vector<16x32xf32> to vector<16xf32>
    %977 = vector.shape_cast %976 : vector<16xf32> to vector<16x1xf32>
    %cst_240 = arith.constant 3.200000e+01 : f32
    %978 = vector.broadcast %cst_240 : f32 to vector<16x1xf32>
    %979 = arith.divf %977, %978 : vector<16x1xf32>
    %cst_241 = arith.constant 9.99999974E-6 : f32
    %980 = vector.broadcast %cst_241 : f32 to vector<16x1xf32>
    %981 = arith.addf %979, %980 : vector<16x1xf32>
    %982 = math.rsqrt %981 : vector<16x1xf32>
    %983 = vector.broadcast %982 : vector<16x1xf32> to vector<16x32xf32>
    %984 = arith.mulf %974, %983 : vector<16x32xf32>
    %985 = vector.broadcast %18 : vector<1x32xf32> to vector<16x32xf32>
    %986 = arith.mulf %984, %985 : vector<16x32xf32>
    %987 = vector.broadcast %19 : vector<1x32xf32> to vector<16x32xf32>
    %988 = arith.addf %986, %987 : vector<16x32xf32>
    %cst_242 = arith.constant 0.000000e+00 : f32
    %989 = vector.broadcast %cst_242 : f32 to vector<16x32xf32>
    %990 = arith.maximumf %988, %989 : vector<16x32xf32>
    %c0_243 = arith.constant 0 : index
    %c0_244 = arith.constant 0 : index
    %991 = vector.load %arg8[%c0_243, %c0_244] : memref<32x32xf32, #tpu.memory_space<vmem>>, vector<32x32xf32>
    %cst_245 = arith.constant dense<0.000000e+00> : vector<16x32xf32>
    %992 = tpu.matmul %990, %991, %cst_245 {dimension_numbers = #tpu.dot_dimension_numbers<[1], [0], [0], [1], [0, 0, 1, 1], [], []>} : vector<16x32xf32>, vector<32x32xf32>, vector<16x32xf32> -> vector<16x32xf32>
    %993 = vector.broadcast %20 : vector<1x32xf32> to vector<16x32xf32>
    %994 = arith.addf %992, %993 : vector<16x32xf32>
    %c0_246 = arith.constant 0 : index
    %c0_247 = arith.constant 0 : index
    %c0_248 = arith.constant 0 : index
    %995 = vector.load %arg12[%c0_246, %c0_247, %c0_248] : memref<1x16x32xf32, #tpu.memory_space<vmem>>, vector<1x16x32xf32>
    %996 = vector.shape_cast %995 : vector<1x16x32xf32> to vector<16x32xf32>
    %997 = vector.shape_cast %994 : vector<16x32xf32> to vector<1x16x32xf32>
    tpu.vector_store %arg12[%c0_246, %c0_247, %c0_248], %997 {strides = array<i32>} : memref<1x16x32xf32, #tpu.memory_space<vmem>>, vector<1x16x32xf32>,
    return
  }
  func.func @transform_0(%arg0: i32, %arg1: i32) -> (i32, i32, i32) {
    %c0_i32 = arith.constant 0 : i32
    %c0_i32_0 = arith.constant 0 : i32
    return %arg0, %arg1, %c0_i32 : i32, i32, i32
  }
  func.func @transform_1(%arg0: i32, %arg1: i32) -> (i32, i32, i32) {
    %c0_i32 = arith.constant 0 : i32
    %c0_i32_0 = arith.constant 0 : i32
    %c0_i32_1 = arith.constant 0 : i32
    return %arg0, %c0_i32, %c0_i32_0 : i32, i32, i32
  }
  func.func @transform_2(%arg0: i32, %arg1: i32) -> (i32, i32) {
    %c0_i32 = arith.constant 0 : i32
    %c0_i32_0 = arith.constant 0 : i32
    %c0_i32_1 = arith.constant 0 : i32
    return %c0_i32, %c0_i32_0 : i32, i32
  }
  func.func @transform_3(%arg0: i32, %arg1: i32) -> (i32, i32) {
    %c0_i32 = arith.constant 0 : i32
    %c0_i32_0 = arith.constant 0 : i32
    %c0_i32_1 = arith.constant 0 : i32
    return %c0_i32, %c0_i32_0 : i32, i32
  }
  func.func @transform_4(%arg0: i32, %arg1: i32) -> (i32, i32) {
    %c0_i32 = arith.constant 0 : i32
    %c0_i32_0 = arith.constant 0 : i32
    %c0_i32_1 = arith.constant 0 : i32
    return %c0_i32, %c0_i32_0 : i32, i32
  }
  func.func @transform_5(%arg0: i32, %arg1: i32) -> (i32, i32) {
    %c0_i32 = arith.constant 0 : i32
    %c0_i32_0 = arith.constant 0 : i32
    %c0_i32_1 = arith.constant 0 : i32
    return %c0_i32, %c0_i32_0 : i32, i32
  }
  func.func @transform_6(%arg0: i32, %arg1: i32) -> (i32, i32) {
    %c0_i32 = arith.constant 0 : i32
    %c0_i32_0 = arith.constant 0 : i32
    %c0_i32_1 = arith.constant 0 : i32
    return %c0_i32, %c0_i32_0 : i32, i32
  }
  func.func @transform_7(%arg0: i32, %arg1: i32) -> (i32, i32) {
    %c0_i32 = arith.constant 0 : i32
    %c0_i32_0 = arith.constant 0 : i32
    %c0_i32_1 = arith.constant 0 : i32
    return %c0_i32, %c0_i32_0 : i32, i32
  }
  func.func @transform_8(%arg0: i32, %arg1: i32) -> (i32, i32) {
    %c0_i32 = arith.constant 0 : i32
    %c0_i32_0 = arith.constant 0 : i32
    %c0_i32_1 = arith.constant 0 : i32
    return %c0_i32, %c0_i32_0 : i32, i32
  }
  func.func @transform_9(%arg0: i32, %arg1: i32) -> (i32, i32) {
    %c0_i32 = arith.constant 0 : i32
    %c0_i32_0 = arith.constant 0 : i32
    %c0_i32_1 = arith.constant 0 : i32
    return %c0_i32, %c0_i32_0 : i32, i32
  }
  func.func @transform_10(%arg0: i32, %arg1: i32) -> (i32, i32, i32) {
    %c0_i32 = arith.constant 0 : i32
    %c0_i32_0 = arith.constant 0 : i32
    return %arg0, %arg1, %c0_i32 : i32, i32, i32
  }
}

</mosaic_0001>

<bundles_post_ra>
// kernel: tpu_custom_call.1
= control target key start
LH: loop header
LB: loop body
LE: loop exit
PB: predicated region body
PF: predicated region fallthrough
CT: control target
= control target key end

     0   :  { %s7289_s0 = inlined_call_operand.vmem [shape: f32[2,16,3], index: 0, kind: input, shape index: {}]   ;;  %s7290_s1 = inlined_call_operand.vmem [shape: f32[2,16,3], index: 1, kind: input, shape index: {}]   ;;  %s7291_s2 = inlined_call_operand.vmem [shape: f32[10,8], index: 2, kind: input, shape index: {}]   ;;  %s7292_s3 = inlined_call_operand.vmem [shape: f32[8,16], index: 3, kind: input, shape index: {}]   ;;  %s7293_s4 = inlined_call_operand.vmem [shape: f32[16,32], index: 4, kind: input, shape index: {}]   ;;  %s7294_s5 = inlined_call_operand.vmem [shape: f32[32,32], index: 5, kind: input, shape index: {}]   ;;  %s7295_s6 = inlined_call_operand.vmem [shape: f32[32,32], index: 6, kind: input, shape index: {}]   ;;  %s7296_s7 = inlined_call_operand.vmem [shape: f32[3,8], index: 7, kind: input, shape index: {}]   ;;  %s7297_s8 = inlined_call_operand.vmem [shape: f32[3,16], index: 8, kind: input, shape index: {}]   ;;  %s7298_s9 = inlined_call_operand.vmem [shape: f32[7,32], index: 9, kind: input, shape index: {}]   ;;  %s7299_s10 = inlined_call_operand.hbm [shape: f32[2,16,32], index: 10, kind: output, shape index: {}]  }
   0x1   :  { %7385 = sst [smem:[#allocation42_spill]] %s7289_s0 }
   0x2   :  { %15 = vsyncpa [#allocation3], 0 }
   0x3   :  { %17 = vsyncpa [#allocation3 + $0x1], 0  ;;  %s5091_s13 = smov 0   ;;  %s5093_s14 = smov 0  }
   0x4   :  { %s5095_s15 = smov 0   ;;  %s5097_s16 = smov 0  }
   0x5   :  { %s5099_s17 = smov 0   ;;  %s5101_s18 = smov 0  }
   0x6 LB: > { %s4395_s19 = sadd.s32 4294967295, %s5023_s18   ;;  %s4396_s20 = sadd.s32 4294967294, %s5023_s18   ;;  %s5023_s18 = sphi %s5101_s18, %s23_s18   ;;  %s5019_s17 = sphi %s5099_s17, %s7515_s17   ;;  %s5015_s16 = sphi %s5097_s16, %s7514_s16   ;;  %s5011_s15 = sphi %s5095_s15, %s7513_s15   ;;  %s5007_s14 = sphi %s5093_s14, %s7512_s14   ;;  %s5003_s13 = sphi %s5091_s13, %s7511_s13  }
   0x7   : > { %s35_s21 = sadd.s32 1, %s5019_s17  ;;  %s266_s22 = sadd.s32 1, %s5011_s15 }
   0x8   : > { %p37_p0 = scmp.ge.s32.totalorder %s35_s21, 2  ;;  %p276_p1 = scmp.ne.s32.totalorder %s5011_s15, %s5007_s14 }
   0x9   : > { %p277_p2 = scmp.eq.s32.totalorder %s4395_s19, 1  ;;  %p282_p3 = scmp.ne.s32.totalorder %s5007_s14, %s5003_s13 }
   0xa   : > { %s7517_s21 = smov (%p37_p0, %s35_s21), 0  ;;  %p283_p5 = scmp.eq.s32.totalorder %s4396_s20, 1 }
   0xb   : > { %p5131_p4 = por %p277_p2, %p276_p1  ;;  %s261_s24 = ssub.s32 %s5019_s17, %s7517_s21 }
   0xc   : > { %p4399_p6 = scmp.ge.s32.totalorder %s5023_s18, 1  ;;  %p264_p7 = scmp.eq.s32.totalorder %s261_s24, 0 }
   0xd   : > { %p5138_p8 = por %p283_p5, %p282_p3  ;;  %p346_p9 = scmp.lt.s32.totalorder %s5023_s18, 3 }
   0xe   : > { %s5144_s26 = scalar_select %p264_p7, %s5011_s15, %s266_s22  }
   0xf   : > { %p347_p10 = pnand %p4399_p6, %p346_p9 }
  0x11   : > { %350 = sbr.rel (%p347_p10) target bundleno = 5739 (0x166b), region = 60 }
  0x16   : > { %p394_p11 = scmp.lt.s32.totalorder %s5015_s16, 1  ;;  %vm420_vm0 = vcmask 23552   ;;  %s7388_s0 = sld [smem:[#allocation42_spill]]  ;;  %vm433_vm1 = vcmask 31744   ;;  %vm523_vm2 = vcmask 130048   ;;  %v7300_v20 = vlaneseq }
  0x17   : > { %v5025_v50 = vmov 0.0   ;;  %s5026_s22 = smov 127   ;;  %s5027_s24 = smov 126  }
  0x18   : > { %s395_s27 = scalar_select %p394_p11, %s5015_s16, 1  ;;  %v5192_v21 = vand.u32 127, %v7300_v20 }
  0x19   : > { %s5033_s30 = smov [#allocation2]  }
  0x1a   : > { %s4522_s28 = sshll.u32 %s395_s27, 4  ;;  %s5028_s27 = smov 1  }
  0x1b   : > { %s407_s11 = scalar_lea.vmem %s7290_s1, %s4522_s28 }
  0x1c   : > { %v5151_v0 = vld [vmem:[%s407_s11 + $0x8] sm:$0xff]  ;;  %v5153_v1 = vld [vmem:[%s407_s11] sm:$0xff]  ;;  %s5169_s20 = scalar_lea.vmem %s7388_s0, %s4522_s28  ;;  %s5029_s28 = smov 2  }
  0x1d   : > { %v419_v2 = vmul.f32 %v5151_v0, %v5151_v0  ;;  %v418_v3 = vmul.f32 %v5153_v1, %v5153_v1  ;;  %4583 = vmatprep.subr.mxu1 %v5151_v0  ;;  %v5172_v6 = vld [vmem:[%s5169_s20] sm:$0xff]  ;;  %v5177_v10 = vld [vmem:[%s5169_s20 + $0x8] sm:$0xff]  ;;  %s390_s11 = sand.u32 1, %s5007_s14  }
  0x1e   : > { %4584 = vmatpush3.msra.mxu1 %v5151_v0  ;;  %v427_v7 = vmul.f32 -2.0, %v5172_v6  ;;  %v428_v12 = vmul.f32 -2.0, %v5177_v10  ;;  %s4400_s12 = sshll.u32 %s390_s11, 4  ;;  %s7244_s29 = scalar_lea.sflag [#allocation3], %s390_s11 }
  0x1f   : > { %v424_v4 = vsel %vm420_vm0, %v419_v2, 0.0  ;;  %4585 = vmatprep.subr.mxu1 %v5153_v1  ;;  %v421_v5 = vsel %vm420_vm0, %v418_v3, 0.0  ;;  %s392_s19 = scalar_lea.vmem [#allocation2], %s4400_s12  ;;  %s4951_s12 = sshll.u32 %s5033_s30, 4  ;;  %s4952_s12 = int_to_ptr.vmem [resolvable:$false] %s4951_s12 }
  0x20   : > { %425 = vadd.xlane.f32.xlu0 %v424_v4  ;;  %4586 = vmatpush3.msra.mxu1 %v5153_v1  ;;  %v429_v8 = vsel %vm420_vm0, %v427_v7, 1.0  ;;  %v430_v15 = vsel %vm420_vm0, %v428_v12, 1.0  ;;  %s4953_s0 = scalar_lea.vmem %s4952_s12, 512 }
  0x21   : > { %4590 = vmatprep.subr.mxu1 %v5151_v0  ;;  %4580 = vmatprep.mubr.msk.f32.mxu0 %vm433_vm1, %v429_v8 }
  0x24   : > { %422 = vadd.xlane.f32.xlu0 %v421_v5 }
  0xa9   : > { %v426_v9 = vpop.xlane.xlu0 %425 }
  0xaa   : > { %v432_v11 = vsel %vm420_vm0, %v5151_v0, %v426_v9 }
  0xab   : > { %4576 = vmatprep.subr.msk.mxu0 %vm433_vm1, %v432_v11 }
  0xac   : > { %4577 = vmatpush3.xpose.msk.msra.mxu0 %vm433_vm1, %v432_v11 }
  0xad   : > { %v423_v13 = vpop.xlane.xlu0 %422 }
  0xae   : > { %v431_v14 = vsel %vm420_vm0, %v5153_v1, %v423_v13 }
  0xaf   : > { %4578 = vmatprep.subr.msk.mxu0 %vm433_vm1, %v431_v14 }
  0xb0   : > { %4579 = vmatpush3.xpose.msk.msra.mxu0 %vm433_vm1, %v431_v14 }
  0xb1   : > { %4597 = vmatprep.subr.mxu0 %v5151_v0 }
  0xb3   : > { %4581 = vmatmul.mubr.msk.f32.vlgmr.msra.gmra.mxu0 %vm433_vm1, %v430_v15 }
  0xb4   : > { %4598 = vmatpush3.msra.mxu0 %v5151_v0 }
  0xb5   : > { %4599 = vmatprep.subr.mxu0 %v5153_v1 }
  0xb6   : > { %4600 = vmatpush3.msra.mxu0 %v5153_v1 }
 0x173   : > { %v4582_v16 = vpop.f32.mrf.mxu0 }
 0x174   : > { %v527_v19 = vsel %vm523_vm2, %v4582_v16, inf }
 0x175   : > { %v512_v17 = vpop.f32.mrf.mxu0 }
 0x176   : > { %v524_v18 = vsel %vm523_vm2, %v512_v17, inf }
 0x177   : > { %525 = vmin.xlane.f32.xlu1 %v524_v18 }
 0x17b   : > { %528 = vmin.xlane.f32.xlu1 %v527_v19 }
 0x200   : > { %v526_v22 = vpop.xlane.xlu1 %525 }
 0x201   : > { %vm530_vm3 = vcmp.eq.f32.partialorder %v512_v17, %v526_v22 }
 0x202   : > { %v532_v23 = vsel %vm530_vm3, %v5192_v21, 16 }
 0x203   : > { %v534_v24 = vsel %vm523_vm2, %v532_v23, 2147483647 }
 0x204   : > { %v529_v25 = vpop.xlane.xlu1 %528  ;;  %v536_v26 = vshra.s32 %v534_v24, 16  ;;  %v535_v32 = vand.u32 65535, %v534_v24 }
 0x205   : > { %vm531_vm4 = vcmp.eq.f32.partialorder %v4582_v16, %v529_v25 }
 0x206   : > { %v533_v27 = vsel %vm531_vm4, %v5192_v21, 16  ;;  %v538_v28 = vcvt.s32.f32 %v536_v26  ;;  %v537_v34 = vcvt.s32.f32 %v535_v32 }
 0x207   : > { %v549_v29 = vsel %vm523_vm2, %v533_v27, 2147483647 }
 0x208   : > { %539 = vmin.xlane.f32.xlu0 %v538_v28  ;;  %v551_v30 = vshra.s32 %v549_v29, 16  ;;  %v550_v35 = vand.u32 65535, %v549_v29 }
 0x20a   : > { %v553_v31 = vcvt.s32.f32 %v551_v30  ;;  %v552_v38 = vcvt.s32.f32 %v550_v35 }
 0x20c   : > { %554 = vmin.xlane.f32.xlu1 %v553_v31 }
 0x291   : > { %v540_v33 = vpop.xlane.xlu0 %539 }
 0x292   : > { %vm541_vm5 = vcmp.eq.f32.partialorder %v538_v28, %v540_v33  ;;  %v546_v40 = vcvt.f32.s32 %v540_v33 }
 0x293   : > { %v542_v36 = vsel %vm541_vm5, %v537_v34, inf }
 0x294   : > { %543 = vmin.xlane.f32.xlu0 %v542_v36  ;;  %v547_v42 = vshll.u32 %v546_v40, 16 }
 0x295   : > { %v555_v37 = vpop.xlane.xlu1 %554 }
 0x296   : > { %vm556_vm6 = vcmp.eq.f32.partialorder %v553_v31, %v555_v37  ;;  %v561_v43 = vcvt.f32.s32 %v555_v37 }
 0x297   : > { %v557_v39 = vsel %vm556_vm6, %v552_v38, inf }
 0x298   : > { %558 = vmin.xlane.f32.xlu1 %v557_v39  ;;  %v562_v47 = vshll.u32 %v561_v43, 16 }
 0x31d   : > { %v544_v41 = vpop.xlane.xlu0 %543 }
 0x31e   : > { %v545_v44 = vcvt.f32.s32 %v544_v41 }
 0x320   : > { %v548_v45 = vadd.s32 %v547_v42, %v545_v44 }
 0x321   : > { %v559_v46 = vpop.xlane.xlu1 %558 }
 0x322   : > { %v560_v48 = vcvt.f32.s32 %v559_v46  ;;  %vm564_vm7 = vcmp.eq.s32.totalorder %v5192_v21, %v548_v45 }
 0x323   : > { %v566_v49 = vsel %vm564_vm7, 1e+30, %v512_v17  ;;  %v4409_v51 = vsel %vm564_vm7, 1.0, %v5025_v50 }
 0x324   : > { %v563_v52 = vadd.s32 %v562_v47, %v560_v48  ;;  %4587 = vmatprep.mubr.msk.f32.mxu1 %vm523_vm2, %v4409_v51  ;;  %v1273_v53 = vsel %vm523_vm2, %v566_v49, inf }
 0x325   : > { %1274 = vmin.xlane.f32.xlu0 %v1273_v53 }
 0x326   : > { %vm565_vm8 = vcmp.eq.s32.totalorder %v5192_v21, %v563_v52 }
 0x327   : > { %v4410_v54 = vsel %vm565_vm8, 1.0, %v5025_v50  ;;  %v567_v55 = vsel %vm565_vm8, 1e+30, %v4582_v16 }
 0x328   : > { %4588 = vmatmul.mubr.msk.f32.vlgmr.msra.gmra.mxu1 %vm523_vm2, %v4410_v54  ;;  %v1276_v56 = vsel %vm523_vm2, %v567_v55, inf }
 0x329   : > { %1277 = vmin.xlane.f32.xlu1 %v1276_v56  ;;  %4591 = vmatpush3.msra.mxu1 %v5151_v0 }
 0x32a   : > { %4592 = vmatprep.subr.mxu1 %v5153_v1 }
 0x32b   : > { %4593 = vmatpush3.msra.mxu1 %v5153_v1 }
 0x32c   : > { %4604 = vmatprep.subr.mxu1 %v5151_v0 }
 0x3ae   : > { %v1275_v57 = vpop.xlane.xlu0 %1274 }
 0x3af   : > { %vm1279_vm9 = vcmp.eq.f32.partialorder %v566_v49, %v1275_v57 }
 0x3b0   : > { %v1281_v58 = vsel %vm1279_vm9, %v5192_v21, 16 }
 0x3b1   : > { %v1283_v59 = vsel %vm523_vm2, %v1281_v58, 2147483647 }
 0x3b2   : > { %v1278_v60 = vpop.xlane.xlu1 %1277  ;;  %v1285_v61 = vshra.s32 %v1283_v59, 16  ;;  %v1284_v5 = vand.u32 65535, %v1283_v59 }
 0x3b3   : > { %vm1280_vm10 = vcmp.eq.f32.partialorder %v567_v55, %v1278_v60 }
 0x3b4   : > { %v1282_v62 = vsel %vm1280_vm10, %v5192_v21, 16  ;;  %v1287_v63 = vcvt.s32.f32 %v1285_v61  ;;  %v1286_v8 = vcvt.s32.f32 %v1284_v5 }
 0x3b5   : > { %v1298_v2 = vsel %vm523_vm2, %v1282_v62, 2147483647 }
 0x3b6   : > { %1288 = vmin.xlane.f32.xlu0 %v1287_v63  ;;  %v1300_v3 = vshra.s32 %v1298_v2, 16  ;;  %v1299_v9 = vand.u32 65535, %v1298_v2 }
 0x3b8   : > { %v1302_v4 = vcvt.s32.f32 %v1300_v3  ;;  %v1301_v13 = vcvt.s32.f32 %v1299_v9 }
 0x3ba   : > { %1303 = vmin.xlane.f32.xlu1 %v1302_v4 }
 0x43f   : > { %v1289_v7 = vpop.xlane.xlu0 %1288 }
 0x440   : > { %vm1290_vm11 = vcmp.eq.f32.partialorder %v1287_v63, %v1289_v7  ;;  %v1295_v15 = vcvt.f32.s32 %v1289_v7 }
 0x441   : > { %v1291_v11 = vsel %vm1290_vm11, %v1286_v8, inf }
 0x442   : > { %1292 = vmin.xlane.f32.xlu0 %v1291_v11  ;;  %v1296_v17 = vshll.u32 %v1295_v15, 16 }
 0x443   : > { %v1304_v12 = vpop.xlane.xlu1 %1303 }
 0x444   : > { %vm1305_vm12 = vcmp.eq.f32.partialorder %v1302_v4, %v1304_v12  ;;  %v1310_v18 = vcvt.f32.s32 %v1304_v12 }
 0x445   : > { %v1306_v14 = vsel %vm1305_vm12, %v1301_v13, inf }
 0x446   : > { %1307 = vmin.xlane.f32.xlu1 %v1306_v14  ;;  %v1311_v24 = vshll.u32 %v1310_v18, 16 }
 0x4cb   : > { %v1293_v16 = vpop.xlane.xlu0 %1292 }
 0x4cc   : > { %v1294_v19 = vcvt.f32.s32 %v1293_v16 }
 0x4ce   : > { %v1297_v22 = vadd.s32 %v1296_v17, %v1294_v19 }
 0x4cf   : > { %v1308_v23 = vpop.xlane.xlu1 %1307 }
 0x4d0   : > { %v1309_v25 = vcvt.f32.s32 %v1308_v23  ;;  %vm1313_vm13 = vcmp.eq.s32.totalorder %v5192_v21, %v1297_v22 }
 0x4d1   : > { %v4431_v26 = vsel %vm1313_vm13, 1.0, %v5025_v50  ;;  %v1315_v27 = vsel %vm1313_vm13, 1e+30, %v566_v49 }
 0x4d2   : > { %v1312_v28 = vadd.s32 %v1311_v24, %v1309_v25  ;;  %4594 = vmatprep.mubr.msk.f32.mxu1 %vm523_vm2, %v4431_v26  ;;  %v1978_v29 = vsel %vm523_vm2, %v1315_v27, inf  ;;  %v4589_v26 = vpop.f32.mrf.mxu1 }
 0x4d3   : > { %1979 = vmin.xlane.f32.xlu0 %v1978_v29  ;;  %v5242_v29 = vsub.f32 %v4589_v26, %v5177_v10 }
 0x4d4   : > { %vm1314_vm14 = vcmp.eq.s32.totalorder %v5192_v21, %v1312_v28 }
 0x4d5   : > { %v4432_v30 = vsel %vm1314_vm14, 1.0, %v5025_v50  ;;  %v1316_v31 = vsel %vm1314_vm14, 1e+30, %v567_v55  ;;  %7389 = vst [vmem:[#allocation5_spill] sm:$0xff] %v5242_v29 }
 0x4d6   : > { %4595 = vmatmul.mubr.msk.f32.vlgmr.msra.gmra.mxu1 %vm523_vm2, %v4432_v30  ;;  %v1981_v32 = vsel %vm523_vm2, %v1316_v31, inf }
 0x4d7   : > { %1982 = vmin.xlane.f32.xlu1 %v1981_v32  ;;  %4605 = vmatpush3.msra.mxu1 %v5151_v0  ;;  %v656_v32 = vmul.f32 %v5242_v29, %v5242_v29 }
 0x4d8   : > { %4606 = vmatprep.subr.mxu1 %v5153_v1 }
 0x4d9   : > { %4607 = vmatpush3.msra.mxu1 %v5153_v1 }
 0x55c   : > { %v1980_v33 = vpop.xlane.xlu0 %1979 }
 0x55d   : > { %vm1984_vm15 = vcmp.eq.f32.partialorder %v1315_v27, %v1980_v33 }
 0x55e   : > { %v1986_v34 = vsel %vm1984_vm15, %v5192_v21, 16 }
 0x55f   : > { %v1988_v35 = vsel %vm523_vm2, %v1986_v34, 2147483647 }
 0x560   : > { %v1983_v36 = vpop.xlane.xlu1 %1982  ;;  %v1990_v37 = vshra.s32 %v1988_v35, 16  ;;  %v1989_v42 = vand.u32 65535, %v1988_v35 }
 0x561   : > { %vm1985_vm0 = vcmp.eq.f32.partialorder %v1316_v31, %v1983_v36 }
 0x562   : > { %v1987_v38 = vsel %vm1985_vm0, %v5192_v21, 16  ;;  %v1992_v39 = vcvt.s32.f32 %v1990_v37  ;;  %v1991_v43 = vcvt.s32.f32 %v1989_v42 }
 0x563   : > { %v2003_v40 = vsel %vm523_vm2, %v1987_v38, 2147483647 }
 0x564   : > { %1993 = vmin.xlane.f32.xlu0 %v1992_v39  ;;  %v2005_v0 = vshra.s32 %v2003_v40, 16  ;;  %v2004_v44 = vand.u32 65535, %v2003_v40 }
 0x566   : > { %v2007_v41 = vcvt.s32.f32 %v2005_v0  ;;  %v2006_v47 = vcvt.s32.f32 %v2004_v44 }
 0x568   : > { %2008 = vmin.xlane.f32.xlu1 %v2007_v41 }
 0x5ed   : > { %v1994_v1 = vpop.xlane.xlu0 %1993 }
 0x5ee   : > { %vm1995_vm1 = vcmp.eq.f32.partialorder %v1992_v39, %v1994_v1  ;;  %v2000_v49 = vcvt.f32.s32 %v1994_v1 }
 0x5ef   : > { %v1996_v45 = vsel %vm1995_vm1, %v1991_v43, inf }
 0x5f0   : > { %1997 = vmin.xlane.f32.xlu0 %v1996_v45  ;;  %v2001_v52 = vshll.u32 %v2000_v49, 16 }
 0x5f1   : > { %v2009_v46 = vpop.xlane.xlu1 %2008 }
 0x5f2   : > { %vm2010_vm3 = vcmp.eq.f32.partialorder %v2007_v41, %v2009_v46  ;;  %v2015_v53 = vcvt.f32.s32 %v2009_v46 }
 0x5f3   : > { %v2011_v48 = vsel %vm2010_vm3, %v2006_v47, inf }
 0x5f4   : > { %2012 = vmin.xlane.f32.xlu1 %v2011_v48  ;;  %v2016_v57 = vshll.u32 %v2015_v53, 16 }
 0x679   : > { %v1998_v51 = vpop.xlane.xlu0 %1997 }
 0x67a   : > { %v1999_v54 = vcvt.f32.s32 %v1998_v51 }
 0x67c   : > { %v2002_v55 = vadd.s32 %v2001_v52, %v1999_v54 }
 0x67d   : > { %v2013_v56 = vpop.xlane.xlu1 %2012 }
 0x67e   : > { %v2014_v58 = vcvt.f32.s32 %v2013_v56  ;;  %vm2018_vm4 = vcmp.eq.s32.totalorder %v5192_v21, %v2002_v55 }
 0x67f   : > { %v4453_v59 = vsel %vm2018_vm4, 1.0, %v5025_v50  ;;  %v2020_v60 = vsel %vm2018_vm4, 1e+30, %v1315_v27  ;;  %v644_v27 = vpop.f32.mrf.mxu1 }
 0x680   : > { %v2017_v61 = vadd.s32 %v2016_v57, %v2014_v58  ;;  %4601 = vmatprep.mubr.msk.f32.mxu0 %vm523_vm2, %v4453_v59  ;;  %v2683_v62 = vsel %vm523_vm2, %v2020_v60, inf  ;;  %v5245_v30 = vsub.f32 %v644_v27, %v5172_v6 }
 0x681   : > { %2684 = vmin.xlane.f32.xlu0 %v2683_v62  ;;  %v4596_v28 = vpop.f32.mrf.mxu1 }
 0x682   : > { %vm2019_vm5 = vcmp.eq.s32.totalorder %v5192_v21, %v2017_v61  ;;  %7390 = vst [vmem:[#allocation6_spill] sm:$0xff] %v5245_v30  ;;  %v655_v34 = vmul.f32 %v5245_v30, %v5245_v30  ;;  %v5261_v38 = vsub.f32 %v4596_v28, %v5177_v10 }
 0x683   : > { %v4454_v63 = vsel %vm2019_vm5, 1.0, %v5025_v50  ;;  %v2021_v2 = vsel %vm2019_vm5, 1e+30, %v1316_v31  ;;  %v1393_v31 = vpop.f32.mrf.mxu1 }
 0x684   : > { %4602 = vmatmul.mubr.msk.f32.vlgmr.msra.gmra.mxu0 %vm523_vm2, %v4454_v63  ;;  %v2686_v3 = vsel %vm523_vm2, %v2021_v2, inf  ;;  %v5250_v33 = vsub.f32 %v1393_v31, %v5172_v6  ;;  %7392 = vst [vmem:[#allocation8_spill] sm:$0xff] %v5261_v38  ;;  %v1405_v40 = vmul.f32 %v5261_v38, %v5261_v38 }
 0x685   : > { %2687 = vmin.xlane.f32.xlu1 %v2686_v3 }
 0x686   : > { %7391 = vst [vmem:[#allocation7_spill] sm:$0xff] %v5250_v33  ;;  %v1404_v36 = vmul.f32 %v5250_v33, %v5250_v33 }
 0x70a   : > { %v2685_v4 = vpop.xlane.xlu0 %2684 }
 0x70b   : > { %vm2689_vm6 = vcmp.eq.f32.partialorder %v2020_v60, %v2685_v4 }
 0x70c   : > { %v2691_v5 = vsel %vm2689_vm6, %v5192_v21, 16 }
 0x70d   : > { %v2693_v7 = vsel %vm523_vm2, %v2691_v5, 2147483647 }
 0x70e   : > { %v2688_v8 = vpop.xlane.xlu1 %2687  ;;  %v2695_v9 = vshra.s32 %v2693_v7, 16  ;;  %v2694_v16 = vand.u32 65535, %v2693_v7 }
 0x70f   : > { %vm2690_vm7 = vcmp.eq.f32.partialorder %v2021_v2, %v2688_v8 }
 0x710   : > { %v2692_v11 = vsel %vm2690_vm7, %v5192_v21, 16  ;;  %v2697_v12 = vcvt.s32.f32 %v2695_v9  ;;  %v2696_v18 = vcvt.s32.f32 %v2694_v16 }
 0x711   : > { %v2708_v13 = vsel %vm523_vm2, %v2692_v11, 2147483647 }
 0x712   : > { %2698 = vmin.xlane.f32.xlu0 %v2697_v12  ;;  %v2710_v14 = vshra.s32 %v2708_v13, 16  ;;  %v2709_v19 = vand.u32 65535, %v2708_v13 }
 0x714   : > { %v2712_v15 = vcvt.s32.f32 %v2710_v14  ;;  %v2711_v24 = vcvt.s32.f32 %v2709_v19 }
 0x716   : > { %2713 = vmin.xlane.f32.xlu1 %v2712_v15 }
 0x744   : > { %v4603_v35 = vpop.f32.mrf.mxu0 }
 0x745   : > { %v5278_v41 = vsub.f32 %v4603_v35, %v5177_v10 }
 0x746   : > { %v2098_v37 = vpop.f32.mrf.mxu0 }
 0x747   : > { %v5264_v39 = vsub.f32 %v2098_v37, %v5172_v6  ;;  %7393 = vst [vmem:[#allocation9_spill] sm:$0xff] %v5278_v41  ;;  %v5285_v6 = vmul.f32 %v5278_v41, %v5278_v41 }
 0x749   : > { %v5272_v0 = vmul.f32 %v5264_v39, %v5264_v39 }
 0x79b   : > { %v2699_v17 = vpop.xlane.xlu0 %2698 }
 0x79c   : > { %vm2700_vm8 = vcmp.eq.f32.partialorder %v2697_v12, %v2699_v17  ;;  %v2705_v42 = vcvt.f32.s32 %v2699_v17 }
 0x79d   : > { %v2701_v22 = vsel %vm2700_vm8, %v2696_v18, inf }
 0x79e   : > { %2702 = vmin.xlane.f32.xlu0 %v2701_v22  ;;  %v2706_v43 = vshll.u32 %v2705_v42, 16 }
 0x79f   : > { %v2714_v23 = vpop.xlane.xlu1 %2713 }
 0x7a0   : > { %vm2715_vm9 = vcmp.eq.f32.partialorder %v2712_v15, %v2714_v23  ;;  %v2720_v10 = vcvt.f32.s32 %v2714_v23 }
 0x7a1   : > { %v2716_v25 = vsel %vm2715_vm9, %v2711_v24, inf }
 0x7a2   : > { %2717 = vmin.xlane.f32.xlu1 %v2716_v25  ;;  %v2721_v48 = vshll.u32 %v2720_v10, 16 }
 0x7b3   : > { %661 = vrot.lane.b32.xlu1 %v656_v32, %s5026_s22 }
 0x7b4   : > { %659 = vrot.lane.b32.xlu0 %v655_v34, %s5026_s22 }
 0x7b7   : > { %667 = vrot.lane.b32.xlu1 %v655_v34, %s5027_s24 }
 0x7b8   : > { %1408 = vrot.lane.b32.xlu0 %v1404_v36, %s5026_s22 }
 0x7bb   : > { %669 = vrot.lane.b32.xlu1 %v656_v32, %s5027_s24 }
 0x7bc   : > { %1416 = vrot.lane.b32.xlu0 %v1404_v36, %s5027_s24 }
 0x7bf   : > { %1410 = vrot.lane.b32.xlu1 %v1405_v40, %s5026_s22 }
 0x7c0   : > { %2113 = vrot.lane.b32.xlu0 %v5272_v0, %s5026_s22 }
 0x7c3   : > { %1418 = vrot.lane.b32.xlu1 %v1405_v40, %s5027_s24 }
 0x7c4   : > { %2121 = vrot.lane.b32.xlu0 %v5272_v0, %s5027_s24 }
 0x7c7   : > { %2115 = vrot.lane.b32.xlu1 %v5285_v6, %s5026_s22 }
 0x7cb   : > { %2123 = vrot.lane.b32.xlu1 %v5285_v6, %s5027_s24 }
 0x827   : > { %v2703_v1 = vpop.xlane.xlu0 %2702 }
 0x828   : > { %v2704_v44 = vcvt.f32.s32 %v2703_v1 }
 0x82a   : > { %v2707_v45 = vadd.s32 %v2706_v43, %v2704_v44 }
 0x82b   : > { %v660_v46 = vpop.permute.xlu0 %659  ;;  %v2718_v47 = vpop.xlane.xlu1 %2717 }
 0x82c   : > { %v2719_v49 = vcvt.f32.s32 %v2718_v47  ;;  %vm2723_vm10 = vcmp.eq.s32.totalorder %v5192_v21, %v2707_v45  ;;  %v665_v56 = vadd.f32 %v660_v46, %v655_v34 }
 0x82d   : > { %v4475_v51 = vsel %vm2723_vm10, 1.0, %v5025_v50 }
 0x82e   : > { %v2722_v52 = vadd.s32 %v2721_v48, %v2719_v49  ;;  %4608 = vmatprep.mubr.msk.f32.mxu1 %vm523_vm2, %v4475_v51 }
 0x82f   : > { %v1409_v53 = vpop.permute.xlu0 %1408  ;;  %v662_v54 = vpop.permute.xlu1 %661 }
 0x830   : > { %vm2724_vm11 = vcmp.eq.s32.totalorder %v5192_v21, %v2722_v52  ;;  %v1414_v57 = vadd.f32 %v1409_v53, %v1404_v36  ;;  %v666_v62 = vadd.f32 %v662_v54, %v656_v32 }
 0x831   : > { %v4476_v55 = vsel %vm2724_vm11, 1.0, %v5025_v50 }
 0x832   : > { %4609 = vmatmul.mubr.msk.f32.vlgmr.msra.gmra.mxu1 %vm523_vm2, %v4476_v55 }
 0x833   : > { %v1417_v58 = vpop.permute.xlu0 %1416  ;;  %v668_v59 = vpop.permute.xlu1 %667 }
 0x834   : > { %v1422_v60 = vadd.f32 %v1417_v58, %v1414_v57  ;;  %v673_v61 = vadd.f32 %v668_v59, %v665_v56 }
 0x836   : > { %4765 = vrsqrt.f32 %v1422_v60  ;;  %vm677_vm12 = vcmp.eq.f32.partialorder %v673_v61, inf  ;;  %v680_v11 = vand.u32 2147483648, %v673_v61  ;;  %vm679_vm13 = vcmp.eq.f32.partialorder %v673_v61, 0.0 }
 0x837   : > { %4767 = vrsqrt.f32 %v673_v61  ;;  %v670_v63 = vpop.permute.xlu1 %669  ;;  %vm1426_vm14 = vcmp.eq.f32.partialorder %v1422_v60, inf  ;;  %v1429_v19 = vand.u32 2147483648, %v1422_v60  ;;  %vm1428_vm1 = vcmp.eq.f32.partialorder %v1422_v60, 0.0  ;;  %v5325_v1 = vpop.permute.xlu0 %2113 }
 0x838   : > { %v674_v2 = vadd.f32 %v670_v63, %v666_v62 }
 0x83a   : > { %4769 = vrsqrt.f32 %v674_v2  ;;  %vm684_vm15 = vcmp.eq.f32.partialorder %v674_v2, inf  ;;  %v687_v18 = vand.u32 2147483648, %v674_v2  ;;  %vm686_vm0 = vcmp.eq.f32.partialorder %v674_v2, 0.0 }
 0x83b   : > { %v1411_v3 = vpop.permute.xlu1 %1410  ;;  %v5329_v10 = vpop.permute.xlu0 %2121 }
 0x83c   : > { %v1415_v4 = vadd.f32 %v1411_v3, %v1405_v40 }
 0x83f   : > { %v1419_v5 = vpop.permute.xlu1 %1418 }
 0x840   : > { %v1423_v21 = vadd.f32 %v1419_v5, %v1415_v4 }
 0x842   : > { %4771 = vrsqrt.f32 %v1423_v21  ;;  %vm1433_vm3 = vcmp.eq.f32.partialorder %v1423_v21, inf  ;;  %v1436_v31 = vand.u32 2147483648, %v1423_v21  ;;  %vm1435_vm4 = vcmp.eq.f32.partialorder %v1423_v21, 0.0 }
 0x843   : > { %v4766_v50 = vpop.eup %4765  ;;  %v5327_v43 = vpop.permute.xlu1 %2115 }
 0x844   : > { %v4768_v7 = vpop.eup %4767  ;;  %v1425_v8 = vmul.f32 %v4766_v50, %v1422_v60 }
 0x845   : > { %v676_v9 = vmul.f32 %v4768_v7, %v673_v61 }
 0x846   : > { %v1427_v16 = vsel %vm1426_vm14, %v1422_v60, %v1425_v8 }
 0x847   : > { %v4770_v12 = vpop.eup %4769  ;;  %v678_v13 = vsel %vm677_vm12, %v673_v61, %v676_v9  ;;  %v5302_v24 = vsel %vm1428_vm1, %v1429_v19, %v1427_v16  ;;  %v5331_v44 = vpop.permute.xlu1 %2123 }
 0x848   : > { %v5297_v14 = vsel %vm679_vm13, %v680_v11, %v678_v13  ;;  %v683_v15 = vmul.f32 %v4770_v12, %v674_v2  ;;  %7396 = vst [vmem:[#allocation12_spill] sm:$0xff] %v5302_v24  ;;  %v1438_v27 = vadd.f32 1e-06, %v5302_v24 }
 0x849   : > { %7394 = vst [vmem:[#allocation10_spill] sm:$0xff] %v5297_v14  ;;  %v689_v17 = vadd.f32 1e-06, %v5297_v14 }
 0x84a   : > { %v685_v22 = vsel %vm684_vm15, %v674_v2, %v683_v15 }
 0x84b   : > { %4773 = vrcp.f32 %v689_v17  ;;  %v5300_v23 = vsel %vm686_vm0, %v687_v18, %v685_v22 }
 0x84c   : > { %7395 = vst [vmem:[#allocation11_spill] sm:$0xff] %v5300_v23  ;;  %v690_v25 = vadd.f32 1e-06, %v5300_v23 }
 0x84e   : > { %4775 = vrcp.f32 %v690_v25 }
 0x84f   : > { %v4772_v26 = vpop.eup %4771  ;;  %4777 = vrcp.f32 %v1438_v27 }
 0x850   : > { %v1432_v28 = vmul.f32 %v4772_v26, %v1423_v21 }
 0x852   : > { %v1434_v32 = vsel %vm1433_vm3, %v1423_v21, %v1432_v28 }
 0x853   : > { %v5306_v34 = vsel %vm1435_vm4, %v1436_v31, %v1434_v32 }
 0x854   : > { %7397 = vst [vmem:[#allocation13_spill] sm:$0xff] %v5306_v34  ;;  %v1439_v35 = vadd.f32 1e-06, %v5306_v34 }
 0x856   : > { %4779 = vrcp.f32 %v1439_v35 }
 0x858   : > { %v4774_v36 = vpop.eup %4773 }
 0x859   : > { %699 = vrot.lane.b32.xlu0 %v4774_v36, %s5028_s27  ;;  %v5410_v9 = vmul.f32 %v4774_v36, %v5245_v30 }
 0x85b   : > { %v4776_v37 = vpop.eup %4775  ;;  %7409 = vst [vmem:[#allocation25_spill] sm:$0xff] %v5410_v9  ;;  %v5417_v11 = vand.u32 2147483647, %v5410_v9 }
 0x85c   : > { %701 = vrot.lane.b32.xlu1 %v4776_v37, %s5028_s27  ;;  %v5312_v40 = vpop.eup %4777  ;;  %v5400_v7 = vmul.f32 %v4776_v37, %v5242_v29 }
 0x85d   : > { %707 = vrot.lane.b32.xlu0 %v4774_v36, %s5029_s28 }
 0x85e   : > { %7408 = vst [vmem:[#allocation24_spill] sm:$0xff] %v5400_v7  ;;  %v5407_v8 = vand.u32 2147483647, %v5400_v7 }
 0x860   : > { %709 = vrot.lane.b32.xlu1 %v4776_v37, %s5029_s28 }
 0x861   : > { %1448 = vrot.lane.b32.xlu0 %v5312_v40, %s5028_s27 }
 0x863   : > { %v5317_v42 = vpop.eup %4779 }
 0x864   : > { %1450 = vrot.lane.b32.xlu1 %v5317_v42, %s5028_s27 }
 0x865   : > { %1456 = vrot.lane.b32.xlu0 %v5312_v40, %s5029_s28 }
 0x868   : > { %1458 = vrot.lane.b32.xlu1 %v5317_v42, %s5029_s28 }
 0x8cb   : > { %v700_v45 = vpop.permute.xlu0 %699 }
 0x8cc   : > { %v5334_v46 = vmul.f32 %v700_v45, %v5245_v30 }
 0x8ce   : > { %7398 = vst [vmem:[#allocation14_spill] sm:$0xff] %v5334_v46  ;;  %v5337_v47 = vand.u32 2147483647, %v5334_v46  ;;  %v702_v48 = vpop.permute.xlu1 %701 }
 0x8cf   : > { %v708_v49 = vpop.permute.xlu0 %707  ;;  %v5340_v51 = vmul.f32 %v702_v48, %v5242_v29 }
 0x8d0   : > { %v5343_v52 = vmul.f32 %v708_v49, %v5245_v30  ;;  %721 = vrot.lane.b32.xlu0 %v5337_v47, %s5026_s22 }
 0x8d1   : > { %7399 = vst [vmem:[#allocation15_spill] sm:$0xff] %v5340_v51  ;;  %v5348_v53 = vand.u32 2147483647, %v5340_v51 }
 0x8d2   : > { %7400 = vst [vmem:[#allocation16_spill] sm:$0xff] %v5343_v52  ;;  %v5351_v54 = vand.u32 2147483647, %v5343_v52  ;;  %v710_v55 = vpop.permute.xlu1 %709 }
 0x8d3   : > { %v1449_v56 = vpop.permute.xlu0 %1448  ;;  %v5354_v57 = vmul.f32 %v710_v55, %v5242_v29  ;;  %723 = vrot.lane.b32.xlu1 %v5348_v53, %s5026_s22 }
 0x8d4   : > { %851 = vrot.lane.b32.xlu0 %v5351_v54, %s5027_s24  ;;  %v5361_v58 = vmul.f32 %v1449_v56, %v5250_v33 }
 0x8d5   : > { %7401 = vst [vmem:[#allocation17_spill] sm:$0xff] %v5354_v57  ;;  %v5364_v59 = vand.u32 2147483647, %v5354_v57 }
 0x8d6   : > { %7402 = vst [vmem:[#allocation18_spill] sm:$0xff] %v5361_v58  ;;  %v1451_v60 = vpop.permute.xlu1 %1450  ;;  %v5371_v62 = vand.u32 2147483647, %v5361_v58 }
 0x8d7   : > { %v1457_v61 = vpop.permute.xlu0 %1456  ;;  %853 = vrot.lane.b32.xlu1 %v5364_v59, %s5027_s24  ;;  %v5374_v63 = vmul.f32 %v1451_v60, %v5261_v38 }
 0x8d8   : > { %973 = vrot.lane.b32.xlu0 %v5351_v54, %s5026_s22  ;;  %v5377_v2 = vmul.f32 %v1457_v61, %v5250_v33 }
 0x8d9   : > { %7403 = vst [vmem:[#allocation19_spill] sm:$0xff] %v5374_v63  ;;  %v5384_v4 = vand.u32 2147483647, %v5374_v63 }
 0x8da   : > { %7404 = vst [vmem:[#allocation20_spill] sm:$0xff] %v5377_v2  ;;  %v1459_v3 = vpop.permute.xlu1 %1458  ;;  %v5390_v21 = vand.u32 2147483647, %v5377_v2 }
 0x8db   : > { %1470 = vrot.lane.b32.xlu1 %v5371_v62, %s5026_s22  ;;  %v5387_v5 = vmul.f32 %v1459_v3, %v5261_v38 }
 0x8dc   : > { %975 = vrot.lane.b32.xlu0 %v5364_v59, %s5026_s22  ;;  %7406 = vst [vmem:[#allocation22_spill] sm:$0xff] %v5390_v21 }
 0x8dd   : > { %7405 = vst [vmem:[#allocation21_spill] sm:$0xff] %v5387_v5  ;;  %v5397_v50 = vand.u32 2147483647, %v5387_v5 }
 0x8df   : > { %1472 = vrot.lane.b32.xlu1 %v5384_v4, %s5026_s22  ;;  %7407 = vst [vmem:[#allocation23_spill] sm:$0xff] %v5397_v50 }
 0x8e0   : > { %1600 = vrot.lane.b32.xlu0 %v5390_v21, %s5027_s24 }
 0x8e3   : > { %1602 = vrot.lane.b32.xlu1 %v5397_v50, %s5027_s24 }
 0x8e4   : > { %1722 = vrot.lane.b32.xlu0 %v5390_v21, %s5026_s22 }
 0x8e7   : > { %777 = vrot.lane.b32.xlu1 %v5407_v8, %s5028_s27 }
 0x8e8   : > { %1724 = vrot.lane.b32.xlu0 %v5397_v50, %s5026_s22 }
 0x8ec   : > { %775 = vrot.lane.b32.xlu0 %v5417_v11, %s5028_s27 }
 0x942   : > { %v722_v12 = vpop.permute.xlu0 %721 }
 0x943   : > { %v727_v13 = vmax.f32 %v5417_v11, %v722_v12  ;;  %v729_v31 = vmin.f32 %v5417_v11, %v722_v12 }
 0x945   : > { %v731_v15 = vmax.f32 %v727_v13, 1e-30  ;;  %v724_v16 = vpop.permute.xlu1 %723 }
 0x946   : > { %v852_v17 = vpop.permute.xlu0 %851  ;;  %v728_v18 = vmax.f32 %v5407_v8, %v724_v16  ;;  %v730_v36 = vmin.f32 %v5407_v8, %v724_v16  ;;  %v2120_v16 = vadd.f32 %v5327_v43, %v5285_v6 }
 0x947   : > { %4781 = vrcp.f32 %v731_v15  ;;  %v857_v19 = vmax.f32 %v5417_v11, %v852_v17  ;;  %v859_v48 = vmin.f32 %v5417_v11, %v852_v17  ;;  %v2119_v17 = vadd.f32 %v5325_v1, %v5272_v0 }
 0x948   : > { %v732_v22 = vmax.f32 %v728_v18, 1e-30  ;;  %v5446_v18 = vadd.f32 %v5331_v44, %v2120_v16 }
 0x949   : > { %v861_v25 = vmax.f32 %v857_v19, 1e-30  ;;  %v854_v26 = vpop.permute.xlu1 %853 }
 0x94a   : > { %4783 = vrcp.f32 %v732_v22  ;;  %v858_v27 = vmax.f32 %v5407_v8, %v854_v26  ;;  %v860_v61 = vmin.f32 %v5407_v8, %v854_v26  ;;  %vm2138_vm9 = vcmp.eq.f32.partialorder %v5446_v18, inf }
 0x94b   : > { %4785 = vrcp.f32 %v861_v25  ;;  %v5450_v25 = vadd.f32 %v5329_v10, %v2119_v17  ;;  %vm2140_vm11 = vcmp.eq.f32.partialorder %v5446_v18, 0.0 }
 0x94c   : > { %v862_v28 = vmax.f32 %v858_v27, 1e-30 }
 0x94d   : > { %vm2131_vm10 = vcmp.eq.f32.partialorder %v5450_v25, inf  ;;  %vm2133_vm12 = vcmp.eq.f32.partialorder %v5450_v25, 0.0 }
 0x94e   : > { %4787 = vrcp.f32 %v862_v28 }
 0x954   : > { %v4782_v32 = vpop.eup %4781 }
 0x955   : > { %v5426_v35 = vmul.f32 %v4782_v32, %v729_v31 }
 0x957   : > { %v4784_v37 = vpop.eup %4783  ;;  %v741_v45 = vadd.f32 1.0, %v5426_v35  ;;  %v4413_v19 = vadd.f32 -1.0, %v5426_v35  ;;  %vm737_vm5 = vcmp.gt.f32.partialorder %v5426_v35, 0.41421357 }
 0x958   : > { %v4786_v49 = vpop.eup %4785  ;;  %v5431_v55 = vmul.f32 %v4784_v37, %v730_v36 }
 0x959   : > { %4789 = vrcp.f32 %v741_v45  ;;  %v5433_v56 = vmul.f32 %v4786_v49, %v859_v48 }
 0x95a   : > { %v742_v60 = vadd.f32 1.0, %v5431_v55  ;;  %v4414_v27 = vadd.f32 -1.0, %v5431_v55  ;;  %vm738_vm6 = vcmp.gt.f32.partialorder %v5431_v55, 0.41421357 }
 0x95b   : > { %v4788_v3 = vpop.eup %4787  ;;  %v871_v12 = vadd.f32 1.0, %v5433_v56  ;;  %v4419_v6 = vadd.f32 -1.0, %v5433_v56  ;;  %vm867_vm7 = vcmp.gt.f32.partialorder %v5433_v56, 0.41421357 }
 0x95c   : > { %4791 = vrcp.f32 %v742_v60  ;;  %v5438_v13 = vmul.f32 %v4788_v3, %v860_v61 }
 0x95d   : > { %4793 = vrcp.f32 %v871_v12 }
 0x95e   : > { %v872_v15 = vadd.f32 1.0, %v5438_v13  ;;  %v4420_v36 = vadd.f32 -1.0, %v5438_v13  ;;  %vm868_vm8 = vcmp.gt.f32.partialorder %v5438_v13, 0.41421357 }
 0x960   : > { %4795 = vrcp.f32 %v872_v15 }
 0x961   : > { %4797 = vrsqrt.f32 %v5446_v18 }
 0x962   : > { %4799 = vrsqrt.f32 %v5450_v25 }
 0x966   : > { %v4790_v22 = vpop.eup %4789 }
 0x967   : > { %v744_v26 = vmul.f32 %v4790_v22, %v4413_v19 }
 0x969   : > { %v4792_v28 = vpop.eup %4791  ;;  %v747_v0 = vsel %vm737_vm5, %v744_v26, %v5426_v35 }
 0x96a   : > { %v4794_v1 = vpop.eup %4793  ;;  %v749_v43 = vmul.f32 %v747_v0, %v747_v0  ;;  %v746_v44 = vmul.f32 %v4792_v28, %v4414_v27 }
 0x96b   : > { %v874_v10 = vmul.f32 %v4794_v1, %v4419_v6 }
 0x96c   : > { %v751_v31 = vmul.f32 0.080537446, %v749_v43  ;;  %v748_v32 = vsel %vm738_vm6, %v746_v44, %v5431_v55 }
 0x96d   : > { %v4796_v37 = vpop.eup %4795  ;;  %v750_v45 = vmul.f32 %v748_v32, %v748_v32  ;;  %v877_v48 = vsel %vm867_vm7, %v874_v10, %v5433_v56 }
 0x96e   : > { %v4415_v49 = vadd.f32 -0.13877685, %v751_v31  ;;  %v879_v60 = vmul.f32 %v877_v48, %v877_v48  ;;  %v876_v61 = vmul.f32 %v4796_v37, %v4420_v36  ;;  %v4798_v31 = vpop.eup %4797 }
 0x96f   : > { %v752_v3 = vmul.f32 0.080537446, %v750_v45  ;;  %v4800_v34 = vpop.eup %4799 }
 0x970   : > { %v755_v12 = vmul.f32 %v4415_v49, %v749_v43  ;;  %v881_v15 = vmul.f32 0.080537446, %v879_v60  ;;  %v878_v16 = vsel %vm868_vm8, %v876_v61, %v5438_v13  ;;  %v2137_v61 = vmul.f32 %v4798_v31, %v5446_v18 }
 0x971   : > { %v4416_v17 = vadd.f32 -0.13877685, %v752_v3  ;;  %v880_v19 = vmul.f32 %v878_v16, %v878_v16 }
 0x972   : > { %v757_v22 = vadd.f32 0.19977711, %v755_v12  ;;  %v4421_v26 = vadd.f32 -0.13877685, %v881_v15 }
 0x973   : > { %v756_v27 = vmul.f32 %v4416_v17, %v750_v45  ;;  %v882_v28 = vmul.f32 0.080537446, %v880_v19  ;;  %v2130_v17 = vmul.f32 %v4800_v34, %v5450_v25 }
 0x974   : > { %v759_v6 = vmul.f32 %v757_v22, %v749_v43  ;;  %v885_v1 = vmul.f32 %v4421_v26, %v879_v60 }
 0x975   : > { %v758_v44 = vadd.f32 0.19977711, %v756_v27  ;;  %v4422_v10 = vadd.f32 -0.13877685, %v882_v28 }
 0x976   : > { %v4417_v36 = vadd.f32 -0.3333295, %v759_v6  ;;  %v887_v37 = vadd.f32 0.19977711, %v885_v1  ;;  %v2139_v6 = vsel %vm2138_vm9, %v5446_v18, %v2137_v61 }
 0x977   : > { %v760_v20 = vmul.f32 %v758_v44, %v750_v45  ;;  %v886_v49 = vmul.f32 %v4422_v10, %v880_v19 }
 0x978   : > { %v763_v24 = vmul.f32 %v4417_v36, %v749_v43  ;;  %v889_v14 = vmul.f32 %v887_v37, %v879_v60  ;;  %v2141_v43 = vand.u32 2147483648, %v5446_v18 }
 0x979   : > { %v4418_v3 = vadd.f32 -0.3333295, %v760_v20  ;;  %v888_v5 = vadd.f32 0.19977711, %v886_v49 }
 0x97a   : > { %v765_v12 = vmul.f32 %v763_v24, %v747_v0  ;;  %v4423_v15 = vadd.f32 -0.3333295, %v889_v14  ;;  %v2132_v14 = vsel %vm2131_vm10, %v5450_v25, %v2130_v17  ;;  %v5524_v17 = vmul.f32 %v5312_v40, %v5250_v33 }
 0x97b   : > { %v764_v22 = vmul.f32 %v4418_v3, %v750_v45  ;;  %v890_v26 = vmul.f32 %v888_v5, %v880_v19  ;;  %v2134_v5 = vand.u32 2147483648, %v5450_v25 }
 0x97c   : > { %v767_v27 = vadd.f32 %v765_v12, %v747_v0  ;;  %v893_v28 = vmul.f32 %v4423_v15, %v879_v60  ;;  %v5482_v0 = vsel %vm2140_vm11, %v2141_v43, %v2139_v6  ;;  %7412 = vst [vmem:[#allocation28_spill] sm:$0xff] %v5524_v17  ;;  %v5532_v6 = vmul.f32 %v5317_v42, %v5261_v38 }
 0x97d   : > { %v766_v1 = vmul.f32 %v764_v22, %v748_v32  ;;  %v4424_v44 = vadd.f32 -0.3333295, %v890_v26  ;;  %7410 = vst [vmem:[#allocation26_spill] sm:$0xff] %v5482_v0  ;;  %v5488_v36 = vsel %vm2133_vm12, %v2134_v5, %v2132_v14  ;;  %v2144_v18 = vadd.f32 1e-06, %v5482_v0  ;;  %v1471_v22 = vpop.permute.xlu1 %1470 }
 0x97e   : > { %v769_v20 = vadd.f32 0.7853982, %v767_v27  ;;  %v895_v10 = vmul.f32 %v893_v28, %v877_v48  ;;  %7411 = vst [vmem:[#allocation27_spill] sm:$0xff] %v5488_v36  ;;  %v2143_v35 = vadd.f32 1e-06, %v5488_v36  ;;  %7413 = vst [vmem:[#allocation29_spill] sm:$0xff] %v5532_v6 }
 0x97f   : > { %v768_v24 = vadd.f32 %v766_v1, %v748_v32  ;;  %v894_v34 = vmul.f32 %v4424_v44, %v880_v19  ;;  %4801 = vrcp.f32 %v2144_v18  ;;  %v5527_v26 = vand.u32 2147483647, %v5524_v17  ;;  %v4610_v17 = vpop.f32.mrf.mxu1 }
 0x980   : > { %v771_v45 = vsel %vm737_vm5, %v769_v20, %v767_v27  ;;  %v897_v37 = vadd.f32 %v895_v10, %v877_v48  ;;  %4803 = vrcp.f32 %v2143_v35  ;;  %v5536_v20 = vand.u32 2147483647, %v5532_v6 }
 0x981   : > { %v783_v60 = vsub.f32 1.5707964, %v771_v45  ;;  %795 = vrot.lane.b32.xlu1 %v771_v45, %s5028_s27  ;;  %v770_v31 = vadd.f32 0.7853982, %v768_v24  ;;  %v896_v49 = vmul.f32 %v894_v34, %v878_v16  ;;  %v1476_v27 = vmax.f32 %v5527_v26, %v1471_v22  ;;  %v1473_v43 = vpop.permute.xlu1 %1472 }
 0x982   : > { %v899_v25 = vadd.f32 0.7853982, %v897_v37  ;;  %v1477_v10 = vmax.f32 %v5536_v20, %v1473_v43 }
 0x983   : > { %787 = vrot.lane.b32.xlu0 %v783_v60, %s5028_s27  ;;  %v772_v32 = vsel %vm738_vm6, %v770_v31, %v768_v24  ;;  %v898_v61 = vadd.f32 %v896_v49, %v878_v16  ;;  %v1480_v44 = vmax.f32 %v1476_v27, 1e-30  ;;  %v1478_v49 = vmin.f32 %v5527_v26, %v1471_v22 }
 0x984   : > { %v784_v19 = vsub.f32 1.5707964, %v772_v32  ;;  %v901_v48 = vsel %vm867_vm7, %v899_v25, %v897_v37  ;;  %v1481_v34 = vmax.f32 %v1477_v10, 1e-30 }
 0x985   : > { %797 = vrot.lane.b32.xlu1 %v772_v32, %s5028_s27  ;;  %v900_v3 = vadd.f32 0.7853982, %v898_v61  ;;  %v911_v55 = vsub.f32 1.5707964, %v901_v48  ;;  %v1603_v31 = vpop.permute.xlu1 %1602 }
 0x986   : > { %v1607_v32 = vmax.f32 %v5536_v20, %v1603_v31 }
 0x987   : > { %789 = vrot.lane.b32.xlu0 %v784_v19, %s5028_s27  ;;  %v902_v16 = vsel %vm868_vm8, %v900_v3, %v898_v61 }
 0x988   : > { %v912_v12 = vsub.f32 1.5707964, %v902_v16  ;;  %v1611_v3 = vmax.f32 %v1607_v32, 1e-30 }
 0x989   : > { %905 = vrot.lane.b32.xlu1 %v5407_v8, %s5029_s28 }
 0x98b   : > { %903 = vrot.lane.b32.xlu0 %v5417_v11, %s5029_s28  ;;  %v974_v11 = vpop.permute.xlu0 %973 }
 0x98c   : > { %v5509_v8 = vpop.eup %4801  ;;  %v979_v13 = vmax.f32 %v5337_v47, %v974_v11  ;;  %v981_v24 = vmin.f32 %v5337_v47, %v974_v11 }
 0x98d   : > { %923 = vrot.lane.b32.xlu1 %v901_v48, %s5029_s28  ;;  %v5513_v56 = vpop.eup %4803 }
 0x98e   : > { %v983_v15 = vmax.f32 %v979_v13, 1e-30  ;;  %v1479_v13 = vmin.f32 %v5536_v20, %v1473_v43 }
 0x98f   : > { %915 = vrot.lane.b32.xlu0 %v911_v55, %s5029_s28  ;;  %v976_v28 = vpop.permute.xlu0 %975 }
 0x990   : > { %4805 = vrcp.f32 %v983_v15  ;;  %v980_v1 = vmax.f32 %v5348_v53, %v976_v28  ;;  %v982_v61 = vmin.f32 %v5348_v53, %v976_v28 }
 0x991   : > { %925 = vrot.lane.b32.xlu1 %v902_v16, %s5029_s28  ;;  %4807 = vrcp.f32 %v1480_v44 }
 0x992   : > { %v984_v40 = vmax.f32 %v980_v1, 1e-30 }
 0x993   : > { %917 = vrot.lane.b32.xlu0 %v912_v12, %s5029_s28  ;;  %v1601_v42 = vpop.permute.xlu0 %1600 }
 0x994   : > { %4809 = vrcp.f32 %v984_v40  ;;  %v1606_v60 = vmax.f32 %v5527_v26, %v1601_v42  ;;  %v1608_v43 = vmin.f32 %v5527_v26, %v1601_v42 }
 0x995   : > { %2155 = vrot.lane.b32.xlu1 %v5509_v8, %s5028_s27  ;;  %4811 = vrcp.f32 %v1481_v34 }
 0x996   : > { %v1610_v18 = vmax.f32 %v1606_v60, 1e-30 }
 0x997   : > { %2153 = vrot.lane.b32.xlu0 %v5513_v56, %s5028_s27  ;;  %v1723_v19 = vpop.permute.xlu0 %1722 }
 0x998   : > { %v1728_v48 = vmax.f32 %v5371_v62, %v1723_v19 }
 0x999   : > { %2163 = vrot.lane.b32.xlu1 %v5509_v8, %s5029_s28 }
 0x99a   : > { %v1732_v11 = vmax.f32 %v1728_v48, 1e-30 }
 0x99b   : > { %2161 = vrot.lane.b32.xlu0 %v5513_v56, %s5029_s28  ;;  %v5557_v28 = vpop.permute.xlu0 %1724 }
 0x99c   : > { %v1729_v40 = vmax.f32 %v5384_v4, %v5557_v28  ;;  %v1731_v38 = vmin.f32 %v5384_v4, %v5557_v28 }
 0x99d   : > { %v4806_v14 = vpop.eup %4805 }
 0x99e   : > { %v5540_v5 = vmul.f32 %v4806_v14, %v981_v24  ;;  %v4808_v37 = vpop.eup %4807  ;;  %v5564_v24 = vpop.permute.xlu1 %777 }
 0x99f   : > { %v5546_v35 = vmul.f32 %v4808_v37, %v1478_v49  ;;  %v5574_v49 = vpop.permute.xlu0 %775 }
 0x9a0   : > { %v993_v45 = vadd.f32 1.0, %v5540_v5  ;;  %v4425_v1 = vadd.f32 -1.0, %v5540_v5  ;;  %vm989_vm13 = vcmp.gt.f32.partialorder %v5540_v5, 0.41421357 }
 0x9a1   : > { %v4810_v25 = vpop.eup %4809  ;;  %v1490_v16 = vadd.f32 1.0, %v5546_v35  ;;  %vm1486_vm14 = vcmp.gt.f32.partialorder %v5546_v35, 0.41421357 }
 0x9a2   : > { %4813 = vrcp.f32 %v993_v45  ;;  %v5550_v55 = vmul.f32 %v4810_v25, %v982_v61  ;;  %v4812_v12 = vpop.eup %4811  ;;  %v1733_v45 = vmax.f32 %v1729_v40, 1e-30 }
 0x9a3   : > { %4815 = vrcp.f32 %v1610_v18  ;;  %v5555_v22 = vmul.f32 %v4812_v12, %v1479_v13  ;;  %v1609_v18 = vmin.f32 %v5536_v20, %v1603_v31 }
 0x9a4   : > { %4817 = vrcp.f32 %v1611_v3  ;;  %v994_v15 = vadd.f32 1.0, %v5550_v55  ;;  %v4435_v3 = vadd.f32 -1.0, %v5546_v35  ;;  %v4426_v40 = vadd.f32 -1.0, %v5550_v55 }
 0x9a5   : > { %4819 = vrcp.f32 %v1490_v16  ;;  %v1491_v44 = vadd.f32 1.0, %v5555_v22  ;;  %vm990_vm15 = vcmp.gt.f32.partialorder %v5550_v55, 0.41421357  ;;  %vm1487_vm0 = vcmp.gt.f32.partialorder %v5555_v22, 0.41421357 }
 0x9a6   : > { %4821 = vrcp.f32 %v1732_v11  ;;  %v1730_v11 = vmin.f32 %v5371_v62, %v1723_v19 }
 0x9a7   : > { %4823 = vrcp.f32 %v994_v15 }
 0x9a8   : > { %4825 = vrcp.f32 %v1491_v44 }
 0x9a9   : > { %4827 = vrcp.f32 %v1733_v45 }
 0x9af   : > { %v4814_v27 = vpop.eup %4813 }
 0x9b0   : > { %v996_v10 = vmul.f32 %v4814_v27, %v4425_v1  ;;  %v4816_v14 = vpop.eup %4815 }
 0x9b1   : > { %v5567_v34 = vmul.f32 %v4816_v14, %v1608_v43  ;;  %v4818_v37 = vpop.eup %4817 }
 0x9b2   : > { %v5572_v60 = vsel %vm989_vm13, %v996_v10, %v5540_v5  ;;  %v4820_v32 = vpop.eup %4819  ;;  %v5584_v48 = vmul.f32 %v4818_v37, %v1609_v18 }
 0x9b3   : > { %v5581_v25 = vmul.f32 %v5572_v60, %v5572_v60  ;;  %v1620_v61 = vadd.f32 1.0, %v5567_v34  ;;  %v4822_v16 = vpop.eup %4821  ;;  %v1493_v31 = vmul.f32 %v4820_v32, %v4435_v3  ;;  %v4436_v3 = vadd.f32 -1.0, %v5555_v22 }
 0x9b4   : > { %v4824_v13 = vpop.eup %4823  ;;  %v5593_v1 = vmul.f32 %v4822_v16, %v1730_v11  ;;  %v1621_v44 = vadd.f32 1.0, %v5584_v48  ;;  %v4441_v28 = vadd.f32 -1.0, %v5567_v34  ;;  %v4442_v63 = vadd.f32 -1.0, %v5584_v48 }
 0x9b5   : > { %v1003_v27 = vmul.f32 0.080537446, %v5581_v25  ;;  %4829 = vrcp.f32 %v1620_v61  ;;  %v5603_v19 = vsel %vm1486_vm14, %v1493_v31, %v5546_v35  ;;  %v998_v14 = vmul.f32 %v4824_v13, %v4426_v40  ;;  %v4826_v37 = vpop.eup %4825 }
 0x9b6   : > { %v1742_v18 = vadd.f32 1.0, %v5593_v1  ;;  %4831 = vrcp.f32 %v1621_v44  ;;  %v5612_v61 = vmul.f32 %v5603_v19, %v5603_v19  ;;  %v1495_v13 = vmul.f32 %v4826_v37, %v4436_v3 }
 0x9b7   : > { %v4427_v45 = vadd.f32 -0.13877685, %v1003_v27  ;;  %v5619_v16 = vsel %vm990_vm15, %v998_v14, %v5550_v55  ;;  %v4828_v27 = vpop.eup %4827  ;;  %vm1616_vm1 = vcmp.gt.f32.partialorder %v5567_v34, 0.41421357  ;;  %vm1617_vm3 = vcmp.gt.f32.partialorder %v5584_v48, 0.41421357 }
 0x9b8   : > { %4833 = vrcp.f32 %v1742_v18  ;;  %v1500_v40 = vmul.f32 0.080537446, %v5612_v61  ;;  %v5629_v2 = vmul.f32 %v5619_v16, %v5619_v16  ;;  %v5641_v37 = vmul.f32 %v4828_v27, %v1731_v38 }
 0x9b9   : > { %v1007_v31 = vmul.f32 %v4427_v45, %v5581_v25  ;;  %v5639_v45 = vsel %vm1487_vm0, %v1495_v13, %v5555_v22  ;;  %vm1738_vm4 = vcmp.gt.f32.partialorder %v5593_v1, 0.41421357 }
 0x9ba   : > { %v4437_v33 = vadd.f32 -0.13877685, %v1500_v40  ;;  %v1004_v0 = vmul.f32 0.080537446, %v5629_v2  ;;  %v5649_v36 = vmul.f32 %v5639_v45, %v5639_v45  ;;  %v1743_v13 = vadd.f32 1.0, %v5641_v37 }
 0x9bb   : > { %v1009_v57 = vadd.f32 0.19977711, %v1007_v31  ;;  %vm1739_vm5 = vcmp.gt.f32.partialorder %v5641_v37, 0.41421357 }
 0x9bc   : > { %v1504_v40 = vmul.f32 %v4437_v33, %v5612_v61  ;;  %v4428_v23 = vadd.f32 -0.13877685, %v1004_v0  ;;  %v1501_v6 = vmul.f32 0.080537446, %v5649_v36  ;;  %4835 = vrcp.f32 %v1743_v13 }
 0x9bd   : > { %v1011_v29 = vmul.f32 %v1009_v57, %v5581_v25 }
 0x9be   : > { %v1008_v13 = vmul.f32 %v4428_v23, %v5629_v2 }
 0x9bf   : > { %v4429_v57 = vadd.f32 -0.3333295, %v1011_v29 }
 0x9c2   : > { %v4830_v18 = vpop.eup %4829 }
 0x9c3   : > { %v1623_v27 = vmul.f32 %v4830_v18, %v4441_v28  ;;  %v4832_v52 = vpop.eup %4831  ;;  %v4447_v28 = vadd.f32 -1.0, %v5593_v1 }
 0x9c4   : > { %v1625_v0 = vmul.f32 %v4832_v52, %v4442_v63  ;;  %v1015_v52 = vmul.f32 %v4429_v57, %v5581_v25  ;;  %v2801_v57 = vpop.f32.mrf.mxu1 }
 0x9c5   : > { %v5671_v33 = vsel %vm1616_vm1, %v1623_v27, %v5567_v34  ;;  %v4834_v18 = vpop.eup %4833  ;;  %v4438_v27 = vadd.f32 -0.13877685, %v1501_v6  ;;  %v4945_v6 = vld [vmem:[%s5169_s20 + $0x8] sm:$0xff] }
 0x9c6   : > { %v5687_v63 = vmul.f32 %v5671_v33, %v5671_v33  ;;  %v1745_v23 = vmul.f32 %v4834_v18, %v4447_v28  ;;  %v5700_v25 = vsub.f32 %v4610_v17, %v4945_v6  ;;  %v1017_v9 = vmul.f32 %v1015_v52, %v5572_v60 }
 0x9c8   : > { %7420 = vst [vmem:[#allocation36_spill] sm:$0xff] %v5700_v25  ;;  %v5731_v52 = vmul.f32 %v5700_v25, %v5700_v25 }
 0x9f3   : > { %v5577_v42 = vpop.permute.xlu1 %795 }
 0x9f5   : > { %v5587_v12 = vpop.permute.xlu0 %787 }
 0x9f7   : > { %v5590_v15 = vpop.permute.xlu1 %797 }
 0x9f9   : > { %v5597_v10 = vpop.permute.xlu0 %789 }
 0x9fb   : > { %v5605_v43 = vpop.permute.xlu1 %905 }
 0x9fd   : > { %v5608_v32 = vpop.permute.xlu0 %903 }
 0x9ff   : > { %v5621_v11 = vpop.permute.xlu1 %923 }
 0xa01   : > { %v5624_v44 = vpop.permute.xlu0 %915 }
 0xa03   : > { %v5634_v14 = vpop.permute.xlu1 %925 }
 0xa05   : > { %v5643_v3 = vpop.permute.xlu0 %917 }
 0xa06   : > { %7414 = vst [vmem:[#allocation30_spill] sm:$0xff] %v5643_v3 }
 0xa07   : > { %v2156_v31 = vpop.permute.xlu1 %2155 }
 0xa08   : > { %v5654_v38 = vmul.f32 %v2156_v31, %v5278_v41 }
 0xa09   : > { %v2154_v30 = vpop.permute.xlu0 %2153 }
 0xa0a   : > { %7415 = vst [vmem:[#allocation31_spill] sm:$0xff] %v5654_v38  ;;  %v5659_v58 = vand.u32 2147483647, %v5654_v38  ;;  %v1506_v38 = vadd.f32 0.19977711, %v1504_v40 }
 0xa0b   : > { %v2164_v51 = vpop.permute.xlu1 %2163  ;;  %v1010_v40 = vadd.f32 0.19977711, %v1008_v13  ;;  %v4946_v13 = vld [vmem:[%s5169_s20] sm:$0xff]  ;;  %s4304_s20 = sshll.u32 %s392_s19, 4  ;;  %s7235_s20 = int_to_ptr.vmem [resolvable:$true] %s4304_s20 }
 0xa0c   : > { %v5664_v31 = vmul.f32 %v2164_v51, %v5278_v41  ;;  %2177 = vrot.lane.b32.xlu1 %v5659_v58, %s5026_s22  ;;  %v5676_v51 = vmul.f32 %v2154_v30, %v5264_v39  ;;  %v5697_v30 = vsel %vm1617_vm3, %v1625_v0, %v5584_v48  ;;  %v1508_v28 = vmul.f32 %v1506_v38, %v5612_v61  ;;  %p4954_p1 = scmp.lt.s32.totalorder %s7235_s20, %s4952_s12 }
 0xa0d   : > { %v2162_v29 = vpop.permute.xlu0 %2161  ;;  %v1630_v0 = vmul.f32 0.080537446, %v5687_v63  ;;  %v5714_v17 = vmul.f32 %v5697_v30, %v5697_v30  ;;  %v5724_v38 = vsel %vm1738_vm4, %v1745_v23, %v5593_v1  ;;  %v5839_v48 = vmul.f32 %v5509_v8, %v5278_v41 }
 0xa0e   : > { %7416 = vst [vmem:[#allocation32_spill] sm:$0xff] %v5664_v31  ;;  %7417 = vst [vmem:[#allocation33_spill] sm:$0xff] %v5676_v51  ;;  %v5679_v46 = vand.u32 2147483647, %v5664_v31  ;;  %v5682_v7 = vmul.f32 %v2162_v29, %v5264_v39  ;;  %v5703_v29 = vand.u32 2147483647, %v5676_v51  ;;  %v1505_v31 = vmul.f32 %v4438_v27, %v5649_v36 }
 0xa0f   : > { %v5727_v27 = vsub.f32 %v2801_v57, %v4946_v13  ;;  %v4439_v6 = vadd.f32 -0.3333295, %v1508_v28  ;;  %v4443_v50 = vadd.f32 -0.13877685, %v1630_v0  ;;  %v1631_v21 = vmul.f32 0.080537446, %v5714_v17  ;;  %v4836_v57 = vpop.eup %4835 }
 0xa10   : > { %7418 = vst [vmem:[#allocation34_spill] sm:$0xff] %v5679_v46  ;;  %7419 = vst [vmem:[#allocation35_spill] sm:$0xff] %v5682_v7  ;;  %2429 = vrot.lane.b32.xlu0 %v5679_v46, %s5026_s22  ;;  %2307 = vrot.lane.b32.xlu1 %v5679_v46, %s5027_s24  ;;  %v5706_v18 = vand.u32 2147483647, %v5682_v7  ;;  %v1012_v7 = vmul.f32 %v1010_v40, %v5629_v2  ;;  %v1507_v51 = vadd.f32 0.19977711, %v1505_v31 }
 0xa11   : > { %7422 = vst [vmem:[#allocation38_spill] sm:$0xff] %v5727_v27  ;;  %v1019_v46 = vadd.f32 %v1017_v9, %v5572_v60  ;;  %v5738_v23 = vmul.f32 %v5724_v38, %v5724_v38  ;;  %v5746_v40 = vmul.f32 %v5727_v27, %v5727_v27  ;;  %v4448_v9 = vadd.f32 -1.0, %v5641_v37  ;;  %7424 = vst [vmem:[#allocation40_spill] sm:$0xff] %v5839_v48 }
 0xa12   : > { %7421 = vst [vmem:[#allocation37_spill] sm:$0xff] %v5706_v18  ;;  %v1512_v60 = vmul.f32 %v4439_v6, %v5612_v61  ;;  %v4430_v31 = vadd.f32 -0.3333295, %v1012_v7  ;;  %v1509_v28 = vmul.f32 %v1507_v51, %v5649_v36  ;;  %v1634_v13 = vmul.f32 %v4443_v50, %v5687_v63 }
 0xa13   : > { %v1021_v0 = vadd.f32 0.7853982, %v1019_v46  ;;  %v4444_v25 = vadd.f32 -0.13877685, %v1631_v21  ;;  %v1747_v27 = vmul.f32 %v4836_v57, %v4448_v9  ;;  %v2170_v1 = vand.u32 2147483647, %v5839_v48 }
 0xa14   : > { %2305 = vrot.lane.b32.xlu0 %v5706_v18, %s5027_s24  ;;  %2175 = vrot.lane.b32.xlu1 %v5703_v29, %s5026_s22  ;;  %v1514_v3 = vmul.f32 %v1512_v60, %v5603_v19  ;;  %v1016_v61 = vmul.f32 %v4430_v31, %v5629_v2  ;;  %v4440_v7 = vadd.f32 -0.3333295, %v1509_v28  ;;  %v1636_v21 = vadd.f32 0.19977711, %v1634_v13 }
 0xa15   : > { %v1023_v50 = vsel %vm989_vm13, %v1021_v0, %v1019_v46  ;;  %v1635_v51 = vmul.f32 %v4444_v25, %v5714_v17  ;;  %v5770_v2 = vsel %vm1739_vm5, %v1747_v27, %v5641_v37 }
 0xa16   : > { %v1033_v57 = vsub.f32 1.5707964, %v1023_v50  ;;  %v1516_v9 = vadd.f32 %v1514_v3, %v5603_v19  ;;  %v1018_v46 = vmul.f32 %v1016_v61, %v5619_v16  ;;  %v1513_v5 = vmul.f32 %v4440_v7, %v5649_v36 }
 0xa17   : > { %v1638_v25 = vmul.f32 %v1636_v21, %v5687_v63  ;;  %v1751_v31 = vmul.f32 %v5770_v2, %v5770_v2 }
 0xa18   : > { %2427 = vrot.lane.b32.xlu0 %v5706_v18, %s5026_s22  ;;  %2818 = vrot.lane.b32.xlu1 %v5731_v52, %s5026_s22  ;;  %v1752_v18 = vmul.f32 0.080537446, %v5738_v23  ;;  %v1518_v27 = vadd.f32 0.7853982, %v1516_v9  ;;  %v1020_v19 = vadd.f32 %v1018_v46, %v5619_v16  ;;  %v1515_v3 = vmul.f32 %v1513_v5, %v5639_v45 }
 0xa19   : > { %v4445_v28 = vadd.f32 -0.3333295, %v1638_v25  ;;  %v1753_v13 = vmul.f32 0.080537446, %v1751_v31 }
 0xa1a   : > { %v4449_v6 = vadd.f32 -0.13877685, %v1752_v18  ;;  %v1637_v18 = vadd.f32 0.19977711, %v1635_v51  ;;  %v1520_v61 = vsel %vm1486_vm14, %v1518_v27, %v1516_v9  ;;  %v1022_v7 = vadd.f32 0.7853982, %v1020_v19 }
 0xa1b   : > { %v1517_v21 = vadd.f32 %v1515_v3, %v5639_v45  ;;  %v1642_v16 = vmul.f32 %v4445_v28, %v5687_v63  ;;  %v1532_v46 = vsub.f32 1.5707964, %v1520_v61 }
 0xa1c   : > { %2816 = vrot.lane.b32.xlu0 %v5746_v40, %s5026_s22  ;;  %2826 = vrot.lane.b32.xlu1 %v5731_v52, %s5027_s24  ;;  %v1756_v60 = vmul.f32 %v4449_v6, %v5738_v23  ;;  %v1639_v36 = vmul.f32 %v1637_v18, %v5714_v17  ;;  %v1024_v5 = vsel %vm990_vm15, %v1022_v7, %v1020_v19 }
 0xa1d   : > { %v1519_v25 = vadd.f32 0.7853982, %v1517_v21  ;;  %v1644_v35 = vmul.f32 %v1642_v16, %v5671_v33  ;;  %v1034_v63 = vsub.f32 1.5707964, %v1024_v5 }
 0xa1e   : > { %v1758_v0 = vadd.f32 0.19977711, %v1756_v60  ;;  %v4446_v51 = vadd.f32 -0.3333295, %v1639_v36 }
 0xa1f   : > { %v1646_v60 = vadd.f32 %v1644_v35, %v5671_v33 }
 0xa20   : > { %2824 = vrot.lane.b32.xlu0 %v5746_v40, %s5027_s24  ;;  %1524 = vrot.lane.b32.xlu1 %v5527_v26, %s5028_s27  ;;  %v1760_v6 = vmul.f32 %v1758_v0, %v5738_v23  ;;  %v1643_v9 = vmul.f32 %v4446_v51, %v5714_v17 }
 0xa21   : > { %v1648_v3 = vadd.f32 0.7853982, %v1646_v60 }
 0xa22   : > { %v4451_v45 = vadd.f32 -0.3333295, %v1760_v6  ;;  %v1645_v55 = vmul.f32 %v1643_v9, %v5697_v30 }
 0xa23   : > { %v1650_v22 = vsel %vm1616_vm1, %v1648_v3, %v1646_v60  ;;  %vm782_vm1 = vcmp.gt.f32.partialorder %v5348_v53, %v5564_v24  ;;  %v7426_v24 = vld [vmem:[#allocation30_spill] sm:$0xff] }
 0xa24   : > { %1025 = vrot.lane.b32.xlu0 %v5337_v47, %s5028_s27  ;;  %1037 = vrot.lane.b32.xlu1 %v1033_v57, %s5028_s27  ;;  %v4450_v57 = vadd.f32 -0.13877685, %v1753_v13  ;;  %v1764_v27 = vmul.f32 %v4451_v45, %v5738_v23  ;;  %v1647_v28 = vadd.f32 %v1645_v55, %v5697_v30  ;;  %v1660_v30 = vsub.f32 1.5707964, %v1650_v22 }
 0xa26   : > { %v1757_v18 = vmul.f32 %v4450_v57, %v1751_v31  ;;  %v1766_v36 = vmul.f32 %v1764_v27, %v5724_v38  ;;  %v1649_v33 = vadd.f32 0.7853982, %v1647_v28 }
 0xa28   : > { %1027 = vrot.lane.b32.xlu0 %v5348_v53, %s5028_s27  ;;  %1526 = vrot.lane.b32.xlu1 %v5536_v20, %s5028_s27  ;;  %v1759_v19 = vadd.f32 0.19977711, %v1757_v18  ;;  %v1768_v23 = vadd.f32 %v1766_v36, %v5724_v38 }
 0xa2a   : > { %v1761_v0 = vmul.f32 %v1759_v19, %v1751_v31  ;;  %v1770_v7 = vadd.f32 0.7853982, %v1768_v23 }
 0xa2c   : > { %1045 = vrot.lane.b32.xlu0 %v1023_v50, %s5028_s27  ;;  %1544 = vrot.lane.b32.xlu1 %v1520_v61, %s5028_s27  ;;  %v1521_v50 = vsel %vm1487_vm0, %v1519_v25, %v1517_v21  ;;  %v4452_v13 = vadd.f32 -0.3333295, %v1761_v0  ;;  %v5822_v61 = vmul.f32 %v5513_v56, %v5264_v39  ;;  %vm781_vm0 = vcmp.gt.f32.partialorder %v5337_v47, %v5574_v49 }
 0xa2d   : > { %v1533_v17 = vsub.f32 1.5707964, %v1521_v50 }
 0xa2e   : > { %7423 = vst [vmem:[#allocation39_spill] sm:$0xff] %v5822_v61  ;;  %v1765_v34 = vmul.f32 %v4452_v13, %v1751_v31  ;;  %v5829_v21 = vand.u32 2147483647, %v5822_v61 }
 0xa30   : > { %1536 = vrot.lane.b32.xlu0 %v1532_v46, %s5028_s27  ;;  %1047 = vrot.lane.b32.xlu1 %v1024_v5, %s5028_s27  ;;  %v1767_v16 = vmul.f32 %v1765_v34, %v5770_v2 }
 0xa32   : > { %v1769_v31 = vadd.f32 %v1767_v16, %v5770_v2 }
 0xa34   : > { %1039 = vrot.lane.b32.xlu0 %v1034_v63, %s5028_s27  ;;  %1546 = vrot.lane.b32.xlu1 %v1521_v50, %s5028_s27  ;;  %v1771_v51 = vadd.f32 0.7853982, %v1769_v31 }
 0xa36   : > { %v1773_v6 = vsel %vm1739_vm5, %v1771_v51, %v1769_v31 }
 0xa37   : > { %v1783_v8 = vsub.f32 1.5707964, %v1773_v6 }
 0xa38   : > { %1538 = vrot.lane.b32.xlu0 %v1533_v17, %s5028_s27  ;;  %1654 = vrot.lane.b32.xlu1 %v5536_v20, %s5029_s28  ;;  %v1651_v20 = vsel %vm1617_vm3, %v1649_v33, %v1647_v28  ;;  %vm909_vm3 = vcmp.gt.f32.partialorder %v5351_v54, %v5608_v32 }
 0xa39   : > { %v1661_v38 = vsub.f32 1.5707964, %v1651_v20 }
 0xa3c   : > { %1652 = vrot.lane.b32.xlu0 %v5527_v26, %s5029_s28  ;;  %1672 = vrot.lane.b32.xlu1 %v1650_v22, %s5029_s28  ;;  %v1772_v26 = vsel %vm1738_vm4, %v1770_v7, %v1768_v23  ;;  %vm910_vm4 = vcmp.gt.f32.partialorder %v5364_v59, %v5605_v43 }
 0xa3d   : > { %v1782_v56 = vsub.f32 1.5707964, %v1772_v26 }
 0xa40   : > { %1664 = vrot.lane.b32.xlu0 %v1660_v30, %s5029_s28  ;;  %1674 = vrot.lane.b32.xlu1 %v1651_v20, %s5029_s28 }
 0xa44   : > { %1666 = vrot.lane.b32.xlu0 %v1661_v38, %s5029_s28  ;;  %2229 = vrot.lane.b32.xlu1 %v5829_v21, %s5028_s27 }
 0xa48   : > { %1774 = vrot.lane.b32.xlu0 %v5371_v62, %s5028_s27  ;;  %1786 = vrot.lane.b32.xlu1 %v1782_v56, %s5028_s27 }
 0xa4c   : > { %1776 = vrot.lane.b32.xlu0 %v5384_v4, %s5028_s27  ;;  %2231 = vrot.lane.b32.xlu1 %v2170_v1, %s5028_s27 }
 0xa50   : > { %1794 = vrot.lane.b32.xlu0 %v1772_v26, %s5028_s27  ;;  %1796 = vrot.lane.b32.xlu1 %v1773_v6, %s5028_s27 }
 0xa54   : > { %1788 = vrot.lane.b32.xlu0 %v1783_v8, %s5028_s27  ;;  %2359 = vrot.lane.b32.xlu1 %v2170_v1, %s5029_s28 }
 0xa58   : > { %2357 = vrot.lane.b32.xlu0 %v5829_v21, %s5029_s28 }
 0xa5c   : > { %2479 = vrot.lane.b32.xlu0 %v5703_v29, %s5028_s27 }
 0xa60   : > { %2481 = vrot.lane.b32.xlu0 %v5659_v58, %s5028_s27 }
 0xa7e   : > { %v2178_v37 = vpop.permute.xlu1 %2177 }
 0xa7f   : > { %v2182_v2 = vmax.f32 %v2170_v1, %v2178_v37  ;;  %v2184_v28 = vmin.f32 %v2170_v1, %v2178_v37 }
 0xa81   : > { %v2186_v57 = vmax.f32 %v2182_v2, 1e-30 }
 0xa82   : > { %v2430_v46 = vpop.permute.xlu0 %2429  ;;  %v2308_v5 = vpop.permute.xlu1 %2307 }
 0xa83   : > { %4837 = vrcp.f32 %v2186_v57  ;;  %v2434_v25 = vmax.f32 %v5659_v58, %v2430_v46  ;;  %v2312_v35 = vmax.f32 %v2170_v1, %v2308_v5  ;;  %v2436_v33 = vmin.f32 %v5659_v58, %v2430_v46 }
 0xa84   : > { %v2314_v13 = vmin.f32 %v2170_v1, %v2308_v5 }
 0xa85   : > { %v2438_v9 = vmax.f32 %v2434_v25, 1e-30  ;;  %v2316_v45 = vmax.f32 %v2312_v35, 1e-30 }
 0xa86   : > { %v2306_v18 = vpop.permute.xlu0 %2305  ;;  %v2176_v63 = vpop.permute.xlu1 %2175 }
 0xa87   : > { %4839 = vrcp.f32 %v2438_v9  ;;  %v2311_v50 = vmax.f32 %v5829_v21, %v2306_v18  ;;  %v2181_v60 = vmax.f32 %v5829_v21, %v2176_v63  ;;  %v2313_v38 = vmin.f32 %v5829_v21, %v2306_v18 }
 0xa88   : > { %4841 = vrcp.f32 %v2316_v45  ;;  %v2183_v56 = vmin.f32 %v5829_v21, %v2176_v63 }
 0xa89   : > { %v2315_v55 = vmax.f32 %v2311_v50, 1e-30  ;;  %v2185_v27 = vmax.f32 %v2181_v60, 1e-30 }
 0xa8a   : > { %v2428_v19 = vpop.permute.xlu0 %2427  ;;  %v2819_v6 = vpop.permute.xlu1 %2818 }
 0xa8b   : > { %4843 = vrcp.f32 %v2315_v55  ;;  %v2433_v17 = vmax.f32 %v5703_v29, %v2428_v19  ;;  %v2435_v37 = vmin.f32 %v5703_v29, %v2428_v19  ;;  %v2823_v9 = vadd.f32 %v2819_v6, %v5731_v52 }
 0xa8c   : > { %4845 = vrcp.f32 %v2185_v27 }
 0xa8d   : > { %v2437_v3 = vmax.f32 %v2433_v17, 1e-30 }
 0xa8e   : > { %v2817_v21 = vpop.permute.xlu0 %2816  ;;  %v2827_v25 = vpop.permute.xlu1 %2826 }
 0xa8f   : > { %4847 = vrcp.f32 %v2437_v3  ;;  %v5889_v18 = vadd.f32 %v2827_v25, %v2823_v9  ;;  %v2822_v55 = vadd.f32 %v2817_v21, %v5746_v40 }
 0xa90   : > { %v4838_v36 = vpop.eup %4837 }
 0xa91   : > { %v5865_v0 = vmul.f32 %v4838_v36, %v2184_v28  ;;  %vm2841_vm12 = vcmp.eq.f32.partialorder %v5889_v18, inf  ;;  %vm2843_vm13 = vcmp.eq.f32.partialorder %v5889_v18, 0.0 }
 0xa92   : > { %v2825_v50 = vpop.permute.xlu0 %2824 }
 0xa93   : > { %v2196_v22 = vadd.f32 1.0, %v5865_v0  ;;  %v4458_v35 = vadd.f32 -1.0, %v5865_v0  ;;  %vm2192_vm6 = vcmp.gt.f32.partialorder %v5865_v0, 0.41421357  ;;  %v5903_v28 = vadd.f32 %v2825_v50, %v2822_v55 }
 0xa94   : > { %v4840_v23 = vpop.eup %4839 }
 0xa95   : > { %v4842_v30 = vpop.eup %4841  ;;  %4849 = vrcp.f32 %v2196_v22  ;;  %v5869_v20 = vmul.f32 %v4840_v23, %v2436_v33  ;;  %vm2834_vm14 = vcmp.eq.f32.partialorder %v5903_v28, inf  ;;  %vm2836_vm15 = vcmp.eq.f32.partialorder %v5903_v28, 0.0 }
 0xa96   : > { %v5871_v7 = vmul.f32 %v4842_v30, %v2314_v13 }
 0xa97   : > { %v2448_v34 = vadd.f32 1.0, %v5869_v20  ;;  %v4470_v60 = vadd.f32 -1.0, %v5869_v20  ;;  %vm2444_vm7 = vcmp.gt.f32.partialorder %v5869_v20, 0.41421357 }
 0xa98   : > { %v4844_v26 = vpop.eup %4843  ;;  %v2326_v16 = vadd.f32 1.0, %v5871_v7  ;;  %v4464_v17 = vadd.f32 -1.0, %v5871_v7  ;;  %vm2322_vm8 = vcmp.gt.f32.partialorder %v5871_v7, 0.41421357 }
 0xa99   : > { %v4846_v31 = vpop.eup %4845  ;;  %4851 = vrcp.f32 %v2448_v34  ;;  %v5877_v51 = vmul.f32 %v4844_v26, %v2313_v38 }
 0xa9a   : > { %4853 = vrcp.f32 %v2326_v16  ;;  %v5879_v1 = vmul.f32 %v4846_v31, %v2183_v56 }
 0xa9b   : > { %v2325_v8 = vadd.f32 1.0, %v5877_v51  ;;  %v4463_v40 = vadd.f32 -1.0, %v5877_v51  ;;  %vm2321_vm9 = vcmp.gt.f32.partialorder %v5877_v51, 0.41421357 }
 0xa9c   : > { %v4848_v2 = vpop.eup %4847  ;;  %v2195_v57 = vadd.f32 1.0, %v5879_v1  ;;  %v4457_v30 = vadd.f32 -1.0, %v5879_v1  ;;  %vm2191_vm10 = vcmp.gt.f32.partialorder %v5879_v1, 0.41421357 }
 0xa9d   : > { %4855 = vrcp.f32 %v2325_v8  ;;  %v5884_v46 = vmul.f32 %v4848_v2, %v2435_v37 }
 0xa9e   : > { %4857 = vrcp.f32 %v2195_v57 }
 0xa9f   : > { %v2447_v5 = vadd.f32 1.0, %v5884_v46  ;;  %v4469_v2 = vadd.f32 -1.0, %v5884_v46  ;;  %vm2443_vm11 = vcmp.gt.f32.partialorder %v5884_v46, 0.41421357 }
 0xaa1   : > { %4859 = vrcp.f32 %v2447_v5 }
 0xaa2   : > { %v4850_v45 = vpop.eup %4849  ;;  %4861 = vrsqrt.f32 %v5889_v18 }
 0xaa3   : > { %v2200_v63 = vmul.f32 %v4850_v45, %v4458_v35  ;;  %4863 = vrsqrt.f32 %v5903_v28 }
 0xaa5   : > { %v5897_v27 = vsel %vm2192_vm6, %v2200_v63, %v5865_v0 }
 0xaa6   : > { %v4852_v19 = vpop.eup %4851  ;;  %v2204_v52 = vmul.f32 %v5897_v27, %v5897_v27 }
 0xaa7   : > { %v4854_v3 = vpop.eup %4853  ;;  %v2452_v36 = vmul.f32 %v4852_v19, %v4470_v60 }
 0xaa8   : > { %v2206_v22 = vmul.f32 0.080537446, %v2204_v52  ;;  %v2330_v33 = vmul.f32 %v4854_v3, %v4464_v17 }
 0xaa9   : > { %v5911_v23 = vsel %vm2444_vm7, %v2452_v36, %v5869_v20 }
 0xaaa   : > { %v4856_v13 = vpop.eup %4855  ;;  %v4460_v34 = vadd.f32 -0.13877685, %v2206_v22  ;;  %v5917_v38 = vsel %vm2322_vm8, %v2330_v33, %v5871_v7  ;;  %v2456_v26 = vmul.f32 %v5911_v23, %v5911_v23 }
 0xaab   : > { %v4858_v16 = vpop.eup %4857  ;;  %v2334_v56 = vmul.f32 %v5917_v38, %v5917_v38  ;;  %v2328_v31 = vmul.f32 %v4856_v13, %v4463_v40 }
 0xaac   : > { %v2210_v6 = vmul.f32 %v4460_v34, %v2204_v52  ;;  %v2458_v8 = vmul.f32 0.080537446, %v2456_v26  ;;  %v2198_v37 = vmul.f32 %v4858_v16, %v4457_v30 }
 0xaad   : > { %v2336_v57 = vmul.f32 0.080537446, %v2334_v56  ;;  %v5930_v21 = vsel %vm2321_vm9, %v2328_v31, %v5877_v51 }
 0xaae   : > { %v4860_v5 = vpop.eup %4859  ;;  %v2212_v25 = vadd.f32 0.19977711, %v2210_v6  ;;  %v4472_v35 = vadd.f32 -0.13877685, %v2458_v8  ;;  %v5935_v9 = vsel %vm2191_vm10, %v2198_v37, %v5879_v1  ;;  %v5939_v45 = vmul.f32 %v5930_v21, %v5930_v21 }
 0xaaf   : > { %v4466_v63 = vadd.f32 -0.13877685, %v2336_v57  ;;  %v2450_v50 = vmul.f32 %v4860_v5, %v4469_v2  ;;  %v2203_v60 = vmul.f32 %v5935_v9, %v5935_v9  ;;  %v4862_v31 = vpop.eup %4861 }
 0xab0   : > { %v2214_v55 = vmul.f32 %v2212_v25, %v2204_v52  ;;  %v2462_v19 = vmul.f32 %v4472_v35, %v2456_v26  ;;  %v2335_v17 = vmul.f32 0.080537446, %v5939_v45  ;;  %v4864_v41 = vpop.eup %4863 }
 0xab1   : > { %v2340_v3 = vmul.f32 %v4466_v63, %v2334_v56  ;;  %v5948_v36 = vsel %vm2443_vm11, %v2450_v50, %v5884_v46  ;;  %v2205_v22 = vmul.f32 0.080537446, %v2203_v60  ;;  %v2840_v50 = vmul.f32 %v4862_v31, %v5889_v18 }
 0xab2   : > { %v4462_v33 = vadd.f32 -0.3333295, %v2214_v55  ;;  %v2464_v40 = vadd.f32 0.19977711, %v2462_v19  ;;  %v2455_v13 = vmul.f32 %v5948_v36, %v5948_v36  ;;  %v4465_v30 = vadd.f32 -0.13877685, %v2335_v17 }
 0xab3   : > { %v2342_v34 = vadd.f32 0.19977711, %v2340_v3  ;;  %v4459_v16 = vadd.f32 -0.13877685, %v2205_v22 }
 0xab4   : > { %v2218_v6 = vmul.f32 %v4462_v33, %v2204_v52  ;;  %v2466_v8 = vmul.f32 %v2464_v40, %v2456_v26  ;;  %v2457_v37 = vmul.f32 0.080537446, %v2455_v13  ;;  %v2339_v5 = vmul.f32 %v4465_v30, %v5939_v45 }
 0xab5   : > { %v2344_v2 = vmul.f32 %v2342_v34, %v2334_v56  ;;  %v2209_v57 = vmul.f32 %v4459_v16, %v2203_v60 }
 0xab6   : > { %v2220_v25 = vmul.f32 %v2218_v6, %v5897_v27  ;;  %v4474_v35 = vadd.f32 -0.3333295, %v2466_v8  ;;  %v4471_v63 = vadd.f32 -0.13877685, %v2457_v37  ;;  %v2341_v40 = vadd.f32 0.19977711, %v2339_v5 }
 0xab7   : > { %v4468_v55 = vadd.f32 -0.3333295, %v2344_v2  ;;  %v2211_v19 = vadd.f32 0.19977711, %v2209_v57  ;;  %v2842_v6 = vsel %vm2841_vm12, %v5889_v18, %v2840_v50 }
 0xab8   : > { %v2222_v17 = vadd.f32 %v2220_v25, %v5897_v27  ;;  %v2470_v3 = vmul.f32 %v4474_v35, %v2456_v26  ;;  %v2461_v22 = vmul.f32 %v4471_v63, %v2455_v13  ;;  %v2343_v37 = vmul.f32 %v2341_v40, %v5939_v45 }
 0xab9   : > { %v2348_v52 = vmul.f32 %v4468_v55, %v2334_v56  ;;  %v2213_v33 = vmul.f32 %v2211_v19, %v2203_v60  ;;  %v2833_v27 = vmul.f32 %v4864_v41, %v5903_v28  ;;  %v2844_v63 = vand.u32 2147483648, %v5889_v18  ;;  %v5969_v55 = vpop.permute.xlu0 %1025 }
 0xaba   : > { %v2224_v34 = vadd.f32 0.7853982, %v2222_v17  ;;  %v2472_v30 = vmul.f32 %v2470_v3, %v5911_v23  ;;  %v2463_v16 = vadd.f32 0.19977711, %v2461_v22  ;;  %v4467_v35 = vadd.f32 -0.3333295, %v2343_v37 }
 0xabb   : > { %v2350_v31 = vmul.f32 %v2348_v52, %v5917_v38  ;;  %v4461_v8 = vadd.f32 -0.3333295, %v2213_v33  ;;  %v2837_v22 = vand.u32 2147483648, %v5903_v28  ;;  %vm1031_vm5 = vcmp.gt.f32.partialorder %v5351_v54, %v5969_v55 }
 0xabc   : > { %v2226_v26 = vsel %vm2192_vm6, %v2224_v34, %v2222_v17  ;;  %v2474_v56 = vadd.f32 %v2472_v30, %v5911_v23  ;;  %v2465_v2 = vmul.f32 %v2463_v16, %v2455_v13  ;;  %v5973_v23 = vsel %vm2843_vm13, %v2844_v63, %v2842_v6 }
 0xabd   : > { %2251 = vrot.lane.b32.xlu1 %v2226_v26, %s5028_s27  ;;  %v2238_v57 = vsub.f32 1.5707964, %v2226_v26  ;;  %v2352_v5 = vadd.f32 %v2350_v31, %v5917_v38  ;;  %v2217_v25 = vmul.f32 %v4461_v8, %v2203_v60  ;;  %7425 = vst [vmem:[#allocation41_spill] sm:$0xff] %v5973_v23  ;;  %v2347_v38 = vmul.f32 %v4467_v35, %v5939_v45  ;;  %v5998_v31 = vpop.permute.xlu1 %1524 }
 0xabe   : > { %v4473_v50 = vadd.f32 -0.3333295, %v2465_v2  ;;  %v2835_v60 = vsel %vm2834_vm14, %v5903_v28, %v2833_v27  ;;  %v2476_v18 = vadd.f32 0.7853982, %v2474_v56  ;;  %v2847_v45 = vadd.f32 1e-06, %v5973_v23 }
 0xabf   : > { %2243 = vrot.lane.b32.xlu0 %v2238_v57, %s5028_s27  ;;  %v2354_v41 = vadd.f32 0.7853982, %v2352_v5  ;;  %v2219_v0 = vmul.f32 %v2217_v25, %v5935_v9  ;;  %v2349_v40 = vmul.f32 %v2347_v38, %v5930_v21  ;;  %v801_v63 = vsel %vm781_vm0, %v5587_v12, %v5577_v42 }
 0xac0   : > { %v2469_v19 = vmul.f32 %v4473_v50, %v2455_v13  ;;  %v5987_v13 = vsel %vm2836_vm15, %v2837_v22, %v2835_v60  ;;  %v2478_v34 = vsel %vm2444_vm7, %v2476_v18, %v2474_v56  ;;  %4865 = vrcp.f32 %v2847_v45  ;;  %v7428_v45 = vld [vmem:[#allocation23_spill] sm:$0xff] }
 0xac1   : > { %v2356_v17 = vsel %vm2322_vm8, %v2354_v41, %v2352_v5  ;;  %v2221_v3 = vadd.f32 %v2219_v0, %v5935_v9  ;;  %v5991_v9 = vpop.permute.xlu0 %1027  ;;  %v2351_v16 = vadd.f32 %v2349_v40, %v5930_v21  ;;  %v2846_v28 = vadd.f32 1e-06, %v5987_v13  ;;  %v1038_v27 = vpop.permute.xlu1 %1037 }
 0xac2   : > { %2379 = vrot.lane.b32.xlu1 %v2356_v17, %s5029_s28  ;;  %v2366_v52 = vsub.f32 1.5707964, %v2356_v17  ;;  %v2471_v33 = vmul.f32 %v2469_v19, %v5948_v36  ;;  %v2488_v37 = vsub.f32 1.5707964, %v2478_v34  ;;  %v805_v41 = vsub.f32 3.1415927, %v801_v63 }
 0xac3   : > { %v2223_v30 = vadd.f32 0.7853982, %v2221_v3  ;;  %4867 = vrcp.f32 %v2846_v28  ;;  %v802_v19 = vsel %vm782_vm1, %v5597_v10, %v5590_v15  ;;  %v929_v42 = vsel %vm909_vm3, %v5624_v44, %v5621_v11 }
 0xac4   : > { %2371 = vrot.lane.b32.xlu0 %v2366_v52, %s5029_s28  ;;  %v2473_v7 = vadd.f32 %v2471_v33, %v5948_v36  ;;  %v2353_v36 = vadd.f32 0.7853982, %v2351_v16  ;;  %v806_v47 = vsub.f32 3.1415927, %v802_v19  ;;  %v931_v53 = vsub.f32 3.1415927, %v929_v42 }
 0xac5   : > { %v2225_v20 = vsel %vm2191_vm10, %v2223_v30, %v2221_v3  ;;  %v1046_v21 = vpop.permute.xlu0 %1045  ;;  %v1527_v1 = vpop.permute.xlu1 %1526  ;;  %v930_v15 = vsel %vm910_vm4, %v7426_v24, %v5634_v14  ;;  %vm1530_vm6 = vcmp.gt.f32.partialorder %v5371_v62, %v5998_v31  ;;  %vm1032_vm7 = vcmp.gt.f32.partialorder %v5364_v59, %v5991_v9  ;;  %v7427_v52 = vld [vmem:[#allocation22_spill] sm:$0xff] }
 0xac6   : > { %2501 = vrot.lane.b32.xlu1 %v2478_v34, %s5028_s27  ;;  %v2475_v6 = vadd.f32 0.7853982, %v2473_v7  ;;  %v2355_v26 = vsel %vm2321_vm9, %v2353_v36, %v2351_v16  ;;  %v2237_v46 = vsub.f32 1.5707964, %v2225_v20  ;;  %v932_v32 = vsub.f32 3.1415927, %v930_v15 }
 0xac7   : > { %v2365_v57 = vsub.f32 1.5707964, %v2355_v26  ;;  %v1051_v44 = vsel %vm1031_vm5, %v1038_v27, %v1046_v21  ;;  %vm1531_vm8 = vcmp.gt.f32.partialorder %v5384_v4, %v1527_v1 }
 0xac8   : > { %v2477_v8 = vsel %vm2443_vm11, %v2475_v6, %v2473_v7  ;;  %v1053_v43 = vsub.f32 3.1415927, %v1051_v44 }
 0xac9   : > { %2499 = vrot.lane.b32.xlu0 %v2477_v8, %s5028_s27  ;;  %v2487_v56 = vsub.f32 1.5707964, %v2477_v8  ;;  %v1537_v2 = vpop.permute.xlu0 %1536  ;;  %v1545_v35 = vpop.permute.xlu1 %1544 }
 0xaca   : > { %2249 = vrot.lane.b32.xlu1 %v2225_v20, %s5028_s27  ;;  %v1550_v38 = vsel %vm1530_vm6, %v1537_v2, %v1545_v35 }
 0xacb   : > { %v1554_v54 = vsub.f32 3.1415927, %v1550_v38 }
 0xacd   : > { %2493 = vrot.lane.b32.xlu0 %v2488_v37, %s5028_s27  ;;  %v6012_v5 = vpop.eup %4865  ;;  %v1040_v51 = vpop.permute.xlu0 %1039 }
 0xace   : > { %2377 = vrot.lane.b32.xlu1 %v2355_v26, %s5029_s28  ;;  %v1048_v0 = vpop.permute.xlu1 %1047 }
 0xacf   : > { %v1052_v55 = vsel %vm1032_vm7, %v1040_v51, %v1048_v0 }
 0xad0   : > { %v6017_v25 = vpop.eup %4867  ;;  %v1054_v62 = vsub.f32 3.1415927, %v1052_v55 }
 0xad1   : > { %2241 = vrot.lane.b32.xlu0 %v2237_v46, %s5028_s27  ;;  %v1539_v50 = vpop.permute.xlu0 %1538 }
 0xad2   : > { %2491 = vrot.lane.b32.xlu1 %v2487_v56, %s5028_s27  ;;  %v1547_v12 = vpop.permute.xlu1 %1546 }
 0xad3   : > { %v1551_v3 = vsel %vm1531_vm8, %v1539_v50, %v1547_v12 }
 0xad4   : > { %v1555_v22 = vsub.f32 3.1415927, %v1551_v3 }
 0xad5   : > { %2369 = vrot.lane.b32.xlu0 %v2365_v57, %s5029_s28  ;;  %v1653_v49 = vpop.permute.xlu0 %1652 }
 0xad6   : > { %2858 = vrot.lane.b32.xlu1 %v6012_v5, %s5028_s27  ;;  %v1655_v11 = vpop.permute.xlu1 %1654  ;;  %vm1658_vm9 = vcmp.gt.f32.partialorder %v7427_v52, %v1653_v49  ;;  %v7429_v49 = vld [vmem:[#allocation36_spill] sm:$0xff] }
 0xad7   : > { %vm1659_vm10 = vcmp.gt.f32.partialorder %v7428_v45, %v1655_v11 }
 0xad9   : > { %2856 = vrot.lane.b32.xlu0 %v6017_v25, %s5028_s27  ;;  %v1665_v10 = vpop.permute.xlu0 %1664 }
 0xada   : > { %2866 = vrot.lane.b32.xlu1 %v6012_v5, %s5029_s28  ;;  %v1673_v60 = vpop.permute.xlu1 %1672 }
 0xadb   : > { %v1678_v33 = vsel %vm1658_vm9, %v1665_v10, %v1673_v60 }
 0xadc   : > { %v1680_v4 = vsub.f32 3.1415927, %v1678_v33 }
 0xadd   : > { %2864 = vrot.lane.b32.xlu0 %v6017_v25, %s5029_s28  ;;  %v1667_v14 = vpop.permute.xlu0 %1666 }
 0xade   : > { %817 = vrot.lane.b32.xlu1 %v801_v63, %s5026_s22  ;;  %v1675_v18 = vpop.permute.xlu1 %1674 }
 0xadf   : > { %v1679_v7 = vsel %vm1659_vm10, %v1667_v14, %v1675_v18 }
 0xae0   : > { %v1681_v34 = vsub.f32 3.1415927, %v1679_v7 }
 0xae1   : > { %809 = vrot.lane.b32.xlu0 %v805_v41, %s5026_s22  ;;  %v1775_v17 = vpop.permute.xlu0 %1774 }
 0xae2   : > { %819 = vrot.lane.b32.xlu1 %v802_v19, %s5026_s22  ;;  %v2230_v40 = vpop.permute.xlu1 %2229  ;;  %vm1780_vm11 = vcmp.gt.f32.partialorder %v7427_v52, %v1775_v17  ;;  %v7434_v17 = vld [vmem:[#allocation37_spill] sm:$0xff]  ;;  %v7435_v52 = vld [vmem:[#allocation34_spill] sm:$0xff] }
 0xae3   : > { %vm2235_vm12 = vcmp.gt.f32.partialorder %v5703_v29, %v2230_v40  ;;  %v7430_v29 = vld [vmem:[#allocation38_spill] sm:$0xff] }
 0xae5   : > { %811 = vrot.lane.b32.xlu0 %v806_v47, %s5026_s22  ;;  %v1777_v59 = vpop.permute.xlu0 %1776 }
 0xae6   : > { %943 = vrot.lane.b32.xlu1 %v929_v42, %s5027_s24  ;;  %v1787_v30 = vpop.permute.xlu1 %1786  ;;  %vm1781_vm13 = vcmp.gt.f32.partialorder %v7428_v45, %v1777_v59  ;;  %v6087_v42 = vmul.f32 %v6012_v5, %v7429_v49 }
 0xae8   : > { %v6096_v10 = vand.u32 2147483647, %v6087_v42 }
 0xae9   : > { %935 = vrot.lane.b32.xlu0 %v931_v53, %s5027_s24  ;;  %v1795_v9 = vpop.permute.xlu0 %1794  ;;  %v6092_v53 = vmul.f32 %v6017_v25, %v7430_v29 }
 0xaea   : > { %945 = vrot.lane.b32.xlu1 %v930_v15, %s5027_s24  ;;  %v1800_v16 = vsel %vm1780_vm11, %v1787_v30, %v1795_v9  ;;  %v2232_v31 = vpop.permute.xlu1 %2231  ;;  %vm2257_vm11 = vcmp.lt.f32.partialorder %v5822_v61, 0.0 }
 0xaeb   : > { %v1802_v6 = vsub.f32 3.1415927, %v1800_v16  ;;  %7431 = vst [vmem:[#allocation30_spill] sm:$0xff] %v6092_v53  ;;  %v6101_v5 = vand.u32 2147483647, %v6092_v53  ;;  %vm2236_vm14 = vcmp.gt.f32.partialorder %v5659_v58, %v2232_v31 }
 0xaed   : > { %937 = vrot.lane.b32.xlu0 %v932_v32, %s5027_s24  ;;  %v1789_v28 = vpop.permute.xlu0 %1788 }
 0xaee   : > { %1065 = vrot.lane.b32.xlu1 %v1051_v44, %s5026_s22  ;;  %v1797_v20 = vpop.permute.xlu1 %1796 }
 0xaef   : > { %v1801_v19 = vsel %vm1781_vm13, %v1789_v28, %v1797_v20  ;;  %vm2258_vm13 = vcmp.lt.f32.partialorder %v5839_v48, 0.0 }
 0xaf0   : > { %v1803_v12 = vsub.f32 3.1415927, %v1801_v19 }
 0xaf1   : > { %1057 = vrot.lane.b32.xlu0 %v1053_v43, %s5026_s22  ;;  %v2358_v8 = vpop.permute.xlu0 %2357 }
 0xaf2   : > { %1566 = vrot.lane.b32.xlu1 %v1550_v38, %s5026_s22  ;;  %v2360_v21 = vpop.permute.xlu1 %2359  ;;  %vm2363_vm15 = vcmp.gt.f32.partialorder %v7434_v17, %v2358_v8  ;;  %v7437_v8 = vld [vmem:[#allocation25_spill] sm:$0xff] }
 0xaf3   : > { %vm2364_vm0 = vcmp.gt.f32.partialorder %v7435_v52, %v2360_v21  ;;  %vm803_vm4 = vcmp.lt.f32.partialorder %v7437_v8, 0.0 }
 0xaf5   : > { %1558 = vrot.lane.b32.xlu0 %v1554_v54, %s5026_s22  ;;  %v6073_v36 = vpop.permute.xlu0 %2479 }
 0xaf6   : > { %1067 = vrot.lane.b32.xlu1 %v1052_v55, %s5026_s22  ;;  %vm2485_vm1 = vcmp.gt.f32.partialorder %v7434_v17, %v6073_v36 }
 0xaf9   : > { %1059 = vrot.lane.b32.xlu0 %v1054_v62, %s5026_s22  ;;  %v6075_v37 = vpop.permute.xlu0 %2481 }
 0xafa   : > { %1568 = vrot.lane.b32.xlu1 %v1551_v3, %s5026_s22  ;;  %vm2486_vm3 = vcmp.gt.f32.partialorder %v7435_v52, %v6075_v37  ;;  %v7438_v37 = vld [vmem:[#allocation24_spill] sm:$0xff] }
 0xafb   : > { %vm804_vm5 = vcmp.lt.f32.partialorder %v7438_v37, 0.0 }
 0xafd   : > { %1560 = vrot.lane.b32.xlu0 %v1555_v22, %s5026_s22 }
 0xafe   : > { %1692 = vrot.lane.b32.xlu1 %v1678_v33, %s5027_s24 }
 0xb01   : > { %1684 = vrot.lane.b32.xlu0 %v1680_v4, %s5027_s24 }
 0xb02   : > { %1694 = vrot.lane.b32.xlu1 %v1679_v7, %s5027_s24 }
 0xb05   : > { %1686 = vrot.lane.b32.xlu0 %v1681_v34, %s5027_s24 }
 0xb06   : > { %1814 = vrot.lane.b32.xlu1 %v1800_v16, %s5026_s22 }
 0xb09   : > { %1806 = vrot.lane.b32.xlu0 %v1802_v6, %s5026_s22 }
 0xb2f   : > { %v2252_v27 = vpop.permute.xlu1 %2251 }
 0xb31   : > { %v2244_v26 = vpop.permute.xlu0 %2243 }
 0xb32   : > { %v2256_v60 = vsel %vm2236_vm14, %v2244_v26, %v2252_v27 }
 0xb33   : > { %v2260_v62 = vsub.f32 3.1415927, %v2256_v60 }
 0xb34   : > { %v2380_v46 = vpop.permute.xlu1 %2379 }
 0xb36   : > { %v2372_v56 = vpop.permute.xlu0 %2371 }
 0xb37   : > { %v2384_v33 = vsel %vm2364_vm0, %v2372_v56, %v2380_v46 }
 0xb38   : > { %v6077_v2 = vpop.permute.xlu1 %2501  ;;  %v2386_v45 = vsub.f32 3.1415927, %v2384_v33 }
 0xb3b   : > { %v2500_v1 = vpop.permute.xlu0 %2499 }
 0xb3c   : > { %v2250_v57 = vpop.permute.xlu1 %2249 }
 0xb3f   : > { %v6079_v51 = vpop.permute.xlu0 %2493 }
 0xb40   : > { %v2378_v35 = vpop.permute.xlu1 %2377  ;;  %v2506_v16 = vsel %vm2486_vm3, %v6079_v51, %v6077_v2 }
 0xb41   : > { %v2508_v31 = vsub.f32 3.1415927, %v2506_v16 }
 0xb43   : > { %v2242_v63 = vpop.permute.xlu0 %2241 }
 0xb44   : > { %v2255_v50 = vsel %vm2235_vm12, %v2242_v63, %v2250_v57  ;;  %v2492_v41 = vpop.permute.xlu1 %2491 }
 0xb45   : > { %v2259_v0 = vsub.f32 3.1415927, %v2255_v50  ;;  %2271 = vrot.lane.b32.xlu1 %v2255_v50, %s5026_s22  ;;  %v2505_v7 = vsel %vm2485_vm1, %v2492_v41, %v2500_v1  ;;  %v7439_v50 = vld [vmem:[#allocation14_spill] sm:$0xff] }
 0xb46   : > { %v2507_v34 = vsub.f32 3.1415927, %v2505_v7  ;;  %vm825_vm6 = vcmp.lt.f32.partialorder %v7439_v50, 0.0 }
 0xb47   : > { %v2370_v47 = vpop.permute.xlu0 %2369  ;;  %2263 = vrot.lane.b32.xlu0 %v2259_v0, %s5026_s22 }
 0xb48   : > { %v2859_v24 = vpop.permute.xlu1 %2858  ;;  %v2383_v3 = vsel %vm2363_vm15, %v2370_v47, %v2378_v35  ;;  %v7440_v47 = vld [vmem:[#allocation28_spill] sm:$0xff] }
 0xb49   : > { %1816 = vrot.lane.b32.xlu1 %v1801_v19, %s5026_s22  ;;  %v6114_v43 = vmul.f32 %v2859_v24, %v7429_v49  ;;  %v2385_v59 = vsub.f32 3.1415927, %v2383_v3  ;;  %vm1552_vm7 = vcmp.lt.f32.partialorder %v7440_v47, 0.0 }
 0xb4b   : > { %v2857_v15 = vpop.permute.xlu0 %2856  ;;  %1808 = vrot.lane.b32.xlu0 %v1803_v12, %s5026_s22  ;;  %v6122_v54 = vand.u32 2147483647, %v6114_v43 }
 0xb4c   : > { %v2867_v11 = vpop.permute.xlu1 %2866  ;;  %v6145_v9 = vmul.f32 %v2857_v15, %v7430_v29 }
 0xb4d   : > { %2934 = vrot.lane.b32.xlu1 %v6096_v10, %s5028_s27  ;;  %v6125_v55 = vmul.f32 %v2867_v11, %v7429_v49 }
 0xb4e   : > { %7436 = vst [vmem:[#allocation36_spill] sm:$0xff] %v6145_v9  ;;  %v6155_v6 = vand.u32 2147483647, %v6145_v9 }
 0xb4f   : > { %v2865_v32 = vpop.permute.xlu0 %2864  ;;  %3060 = vrot.lane.b32.xlu0 %v6101_v5, %s5029_s28  ;;  %7433 = vst [vmem:[#allocation23_spill] sm:$0xff] %v6125_v55  ;;  %v6133_v58 = vand.u32 2147483647, %v6125_v55 }
 0xb50   : > { %v6106_v25 = vmul.f32 %v2865_v32, %v7430_v29  ;;  %v818_v38 = vpop.permute.xlu1 %817  ;;  %v7363_v32 = vmov 2  }
 0xb51   : > { %3062 = vrot.lane.b32.xlu1 %v6096_v10, %s5029_s28  ;;  %4735 = vset.pattern.permute.xlu0 %v7363_v32 }
 0xb52   : > { %7432 = vst [vmem:[#allocation22_spill] sm:$0xff] %v6106_v25  ;;  %v6111_v44 = vand.u32 2147483647, %v6106_v25 }
 0xb53   : > { %v810_v14 = vpop.permute.xlu0 %809 }
 0xb54   : > { %3008 = vrot.lane.b32.xlu0 %v6111_v44, %s5027_s24  ;;  %v820_v22 = vpop.permute.xlu1 %819  ;;  %v823_v20 = vsel %vm803_vm4, %v810_v14, %v818_v38  ;;  %v7441_v14 = vld [vmem:[#allocation15_spill] sm:$0xff]  ;;  %v7361_v38 = vmov 0  }
 0xb55   : > { %2932 = vrot.lane.b32.xlu1 %v6101_v5, %s5028_s27  ;;  %v827_v21 = vsub.f32 0.0, %v823_v20  ;;  %vm826_vm8 = vcmp.lt.f32.partialorder %v7441_v14, 0.0 }
 0xb56   : > { %4728 = vset.pattern.permute.xlu1 %v7361_v38 }
 0xb57   : > { %v812_v18 = vpop.permute.xlu0 %811 }
 0xb58   : > { %3130 = vrot.lane.b32.xlu0 %v6111_v44, %s5026_s22  ;;  %v944_v4 = vpop.permute.xlu1 %943  ;;  %v824_v26 = vsel %vm804_vm5, %v812_v18, %v820_v22  ;;  %v7442_v18 = vld [vmem:[#allocation29_spill] sm:$0xff] }
 0xb59   : > { %2880 = vrot.lane.b32.xlu1 %v6122_v54, %s5026_s22  ;;  %v828_v46 = vsub.f32 0.0, %v824_v26  ;;  %vm1553_vm9 = vcmp.lt.f32.partialorder %v7442_v18, 0.0 }
 0xb5b   : > { %v936_v40 = vpop.permute.xlu0 %935 }
 0xb5c   : > { %2265 = vrot.lane.b32.xlu0 %v2260_v62, %s5026_s22  ;;  %v946_v28 = vpop.permute.xlu1 %945  ;;  %v949_v2 = vsel %vm803_vm4, %v936_v40, %v944_v4 }
 0xb5d   : > { %3010 = vrot.lane.b32.xlu1 %v6133_v58, %s5027_s24  ;;  %v953_v57 = vsub.f32 0.0, %v949_v2 }
 0xb5f   : > { %v938_v30 = vpop.permute.xlu0 %937 }
 0xb60   : > { %2389 = vrot.lane.b32.xlu0 %v2385_v59, %s5027_s24  ;;  %v1066_v27 = vpop.permute.xlu1 %1065  ;;  %v950_v51 = vsel %vm804_vm5, %v938_v30, %v946_v28 }
 0xb61   : > { %3132 = vrot.lane.b32.xlu1 %v6133_v58, %s5026_s22  ;;  %v954_v63 = vsub.f32 0.0, %v950_v51 }
 0xb63   : > { %v1058_v36 = vpop.permute.xlu0 %1057 }
 0xb64   : > { %2391 = vrot.lane.b32.xlu0 %v2386_v45, %s5027_s24  ;;  %v1567_v1 = vpop.permute.xlu1 %1566  ;;  %v1071_v0 = vsel %vm825_vm6, %v1058_v36, %v1066_v27 }
 0xb65   : > { %3184 = vrot.lane.b32.xlu1 %v6122_v54, %s5028_s27  ;;  %v1073_v19 = vsub.f32 0.0, %v1071_v0 }
 0xb67   : > { %v1559_v56 = vpop.permute.xlu0 %1558 }
 0xb68   : > { %2511 = vrot.lane.b32.xlu0 %v2507_v34, %s5026_s22  ;;  %v1068_v41 = vpop.permute.xlu1 %1067  ;;  %v1572_v24 = vsel %vm1552_vm7, %v1559_v56, %v1567_v1 }
 0xb69   : > { %2878 = vrot.lane.b32.xlu1 %v6155_v6, %s5026_s22  ;;  %v1576_v11 = vsub.f32 0.0, %v1572_v24 }
 0xb6b   : > { %v1060_v35 = vpop.permute.xlu0 %1059 }
 0xb6c   : > { %2513 = vrot.lane.b32.xlu0 %v2508_v31, %s5026_s22  ;;  %v1569_v15 = vpop.permute.xlu1 %1568 }
 0xb6d   : > { %2273 = vrot.lane.b32.xlu1 %v2256_v60, %s5026_s22  ;;  %v1072_v60 = vsel %vm826_vm8, %v1060_v35, %v1068_v41 }
 0xb6e   : > { %v1074_v62 = vsub.f32 0.0, %v1072_v60 }
 0xb6f   : > { %v1561_v12 = vpop.permute.xlu0 %1560 }
 0xb70   : > { %831 = vrot.lane.b32.xlu0 %v827_v21, %s5028_s27  ;;  %v1573_v22 = vsel %vm1553_vm9, %v1561_v12, %v1569_v15 }
 0xb71   : > { %2397 = vrot.lane.b32.xlu1 %v2383_v3, %s5027_s24  ;;  %v1693_v3 = vpop.permute.xlu1 %1692  ;;  %v1577_v52 = vsub.f32 0.0, %v1573_v22 }
 0xb73   : > { %v1685_v17 = vpop.permute.xlu0 %1684 }
 0xb74   : > { %833 = vrot.lane.b32.xlu0 %v828_v46, %s5028_s27  ;;  %v7444_v46 = vld [vmem:[#allocation19_spill] sm:$0xff] }
 0xb75   : > { %2399 = vrot.lane.b32.xlu1 %v2384_v33, %s5027_s24  ;;  %v1698_v33 = vsel %vm1552_vm7, %v1685_v17, %v1693_v3  ;;  %v1695_v40 = vpop.permute.xlu1 %1694  ;;  %vm1575_vm12 = vcmp.lt.f32.partialorder %v7444_v46, 0.0 }
 0xb76   : > { %v1702_v45 = vsub.f32 0.0, %v1698_v33 }
 0xb77   : > { %v1687_v59 = vpop.permute.xlu0 %1686 }
 0xb78   : > { %957 = vrot.lane.b32.xlu0 %v953_v57, %s5029_s28  ;;  %v1699_v4 = vsel %vm1553_vm9, %v1687_v59, %v1695_v40 }
 0xb79   : > { %2519 = vrot.lane.b32.xlu1 %v2505_v7, %s5026_s22  ;;  %v1703_v34 = vsub.f32 0.0, %v1699_v4  ;;  %v1815_v30 = vpop.permute.xlu1 %1814 }
 0xb7b   : > { %v1807_v7 = vpop.permute.xlu0 %1806 }
 0xb7c   : > { %959 = vrot.lane.b32.xlu0 %v954_v63, %s5029_s28 }
 0xb7d   : > { %2521 = vrot.lane.b32.xlu1 %v2506_v16, %s5026_s22  ;;  %v7443_v16 = vld [vmem:[#allocation18_spill] sm:$0xff] }
 0xb7e   : > { %vm1574_vm10 = vcmp.lt.f32.partialorder %v7443_v16, 0.0 }
 0xb7f   : > { %v1820_v28 = vsel %vm1574_vm10, %v1807_v7, %v1815_v30 }
 0xb80   : > { %1077 = vrot.lane.b32.xlu0 %v1073_v19, %s5028_s27  ;;  %v1822_v31 = vsub.f32 0.0, %v1820_v28 }
 0xb81   : > { %839 = vrot.lane.b32.xlu1 %v823_v20, %s5028_s27 }
 0xb84   : > { %1580 = vrot.lane.b32.xlu0 %v1576_v11, %s5028_s27 }
 0xb85   : > { %841 = vrot.lane.b32.xlu1 %v824_v26, %s5028_s27 }
 0xb88   : > { %1079 = vrot.lane.b32.xlu0 %v1074_v62, %s5028_s27 }
 0xb89   : > { %965 = vrot.lane.b32.xlu1 %v949_v2, %s5029_s28 }
 0xb8c   : > { %1582 = vrot.lane.b32.xlu0 %v1577_v52, %s5028_s27 }
 0xb8d   : > { %967 = vrot.lane.b32.xlu1 %v950_v51, %s5029_s28 }
 0xb90   : > { %1706 = vrot.lane.b32.xlu0 %v1702_v45, %s5029_s28 }
 0xb91   : > { %1085 = vrot.lane.b32.xlu1 %v1071_v0, %s5028_s27 }
 0xb94   : > { %1708 = vrot.lane.b32.xlu0 %v1703_v34, %s5029_s28 }
 0xb95   : > { %1588 = vrot.lane.b32.xlu1 %v1572_v24, %s5028_s27 }
 0xb98   : > { %1826 = vrot.lane.b32.xlu0 %v1822_v31, %s5028_s27 }
 0xb99   : > { %1087 = vrot.lane.b32.xlu1 %v1072_v60, %s5028_s27 }
 0xb9d   : > { %1590 = vrot.lane.b32.xlu1 %v1573_v22, %s5028_s27 }
 0xba1   : > { %1714 = vrot.lane.b32.xlu1 %v1698_v33, %s5029_s28 }
 0xba5   : > { %1716 = vrot.lane.b32.xlu1 %v1699_v4, %s5029_s28 }
 0xba9   : > { %1834 = vrot.lane.b32.xlu1 %v1820_v28, %s5028_s27 }
 0xbb7   : > { %v2272_v20 = vpop.permute.xlu1 %2271 }
 0xbb9   : > { %v2264_v36 = vpop.permute.xlu0 %2263 }
 0xbba   : > { %v2277_v21 = vsel %vm2257_vm11, %v2264_v36, %v2272_v20 }
 0xbbb   : > { %v2281_v27 = vsub.f32 0.0, %v2277_v21  ;;  %2293 = vrot.lane.b32.xlu1 %v2277_v21, %s5028_s27  ;;  %v1817_v26 = vpop.permute.xlu1 %1816 }
 0xbbd   : > { %v1809_v56 = vpop.permute.xlu0 %1808  ;;  %2285 = vrot.lane.b32.xlu0 %v2281_v27, %s5028_s27 }
 0xbbe   : > { %v1821_v2 = vsel %vm1575_vm12, %v1809_v56, %v1817_v26 }
 0xbbf   : > { %v1823_v1 = vsub.f32 0.0, %v1821_v2  ;;  %1836 = vrot.lane.b32.xlu1 %v1821_v2, %s5028_s27  ;;  %v6216_v57 = vpop.permute.xlu1 %2934 }
 0xbc1   : > { %v6218_v51 = vpop.permute.xlu0 %3060  ;;  %1828 = vrot.lane.b32.xlu0 %v1823_v1, %s5028_s27 }
 0xbc3   : > { %v6221_v35 = vpop.permute.xlu1 %3062 }
 0xbc6   : > { %v3009_v63 = vpop.permute.xlu0 %3008 }
 0xbc7   : > { %v3014_v41 = vmax.f32 %v6101_v5, %v3009_v63  ;;  %v6224_v0 = vpop.permute.xlu1 %2932  ;;  %v3016_v45 = vmin.f32 %v6101_v5, %v3009_v63 }
 0xbc9   : > { %v3018_v19 = vmax.f32 %v3014_v41, 1e-30 }
 0xbca   : > { %v3131_v12 = vpop.permute.xlu0 %3130 }
 0xbcb   : > { %4869 = vrcp.f32 %v3018_v19  ;;  %v3136_v24 = vmax.f32 %v6155_v6, %v3131_v12  ;;  %v2881_v15 = vpop.permute.xlu1 %2880  ;;  %v3138_v31 = vmin.f32 %v6155_v6, %v3131_v12 }
 0xbcc   : > { %v2885_v11 = vmax.f32 %v6096_v10, %v2881_v15  ;;  %v2887_v21 = vmin.f32 %v6096_v10, %v2881_v15 }
 0xbcd   : > { %v3140_v60 = vmax.f32 %v3136_v24, 1e-30 }
 0xbce   : > { %v2889_v17 = vmax.f32 %v2885_v11, 1e-30  ;;  %v2266_v22 = vpop.permute.xlu0 %2265 }
 0xbcf   : > { %4871 = vrcp.f32 %v3140_v60  ;;  %v3011_v62 = vpop.permute.xlu1 %3010 }
 0xbd0   : > { %4873 = vrcp.f32 %v2889_v17  ;;  %v3015_v3 = vmax.f32 %v6096_v10, %v3011_v62  ;;  %v3017_v24 = vmin.f32 %v6096_v10, %v3011_v62 }
 0xbd2   : > { %v3019_v52 = vmax.f32 %v3015_v3, 1e-30  ;;  %v2390_v4 = vpop.permute.xlu0 %2389 }
 0xbd3   : > { %v3133_v59 = vpop.permute.xlu1 %3132 }
 0xbd4   : > { %4875 = vrcp.f32 %v3019_v52  ;;  %v3137_v33 = vmax.f32 %v6122_v54, %v3133_v59  ;;  %v3139_v10 = vmin.f32 %v6122_v54, %v3133_v59 }
 0xbd6   : > { %v3141_v40 = vmax.f32 %v3137_v33, 1e-30  ;;  %v2392_v2 = vpop.permute.xlu0 %2391 }
 0xbd7   : > { %v6231_v7 = vpop.permute.xlu1 %3184 }
 0xbd8   : > { %v4870_v34 = vpop.eup %4869  ;;  %4877 = vrcp.f32 %v3141_v40 }
 0xbd9   : > { %v6233_v30 = vmul.f32 %v4870_v34, %v3016_v45 }
 0xbda   : > { %v2512_v3 = vpop.permute.xlu0 %2511 }
 0xbdb   : > { %v3028_v28 = vadd.f32 1.0, %v6233_v30  ;;  %v2879_v20 = vpop.permute.xlu1 %2878  ;;  %v4485_v59 = vadd.f32 -1.0, %v6233_v30  ;;  %vm3024_vm15 = vcmp.gt.f32.partialorder %v6233_v30, 0.41421357 }
 0xbdc   : > { %v4872_v36 = vpop.eup %4871  ;;  %v2884_v27 = vmax.f32 %v6101_v5, %v2879_v20 }
 0xbdd   : > { %v4874_v26 = vpop.eup %4873  ;;  %4879 = vrcp.f32 %v3028_v28  ;;  %v6239_v56 = vmul.f32 %v4872_v36, %v3138_v31 }
 0xbde   : > { %v6241_v1 = vmul.f32 %v4874_v26, %v2887_v21  ;;  %v2888_v63 = vmax.f32 %v2884_v27, 1e-30  ;;  %v2514_v36 = vpop.permute.xlu0 %2513  ;;  %v7445_v26 = vld [vmem:[#allocation33_spill] sm:$0xff] }
 0xbdf   : > { %v3150_v41 = vadd.f32 1.0, %v6239_v56  ;;  %v2274_v19 = vpop.permute.xlu1 %2273  ;;  %vm2279_vm14 = vcmp.lt.f32.partialorder %v7445_v26, 0.0  ;;  %vm3146_vm1 = vcmp.gt.f32.partialorder %v6239_v56, 0.41421357  ;;  %v7376_v26 = vmov 1  }
 0xbe0   : > { %v2899_v12 = vadd.f32 1.0, %v6241_v1  ;;  %4881 = vrcp.f32 %v2888_v63  ;;  %v2278_v15 = vsel %vm2258_vm13, %v2266_v22, %v2274_v19  ;;  %vm2895_vm3 = vcmp.gt.f32.partialorder %v6241_v1, 0.41421357 }
 0xbe1   : > { %v4876_v11 = vpop.eup %4875  ;;  %4883 = vrcp.f32 %v3150_v41  ;;  %v2282_v60 = vsub.f32 0.0, %v2278_v15  ;;  %2295 = vrot.lane.b32.xlu1 %v2278_v15, %s5028_s27  ;;  %v2886_v41 = vmin.f32 %v6101_v5, %v2879_v20 }
 0xbe2   : > { %4885 = vrcp.f32 %v2899_v12  ;;  %v6250_v17 = vmul.f32 %v4876_v11, %v3017_v24  ;;  %v4491_v12 = vadd.f32 -1.0, %v6239_v56 }
 0xbe3   : > { %2287 = vrot.lane.b32.xlu0 %v2282_v60, %s5028_s27  ;;  %v2398_v52 = vpop.permute.xlu1 %2397  ;;  %v4480_v60 = vadd.f32 -1.0, %v6241_v1 }
 0xbe4   : > { %v3029_v33 = vadd.f32 1.0, %v6250_v17  ;;  %v2403_v62 = vsel %vm2257_vm11, %v2390_v4, %v2398_v52  ;;  %vm3025_vm4 = vcmp.gt.f32.partialorder %v6250_v17, 0.41421357  ;;  %vm3067_vm11 = vcmp.gt.f32.partialorder %v6133_v58, %v6221_v35 }
 0xbe5   : > { %v4878_v22 = vpop.eup %4877  ;;  %v2407_v40 = vsub.f32 0.0, %v2403_v62  ;;  %2419 = vrot.lane.b32.xlu1 %v2403_v62, %s5029_s28 }
 0xbe6   : > { %4887 = vrcp.f32 %v3029_v33  ;;  %v6258_v45 = vmul.f32 %v4878_v22, %v3139_v10  ;;  %v6286_v33 = vpop.permute.xlu0 %831  ;;  %v7446_v10 = vld [vmem:[#allocation31_spill] sm:$0xff] }
 0xbe7   : > { %2411 = vrot.lane.b32.xlu0 %v2407_v40, %s5029_s28  ;;  %v2400_v34 = vpop.permute.xlu1 %2399  ;;  %vm2280_vm0 = vcmp.lt.f32.partialorder %v7446_v10, 0.0 }
 0xbe8   : > { %v3151_v28 = vadd.f32 1.0, %v6258_v45  ;;  %v2404_v31 = vsel %vm2258_vm13, %v2392_v2, %v2400_v34  ;;  %vm3147_vm5 = vcmp.gt.f32.partialorder %v6258_v45, 0.41421357  ;;  %vm3189_vm13 = vcmp.gt.f32.partialorder %v6133_v58, %v6231_v7 }
 0xbe9   : > { %v2408_v21 = vsub.f32 0.0, %v2404_v31  ;;  %2421 = vrot.lane.b32.xlu1 %v2404_v31, %s5029_s28 }
 0xbea   : > { %v4880_v4 = vpop.eup %4879  ;;  %4889 = vrcp.f32 %v3151_v28  ;;  %v4486_v28 = vadd.f32 -1.0, %v6250_v17 }
 0xbeb   : > { %v3031_v27 = vmul.f32 %v4880_v4, %v4485_v59  ;;  %2413 = vrot.lane.b32.xlu0 %v2408_v21, %s5029_s28  ;;  %v2520_v63 = vpop.permute.xlu1 %2519 }
 0xbec   : > { %v2525_v19 = vsel %vm2279_vm14, %v2512_v3, %v2520_v63 }
 0xbed   : > { %v4882_v2 = vpop.eup %4881  ;;  %v2527_v24 = vsub.f32 0.0, %v2525_v19  ;;  %2539 = vrot.lane.b32.xlu1 %v2525_v19, %s5028_s27  ;;  %v6277_v15 = vsel %vm3024_vm15, %v3031_v27, %v6233_v30  ;;  %v7456_v30 = vld [vmem:[#allocation7_spill] sm:$0xff] }
 0xbee   : > { %v4884_v11 = vpop.eup %4883  ;;  %v6280_v5 = vmul.f32 %v4882_v2, %v2886_v41  ;;  %v6284_v20 = vmul.f32 %v6277_v15, %v6277_v15  ;;  %v6317_v2 = vpop.permute.xlu0 %833 }
 0xbef   : > { %v4886_v3 = vpop.eup %4885  ;;  %v3153_v52 = vmul.f32 %v4884_v11, %v4491_v12  ;;  %2531 = vrot.lane.b32.xlu0 %v2527_v24, %s5028_s27  ;;  %v2522_v62 = vpop.permute.xlu1 %2521  ;;  %v7447_v12 = vld [vmem:[#allocation11_spill] sm:$0xff]  ;;  %v4492_v11 = vadd.f32 -1.0, %v6258_v45 }
 0xbf0   : > { %v2903_v22 = vmul.f32 %v4886_v3, %v4480_v60  ;;  %v2898_v40 = vadd.f32 1.0, %v6280_v5  ;;  %v2526_v34 = vsel %vm2280_vm0, %v2514_v36, %v2522_v62  ;;  %v3038_v36 = vmul.f32 0.080537446, %v6284_v20 }
 0xbf1   : > { %v2528_v31 = vsub.f32 0.0, %v2526_v34  ;;  %2541 = vrot.lane.b32.xlu1 %v2526_v34, %s5028_s27  ;;  %v6300_v59 = vsel %vm3146_vm1, %v3153_v52, %v6239_v56  ;;  %vm2894_vm9 = vcmp.gt.f32.partialorder %v6280_v5, 0.41421357 }
 0xbf2   : > { %4891 = vrcp.f32 %v2898_v40  ;;  %v6305_v21 = vsel %vm2895_vm3, %v2903_v22, %v6241_v1  ;;  %v6310_v4 = vmul.f32 %v6300_v59, %v6300_v59  ;;  %v4487_v3 = vadd.f32 -0.13877685, %v3038_v36  ;;  %v958_v32 = vpop.permute.xlu0 %957 }
 0xbf3   : > { %v4888_v27 = vpop.eup %4887  ;;  %2533 = vrot.lane.b32.xlu0 %v2528_v31, %s5028_s27  ;;  %v6313_v63 = vpop.permute.xlu1 %839  ;;  %v2907_v41 = vmul.f32 %v6305_v21, %v6305_v21  ;;  %v7448_v31 = vld [vmem:[#allocation6_spill] sm:$0xff] }
 0xbf4   : > { %v3033_v19 = vmul.f32 %v4888_v27, %v4486_v28  ;;  %v3160_v52 = vmul.f32 0.080537446, %v6310_v4 }
 0xbf5   : > { %1100 = vperm.xlu1 %4728, %v7447_v12   ;;  %v2909_v24 = vmul.f32 0.080537446, %v2907_v41 }
 0xbf6   : > { %v6325_v60 = vsel %vm3025_vm4, %v3033_v19, %v6250_v17  ;;  %v3042_v19 = vmul.f32 %v4487_v3, %v6284_v20  ;;  %v4493_v38 = vadd.f32 -0.13877685, %v3160_v52  ;;  %v4479_v52 = vadd.f32 -1.0, %v6280_v5 }
 0xbf7   : > { %v4890_v62 = vpop.eup %4889  ;;  %v6328_v22 = vpop.permute.xlu1 %841  ;;  %v4482_v40 = vadd.f32 -0.13877685, %v2909_v24  ;;  %v3037_v34 = vmul.f32 %v6325_v60, %v6325_v60  ;;  %v7449_v24 = vld [vmem:[#allocation16_spill] sm:$0xff] }
 0xbf8   : > { %v3155_v28 = vmul.f32 %v4890_v62, %v4492_v11  ;;  %vm951_vm7 = vcmp.lt.f32.partialorder %v7449_v24, 0.0  ;;  %v3044_v48 = vadd.f32 0.19977711, %v3042_v19 }
 0xbf9   : > { %1117 = vperm.xlu1 %4728, %v7448_v31   ;;  %v2913_v27 = vmul.f32 %v4482_v40, %v2907_v41  ;;  %v3039_v12 = vmul.f32 0.080537446, %v3037_v34 }
 0xbfa   : > { %v6337_v36 = vsel %vm3147_vm5, %v3155_v28, %v6258_v45  ;;  %v846_v45 = vsel %vm826_vm8, %v6317_v2, %v6328_v22 }
 0xbfb   : > { %v966_v25 = vpop.permute.xlu1 %965  ;;  %v2915_v55 = vadd.f32 0.19977711, %v2913_v27  ;;  %v4488_v11 = vadd.f32 -0.13877685, %v3039_v12  ;;  %v3159_v62 = vmul.f32 %v6337_v36, %v6337_v36  ;;  %v3164_v27 = vmul.f32 %v4493_v38, %v6310_v4 }
 0xbfc   : > { %v971_v40 = vsel %vm951_vm7, %v958_v32, %v966_v25  ;;  %v3046_v38 = vmul.f32 %v3044_v48, %v6284_v20 }
 0xbfd   : > { %4729 = vset.pattern.permute.xlu1 %v7376_v26  ;;  %1185 = vperm.xlu0 %4735, %v971_v40   ;;  %v2917_v28 = vmul.f32 %v2915_v55, %v2907_v41  ;;  %v3043_v46 = vmul.f32 %v4488_v11, %v3037_v34  ;;  %v3161_v3 = vmul.f32 0.080537446, %v3159_v62  ;;  %v7450_v11 = vld [vmem:[#allocation5_spill] sm:$0xff]  ;;  %v3166_v40 = vadd.f32 0.19977711, %v3164_v27 }
 0xbfe   : > { %1134 = vperm.xlu1 %4729, %v7448_v31   ;;  %v4489_v26 = vadd.f32 -0.3333295, %v3046_v38 }
 0xbff   : > { %v4892_v12 = vpop.eup %4891  ;;  %v4484_v61 = vadd.f32 -0.3333295, %v2917_v28  ;;  %v3045_v18 = vadd.f32 0.19977711, %v3043_v46  ;;  %v4494_v23 = vadd.f32 -0.13877685, %v3161_v3  ;;  %v3168_v53 = vmul.f32 %v3166_v40, %v6310_v4 }
 0xc00   : > { %v2901_v9 = vmul.f32 %v4892_v12, %v4479_v52  ;;  %v7451_v12 = vmov 2   ;;  %v3050_v38 = vmul.f32 %v4489_v26, %v6284_v20  ;;  %v845_v26 = vsel %vm825_vm6, %v6286_v33, %v6313_v63 }
 0xc01   : > { %3182 = vrot.lane.b32.xlu0 %v6155_v6, %s5028_s27  ;;  %v2921_v25 = vmul.f32 %v4484_v61, %v2907_v41  ;;  %v3047_v32 = vmul.f32 %v3045_v18, %v3037_v34  ;;  %v3165_v55 = vmul.f32 %v4494_v23, %v3159_v62 }
 0xc02   : > { %1138 = vperm.xlu1 %4729, %v7450_v11   ;;  %v2904_v19 = vsel %vm2894_vm9, %v2901_v9, %v6280_v5 }
 0xc03   : > { %v2923_v46 = vmul.f32 %v2921_v25, %v6305_v21  ;;  %v4490_v28 = vadd.f32 -0.3333295, %v3047_v32  ;;  %v3167_v3 = vadd.f32 0.19977711, %v3165_v55  ;;  %v2906_v52 = vmul.f32 %v2904_v19, %v2904_v19 }
 0xc05   : > { %v2925_v61 = vadd.f32 %v2923_v46, %v6305_v21  ;;  %v3051_v18 = vmul.f32 %v4490_v28, %v3037_v34  ;;  %v3169_v23 = vmul.f32 %v3167_v3, %v3159_v62  ;;  %v2908_v41 = vmul.f32 0.080537446, %v2906_v52 }
 0xc06   : > { %4730 = vset.pattern.permute.xlu1 %v7451_v12  ;;  %v4495_v3 = vadd.f32 -0.3333295, %v3168_v53  ;;  %v3052_v53 = vmul.f32 %v3050_v38, %v6277_v15  ;;  %v968_v38 = vpop.permute.xlu1 %967 }
 0xc07   : > { %1150 = vperm.xlu1 %4730, %v7448_v31   ;;  %v2927_v9 = vadd.f32 0.7853982, %v2925_v61  ;;  %v3053_v48 = vmul.f32 %v3051_v18, %v6325_v60  ;;  %v4496_v27 = vadd.f32 -0.3333295, %v3169_v23  ;;  %v4481_v25 = vadd.f32 -0.13877685, %v2908_v41 }
 0xc08   : > { %v3172_v41 = vmul.f32 %v4495_v3, %v6310_v4  ;;  %v3054_v33 = vadd.f32 %v3052_v53, %v6277_v15 }
 0xc09   : > { %v6365_v32 = vsel %vm2895_vm3, %v2927_v9, %v2925_v61  ;;  %v3055_v21 = vadd.f32 %v3053_v48, %v6325_v60  ;;  %v3173_v34 = vmul.f32 %v4496_v27, %v3159_v62  ;;  %v2912_v55 = vmul.f32 %v4481_v25, %v2906_v52  ;;  %v7454_v25 = vld [vmem:[#allocation27_spill] sm:$0xff] }
 0xc0a   : > { %v2941_v46 = vsub.f32 1.5707964, %v6365_v32  ;;  %v7452_v61 = vmov 1   ;;  %v3174_v63 = vmul.f32 %v3172_v41, %v6300_v59  ;;  %v7453_v27 = vmov 0   ;;  %v1086_v5 = vpop.permute.xlu1 %1085 }
 0xc0b   : > { %1154 = vperm.xlu1 %4730, %v7450_v11   ;;  %v3057_v31 = vadd.f32 0.7853982, %v3055_v21  ;;  %v3175_v40 = vmul.f32 %v3173_v34, %v6337_v36  ;;  %v2914_v28 = vadd.f32 0.19977711, %v2912_v55  ;;  %v3056_v34 = vadd.f32 0.7853982, %v3054_v33 }
 0xc0c   : > { %2946 = vrot.lane.b32.xlu0 %v2941_v46, %s5028_s27  ;;  %v3176_v55 = vadd.f32 %v3174_v63, %v6300_v59  ;;  %vm3066_vm3 = vcmp.gt.f32.partialorder %v6111_v44, %v6218_v51 }
 0xc0d   : > { %v3059_v1 = vsel %vm3025_vm4, %v3057_v31, %v3055_v21  ;;  %v3177_v60 = vadd.f32 %v3175_v40, %v6337_v36  ;;  %v2916_v62 = vmul.f32 %v2914_v28, %v2906_v52  ;;  %v3058_v46 = vsel %vm3024_vm15, %v3056_v34, %v3054_v33  ;;  %v7455_v31 = vld [vmem:[#allocation26_spill] sm:$0xff]  ;;  %v960_v40 = vpop.permute.xlu0 %959  ;;  %v7457_v28 = vld [vmem:[#allocation17_spill] sm:$0xff] }
 0xc0e   : > { %v3069_v20 = vsub.f32 1.5707964, %v3059_v1  ;;  %v3068_v59 = vsub.f32 1.5707964, %v3058_v46  ;;  %vm952_vm6 = vcmp.lt.f32.partialorder %v7457_v28, 0.0 }
 0xc0f   : > { %4731 = vset.pattern.permute.xlu1 %v7452_v61  ;;  %v3179_v18 = vadd.f32 0.7853982, %v3177_v60  ;;  %v4483_v23 = vadd.f32 -0.3333295, %v2916_v62  ;;  %v972_v3 = vsel %vm952_vm6, %v960_v40, %v968_v38 }
 0xc10   : > { %1167 = vperm.xlu1 %4731, %v845_v26   ;;  %3074 = vrot.lane.b32.xlu0 %v3069_v20, %s5029_s28 }
 0xc11   : > { %v3181_v17 = vsel %vm3147_vm5, %v3179_v18, %v3177_v60  ;;  %v2920_v36 = vmul.f32 %v4483_v23, %v2906_v52  ;;  %v1589_v60 = vpop.permute.xlu1 %1588  ;;  %v7458_v18 = vld [vmem:[#allocation8_spill] sm:$0xff] }
 0xc12   : > { %v3191_v9 = vsub.f32 1.5707964, %v3181_v17 }
 0xc13   : > { %v2922_v48 = vmul.f32 %v2920_v36, %v2904_v19 }
 0xc14   : > { %4732 = vset.pattern.permute.xlu1 %v7453_v27  ;;  %3196 = vrot.lane.b32.xlu0 %v3191_v9, %s5028_s27 }
 0xc15   : > { %2549 = vperm.xlu1 %4732, %v7454_v25   ;;  %v2924_v4 = vadd.f32 %v2922_v48, %v2904_v19  ;;  %v3178_v19 = vadd.f32 0.7853982, %v3176_v55  ;;  %v1088_v56 = vpop.permute.xlu1 %1087 }
 0xc17   : > { %v2926_v21 = vadd.f32 0.7853982, %v2924_v4  ;;  %v3180_v2 = vsel %vm3146_vm1, %v3178_v19, %v3176_v55  ;;  %v7460_v55 = vld [vmem:[#allocation20_spill] sm:$0xff]  ;;  %vm2938_vm1 = vcmp.gt.f32.partialorder %v6155_v6, %v6224_v0 }
 0xc18   : > { %v3190_v22 = vsub.f32 1.5707964, %v3180_v2  ;;  %vm1700_vm8 = vcmp.lt.f32.partialorder %v7460_v55, 0.0 }
 0xc19   : > { %4733 = vset.pattern.permute.xlu1 %v7452_v61  ;;  %v2928_v15 = vsel %vm2894_vm9, %v2926_v21, %v2924_v4  ;;  %v6420_v62 = vpop.permute.xlu1 %1590  ;;  %v7459_v4 = vld [vmem:[#allocation9_spill] sm:$0xff]  ;;  %vm2983_vm9 = vcmp.lt.f32.partialorder %v6114_v43, 0.0 }
 0xc1a   : > { %1172 = vperm.xlu1 %4733, %v846_v45   ;;  %v2940_v52 = vsub.f32 1.5707964, %v2928_v15 }
 0xc1c   : > { %2944 = vrot.lane.b32.xlu0 %v2940_v52, %s5028_s27 }
 0xc1d   : > { %v1715_v26 = vpop.permute.xlu1 %1714 }
 0xc1e   : > { %4734 = vset.pattern.permute.xlu1 %v7453_v27 }
 0xc1f   : > { %2554 = vperm.xlu1 %4734, %v7455_v31  }
 0xc20   : > { %3072 = vrot.lane.b32.xlu0 %v3068_v59, %s5029_s28 }
 0xc21   : > { %v6425_v20 = vpop.permute.xlu1 %1716 }
 0xc23   : > { %4736 = vset.pattern.permute.xlu1 %v7451_v12 }
 0xc24   : > { %1883 = vperm.xlu1 %4736, %v7456_v30   ;;  %3194 = vrot.lane.b32.xlu0 %v3190_v22, %s5028_s27 }
 0xc25   : > { %v6429_v23 = vpop.permute.xlu1 %1834 }
 0xc28   : > { %4737 = vset.pattern.permute.xlu1 %v7453_v27  ;;  %1190 = vperm.xlu0 %4735, %v972_v3  }
 0xc29   : > { %2563 = vperm.xlu1 %4737, %v5264_v39  }
 0xc2c   : > { %2588 = vperm.xlu0 %4735, %v5264_v39  }
 0xc2d   : > { %2954 = vrot.lane.b32.xlu1 %v6365_v32, %s5028_s27  ;;  %v1078_v32 = vpop.permute.xlu0 %1077  ;;  %v6433_v53 = vpop.permute.xlu1 %2293 }
 0xc2e   : > { %4738 = vset.pattern.permute.xlu1 %v7451_v12 }
 0xc31   : > { %3082 = vrot.lane.b32.xlu1 %v3059_v1, %s5029_s28  ;;  %v1091_v1 = vsel %vm951_vm7, %v1078_v32, %v1086_v5  ;;  %v1581_v41 = vpop.permute.xlu0 %1580  ;;  %v6438_v36 = vpop.permute.xlu1 %1836 }
 0xc35   : > { %3204 = vrot.lane.b32.xlu1 %v3181_v17, %s5028_s27  ;;  %v1594_v17 = vsel %vm1574_vm10, %v1581_v41, %v1589_v60  ;;  %v1080_v9 = vpop.permute.xlu0 %1079  ;;  %vm2939_vm10 = vcmp.gt.f32.partialorder %v6122_v54, %v6216_v57 }
 0xc36   : > { %v1092_v33 = vsel %vm952_vm6, %v1080_v9, %v1088_v56 }
 0xc39   : > { %2952 = vrot.lane.b32.xlu1 %v2928_v15, %s5028_s27  ;;  %v6447_v63 = vpop.permute.xlu0 %1582 }
 0xc3d   : > { %3080 = vrot.lane.b32.xlu1 %v3058_v46, %s5029_s28  ;;  %v1707_v21 = vpop.permute.xlu0 %1706 }
 0xc3e   : > { %v1720_v45 = vsel %vm1700_vm8, %v1707_v21, %v1715_v26 }
 0xc41   : > { %3202 = vrot.lane.b32.xlu1 %v3180_v2, %s5028_s27 }
 0xc45   : > { %1887 = vperm.xlu1 %4738, %v7458_v18  }
 0xc49   : > { %1203 = vperm.xlu1 %4738, %v1091_v1  }
 0xc4d   : > { %4739 = vset.pattern.permute.xlu1 %v7452_v61 }
 0xc4e   : > { %1896 = vperm.xlu1 %4739, %v1594_v17  }
 0xc52   : > { %4740 = vset.pattern.permute.xlu1 %v7453_v27 }
 0xc53   : > { %3252 = vperm.xlu1 %4740, %v5987_v13   ;;  %v6442_v48 = vpop.permute.xlu1 %2295  ;;  %v1709_v13 = vpop.permute.xlu0 %1708 }
 0xc57   : > { %4741 = vset.pattern.permute.xlu1 %v7451_v12  ;;  %v6449_v25 = vpop.permute.xlu1 %2419  ;;  %v6463_v52 = vpop.permute.xlu0 %1826 }
 0xc58   : > { %1208 = vperm.xlu1 %4741, %v1092_v33  }
 0xc5b   : > { %v6453_v34 = vpop.permute.xlu1 %2421 }
 0xc5c   : > { %4742 = vset.pattern.permute.xlu1 %v7452_v61 }
 0xc5d   : > { %2580 = vperm.xlu1 %4742, %v7459_v4  }
 0xc5f   : > { %v6460_v15 = vpop.permute.xlu1 %2539 }
 0xc61   : > { %4743 = vset.pattern.permute.xlu1 %v7453_v27 }
 0xc62   : > { %1221 = vperm.xlu1 %4743, %v7437_v8   ;;  %v6469_v8 = vpop.permute.xlu0 %2285 }
 0xc63   : > { %v6466_v46 = vpop.permute.xlu1 %2541 }
 0xc66   : > { %4744 = vset.pattern.permute.xlu1 %v7451_v12  ;;  %v1829_v38 = vpop.permute.xlu0 %1828 }
 0xc67   : > { %1910 = vperm.xlu1 %4744, %v1720_v45  }
 0xc6a   : > { %v6475_v31 = vpop.permute.xlu0 %2287 }
 0xc6b   : > { %4745 = vset.pattern.permute.xlu1 %v7453_v27 }
 0xc6c   : > { %3266 = vperm.xlu1 %4745, %v7430_v29  }
 0xc6e   : > { %v2412_v22 = vpop.permute.xlu0 %2411 }
 0xc70   : > { %v6471_v19 = vpop.permute.xlu1 %1100 }
 0xc72   : > { %v6483_v3 = vpop.permute.xlu0 %2413 }
 0xc74   : > { %v6473_v59 = vpop.permute.xlu1 %1117 }
 0xc75   : > { %7461 = vst [vmem:[#allocation38_spill] sm:$0xff] %v6473_v59 }
 0xc76   : > { %v6487_v56 = vpop.permute.xlu0 %2531 }
 0xc79   : > { %v6477_v2 = vpop.permute.xlu1 %1134 }
 0xc7a   : > { %7462 = vst [vmem:[#allocation37_spill] sm:$0xff] %v6477_v2  ;;  %v6491_v32 = vpop.permute.xlu0 %2533 }
 0xc7d   : > { %v6479_v5 = vpop.permute.xlu1 %1138 }
 0xc7e   : > { %v6495_v41 = vpop.permute.xlu0 %1185 }
 0xc7f   : > { %7467 = vst [vmem:[#allocation28_spill] sm:$0xff] %v6495_v41 }
 0xc82   : > { %v6481_v40 = vpop.permute.xlu1 %1150  ;;  %v3183_v9 = vpop.permute.xlu0 %3182 }
 0xc83   : > { %7463 = vst [vmem:[#allocation34_spill] sm:$0xff] %v6481_v40  ;;  %vm3188_vm4 = vcmp.gt.f32.partialorder %v6111_v44, %v3183_v9 }
 0xc86   : > { %v6485_v60 = vpop.permute.xlu1 %1154  ;;  %v2947_v45 = vpop.permute.xlu0 %2946 }
 0xc87   : > { %7464 = vst [vmem:[#allocation25_spill] sm:$0xff] %v6485_v60 }
 0xc8a   : > { %v3075_v2 = vpop.permute.xlu0 %3074 }
 0xc8b   : > { %v6489_v26 = vpop.permute.xlu1 %1167 }
 0xc8c   : > { %7465 = vst [vmem:[#allocation24_spill] sm:$0xff] %v6489_v26 }
 0xc8e   : > { %v3197_v41 = vpop.permute.xlu0 %3196 }
 0xc90   : > { %v6493_v1 = vpop.permute.xlu1 %2549 }
 0xc91   : > { %7466 = vst [vmem:[#allocation14_spill] sm:$0xff] %v6493_v1 }
 0xc92   : > { %v2945_v54 = vpop.permute.xlu0 %2944 }
 0xc95   : > { %v6497_v17 = vpop.permute.xlu1 %1172 }
 0xc96   : > { %7468 = vst [vmem:[#allocation15_spill] sm:$0xff] %v6497_v17 }
 0xc9a   : > { %v6499_v33 = vpop.permute.xlu1 %2554 }
 0xc9f   : > { %v6501_v21 = vpop.permute.xlu1 %1883 }
 0xca0   : > { %7469 = vst [vmem:[#allocation18_spill] sm:$0xff] %v6501_v21 }
 0xca4   : > { %v6503_v40 = vpop.permute.xlu1 %2563 }
 0xca8   : > { %v2955_v26 = vpop.permute.xlu1 %2954 }
 0xca9   : > { %v2959_v59 = vsel %vm2939_vm10, %v2947_v45, %v2955_v26  ;;  %vm3386_vm10 = vcmask 64512  }
 0xcaa   : > { %v2963_v60 = vsub.f32 3.1415927, %v2959_v59  ;;  %2976 = vrot.lane.b32.xlu1 %v2959_v59, %s5026_s22  ;;  %v7470_v59 = vld [vmem:[#allocation21_spill] sm:$0xff] }
 0xcab   : > { %vm1701_vm15 = vcmp.lt.f32.partialorder %v7470_v59, 0.0 }
 0xcac   : > { %2968 = vrot.lane.b32.xlu0 %v2963_v60, %s5026_s22  ;;  %v3083_v1 = vpop.permute.xlu1 %3082  ;;  %v1721_v35 = vsel %vm1701_vm15, %v1709_v13, %v6425_v20  ;;  %v1841_v58 = vsel %vm1701_vm15, %v1829_v38, %v6438_v36  ;;  %v7471_v13 = vld [vmem:[#allocation35_spill] sm:$0xff] }
 0xcad   : > { %v3087_v21 = vsel %vm3067_vm11, %v3075_v2, %v3083_v1  ;;  %v3073_v1 = vpop.permute.xlu0 %3072  ;;  %vm2405_vm5 = vcmp.lt.f32.partialorder %v7471_v13, 0.0  ;;  %vm3930_vm11 = vcmask 261120  }
 0xcae   : > { %v3089_v17 = vsub.f32 3.1415927, %v3087_v21  ;;  %3102 = vrot.lane.b32.xlu1 %v3087_v21, %s5027_s24  ;;  %v2425_v51 = vsel %vm2405_vm5, %v2412_v22, %v6449_v25 }
 0xcb0   : > { %3094 = vrot.lane.b32.xlu0 %v3089_v17, %s5027_s24  ;;  %v3205_v57 = vpop.permute.xlu1 %3204 }
 0xcb1   : > { %v3209_v26 = vsel %vm3189_vm13, %v3197_v41, %v3205_v57  ;;  %v3195_v20 = vpop.permute.xlu0 %3194 }
 0xcb2   : > { %3224 = vrot.lane.b32.xlu1 %v3209_v26, %s5026_s22  ;;  %v3211_v36 = vsub.f32 3.1415927, %v3209_v26 }
 0xcb4   : > { %1915 = vperm.xlu0 %4735, %v1721_v35   ;;  %v2953_v2 = vpop.permute.xlu1 %2952 }
 0xcb5   : > { %v2958_v60 = vsel %vm2938_vm1, %v2945_v54, %v2953_v2  ;;  %v6573_v9 = vpop.permute.xlu0 %1190 }
 0xcb6   : > { %2974 = vrot.lane.b32.xlu1 %v2958_v60, %s5026_s22  ;;  %v2962_v44 = vsub.f32 3.1415927, %v2958_v60 }
 0xcb8   : > { %1929 = vperm.xlu0 %4735, %v1841_v58   ;;  %v3081_v7 = vpop.permute.xlu1 %3080  ;;  %v7474_v58 = vld [vmem:[#allocation32_spill] sm:$0xff] }
 0xcb9   : > { %v3086_v41 = vsel %vm3066_vm3, %v3073_v1, %v3081_v7  ;;  %v6577_v21 = vpop.permute.xlu0 %2588  ;;  %vm2406_vm7 = vcmp.lt.f32.partialorder %v7474_v58, 0.0 }
 0xcba   : > { %3100 = vrot.lane.b32.xlu1 %v3086_v41, %s5027_s24  ;;  %v2426_v7 = vsel %vm2406_vm7, %v6483_v3, %v6453_v34  ;;  %v7478_v3 = vld [vmem:[#allocation13_spill] sm:$0xff] }
 0xcbc   : > { %1257 = vperm.xlu0 %4735, %v7449_v24   ;;  %v3203_v6 = vpop.permute.xlu1 %3202  ;;  %v3088_v24 = vsub.f32 3.1415927, %v3086_v41 }
 0xcbd   : > { %v3208_v0 = vsel %vm3188_vm4, %v3195_v20, %v3203_v6  ;;  %v7475_v6 = vld [vmem:[#allocation10_spill] sm:$0xff] }
 0xcbe   : > { %3222 = vrot.lane.b32.xlu1 %v3208_v0, %s5026_s22  ;;  %v3210_v25 = vsub.f32 3.1415927, %v3208_v0 }
 0xcc0   : > { %2615 = vperm.xlu0 %4735, %v2425_v51  }
 0xcc2   : > { %1226 = vperm.xlu1 %4745, %v7438_v37   ;;  %v1840_v37 = vsel %vm1700_vm8, %v6463_v52, %v6429_v23  ;;  %v6556_v23 = vpop.permute.xlu1 %1887 }
 0xcc4   : > { %3216 = vrot.lane.b32.xlu0 %v3211_v36, %s5026_s22  ;;  %v7477_v36 = vld [vmem:[#allocation12_spill] sm:$0xff] }
 0xcc6   : > { %4746 = vset.pattern.permute.xlu1 %v7451_v12  ;;  %v6559_v52 = vpop.permute.xlu1 %1203 }
 0xcc7   : > { %2592 = vperm.xlu1 %4746, %v7459_v4  }
 0xcc8   : > { %2966 = vrot.lane.b32.xlu0 %v2962_v44, %s5026_s22 }
 0xcca   : > { %v6561_v38 = vpop.permute.xlu1 %1896 }
 0xccb   : > { %4747 = vset.pattern.permute.xlu1 %v7452_v61 }
 0xccc   : > { %3092 = vrot.lane.b32.xlu0 %v3088_v24, %s5027_s24  ;;  %1239 = vperm.xlu1 %4747, %v7439_v50   ;;  %v2300_v50 = vsel %vm2280_vm0, %v6475_v31, %v6442_v48  ;;  %vm2961_vm0 = vcmp.lt.f32.partialorder %v6087_v42, 0.0 }
 0xcd0   : > { %4748 = vset.pattern.permute.xlu1 %v7451_v12  ;;  %3214 = vrot.lane.b32.xlu0 %v3210_v25, %s5026_s22  ;;  %v7479_v25 = vld [vmem:[#allocation30_spill] sm:$0xff]  ;;  %s4524_s22 = sshll.u32 %s5015_s16, 8  ;;  %s4947_s16 = scalar_lea.vmem %s7235_s20, 256 }
 0xcd1   : > { %1924 = vperm.xlu1 %4748, %v1840_v37   ;;  %vm2960_vm6 = vcmp.lt.f32.partialorder %v7479_v25, 0.0  ;;  %p4948_p12 = scmp.ne.s32.totalorder %s7235_s20, %s4947_s16  ;;  %p4955_p2 = scmp.lt.s32.totalorder %s4953_s0, %s4947_s16 }
 0xcd3   : > { %p4949_p13 = pnand %p4948_p12, %p5131_p4  ;;  %p4956_p3 = por %p4955_p2, %p4954_p1 }
 0xcd5   : > { %4749 = vset.pattern.permute.xlu1 %v7452_v61  ;;  %p4950_p0 = pneg %p4949_p13 }
 0xcd6   : > { %3279 = vperm.xlu1 %4749, %v7430_v29  }
 0xcd7   : > { %p4957_p5 = pnand %p4956_p3, %p4950_p0 }
 0xcda   : > { %1244 = vperm.xlu1 %4749, %v7441_v14   ;;  %v6563_v14 = vpop.permute.xlu1 %3252 }
 0xcdb   : > { %7472 = vst [vmem:[#allocation31_spill] sm:$0xff] %v6563_v14 }
 0xcde   : > { %2606 = vperm.xlu1 %4749, %v2300_v50   ;;  %v6565_v22 = vpop.permute.xlu1 %1208 }
 0xce2   : > { %3283 = vperm.xlu1 %4749, %v7429_v49   ;;  %v6567_v48 = vpop.permute.xlu1 %2580 }
 0xce6   : > { %4750 = vset.pattern.permute.xlu1 %v7453_v27  ;;  %v6569_v31 = vpop.permute.xlu1 %1221 }
 0xce7   : > { %1938 = vperm.xlu1 %4750, %v7440_v47  }
 0xcea   : > { %v6571_v17 = vpop.permute.xlu1 %1910 }
 0xceb   : > { %4751 = vset.pattern.permute.xlu1 %v7451_v12 }
 0xcee   : > { %v6575_v47 = vpop.permute.xlu1 %3266 }
 0xcef   : > { %7473 = vst [vmem:[#allocation11_spill] sm:$0xff] %v6575_v47 }
 0xd1c   : > { %v2977_v45 = vpop.permute.xlu1 %2976 }
 0xd1e   : > { %v2969_v54 = vpop.permute.xlu0 %2968 }
 0xd1f   : > { %v2981_v57 = vsel %vm2961_vm0, %v2969_v54, %v2977_v45 }
 0xd20   : > { %v2985_v26 = vsub.f32 0.0, %v2981_v57  ;;  %2998 = vrot.lane.b32.xlu1 %v2981_v57, %s5028_s27  ;;  %v3103_v35 = vpop.permute.xlu1 %3102 }
 0xd22   : > { %v3095_v2 = vpop.permute.xlu0 %3094  ;;  %2990 = vrot.lane.b32.xlu0 %v2985_v26, %s5028_s27  ;;  %v7480_v26 = vld [vmem:[#allocation36_spill] sm:$0xff] }
 0xd23   : > { %v3107_v60 = vsel %vm2961_vm0, %v3095_v2, %v3103_v35  ;;  %vm2982_vm8 = vcmp.lt.f32.partialorder %v7480_v26, 0.0 }
 0xd24   : > { %v3111_v1 = vsub.f32 0.0, %v3107_v60  ;;  %3124 = vrot.lane.b32.xlu1 %v3107_v60, %s5029_s28  ;;  %v7481_v60 = vld [vmem:[#allocation41_spill] sm:$0xff] }
 0xd26   : > { %3116 = vrot.lane.b32.xlu0 %v3111_v1, %s5029_s28 }
 0xd2a   : > { %1262 = vperm.xlu0 %4735, %v7457_v28   ;;  %v3225_v28 = vpop.permute.xlu1 %3224 }
 0xd2e   : > { %2620 = vperm.xlu0 %4735, %v2426_v7   ;;  %v2975_v44 = vpop.permute.xlu1 %2974  ;;  %v7482_v7 = vld [vmem:[#allocation29_spill] sm:$0xff] }
 0xd2f   : > { %v6590_v41 = vpop.permute.xlu0 %1915 }
 0xd32   : > { %4753 = vset.pattern.permute.xlu0 %v7453_v27  ;;  %v3101_v50 = vpop.permute.xlu1 %3100 }
 0xd33   : > { %v6593_v20 = vpop.permute.xlu0 %1929  ;;  %1095 = vperm.xlu0 %4753, %v7475_v6  }
 0xd36   : > { %v3223_v57 = vpop.permute.xlu1 %3222 }
 0xd37   : > { %v6596_v0 = vpop.permute.xlu0 %1257  ;;  %1122 = vperm.xlu0 %4753, %v7450_v11  }
 0xd38   : > { %7476 = vst [vmem:[#allocation6_spill] sm:$0xff] %v6596_v0 }
 0xd3b   : > { %v6599_v51 = vpop.permute.xlu0 %2615  ;;  %1844 = vperm.xlu0 %4753, %v7477_v36  }
 0xd3f   : > { %v3217_v34 = vpop.permute.xlu0 %3216  ;;  %1849 = vperm.xlu0 %4753, %v7478_v3  }
 0xd40   : > { %v3229_v24 = vsel %vm2983_vm9, %v3217_v34, %v3225_v28  ;;  %v6630_v28 = vpop.permute.xlu1 %1226  ;;  %v7483_v34 = vld [vmem:[#allocation39_spill] sm:$0xff] }
 0xd41   : > { %3244 = vrot.lane.b32.xlu1 %v3229_v24, %s5028_s27  ;;  %v3231_v1 = vsub.f32 0.0, %v3229_v24 }
 0xd43   : > { %v2967_v37 = vpop.permute.xlu0 %2966  ;;  %1858 = vperm.xlu0 %4753, %v7456_v30  }
 0xd44   : > { %v2980_v11 = vsel %vm2960_vm6, %v2967_v37, %v2975_v44  ;;  %v2546_v44 = vsel %vm2406_vm7, %v6491_v32, %v6466_v46  ;;  %v7486_v32 = vld [vmem:[#allocation19_spill] sm:$0xff] }
 0xd45   : > { %2996 = vrot.lane.b32.xlu1 %v2980_v11, %s5028_s27  ;;  %v2984_v6 = vsub.f32 0.0, %v2980_v11 }
 0xd47   : > { %v3093_v45 = vpop.permute.xlu0 %3092  ;;  %1863 = vperm.xlu0 %4753, %v7458_v18  }
 0xd48   : > { %v3106_v54 = vsel %vm2960_vm6, %v3093_v45, %v3101_v50 }
 0xd49   : > { %3122 = vrot.lane.b32.xlu1 %v3106_v54, %s5029_s28 }
 0xd4b   : > { %v3215_v35 = vpop.permute.xlu0 %3214  ;;  %2568 = vperm.xlu0 %4753, %v7459_v4   ;;  %v3110_v4 = vsub.f32 0.0, %v3106_v54 }
 0xd4c   : > { %v3228_v2 = vsel %vm2982_vm8, %v3215_v35, %v3223_v57 }
 0xd4d   : > { %3242 = vrot.lane.b32.xlu1 %v3228_v2, %s5028_s27  ;;  %v3230_v36 = vsub.f32 0.0, %v3228_v2  ;;  %v7489_v2 = vlaneseq }
 0xd4f   : > { %3257 = vperm.xlu0 %4753, %v7481_v60   ;;  %v6702_v60 = vshrl.u32 %v7489_v2, 7 }
 0xd51   : > { %3291 = vperm.xlu1 %4751, %v7430_v29   ;;  %v2545_v29 = vsel %vm2405_vm5, %v6487_v56, %v6460_v15  ;;  %v7484_v56 = vld [vmem:[#allocation40_spill] sm:$0xff]  ;;  %v1159_v2 = vsub.s32 3, %v6702_v60 }
 0xd53   : > { %3271 = vperm.xlu0 %4753, %v7429_v49  }
 0xd55   : > { %4752 = vset.pattern.permute.xlu1 %v7453_v27 }
 0xd56   : > { %1943 = vperm.xlu1 %4752, %v7482_v7  }
 0xd57   : > { %3236 = vrot.lane.b32.xlu0 %v3231_v1, %s5028_s27 }
 0xd5a   : > { %4754 = vset.pattern.permute.xlu1 %v7451_v12 }
 0xd5b   : > { %2988 = vrot.lane.b32.xlu0 %v2984_v6, %s5028_s27  ;;  %3295 = vperm.xlu1 %4754, %v7429_v49   ;;  %v6638_v49 = vpop.permute.xlu1 %2592  ;;  %v6707_v6 = vsub.s32 0, %v6702_v60 }
 0xd5f   : > { %3114 = vrot.lane.b32.xlu0 %v3110_v4, %s5029_s28  ;;  %2629 = vperm.xlu1 %4754, %v2545_v29   ;;  %v6642_v15 = vpop.permute.xlu1 %1239  ;;  %v6712_v4 = vld [vmem:[%s7291_s2] sm:$0xff]  ;;  %v6715_v29 = vsub.s32 1, %v6702_v60  ;;  %s7241_s28 = scalar_lea.hbm %s7299_s10, %s4524_s22 }
 0xd63   : > { %2634 = vperm.xlu1 %4754, %v2546_v44   ;;  %3234 = vrot.lane.b32.xlu0 %v3230_v36, %s5028_s27  ;;  %v6648_v46 = vpop.permute.xlu1 %1924  ;;  %v6719_v44 = vrot.slane %v6712_v4, %v6707_v6 }
 0xd67   : > { %1966 = vperm.xlu1 %4754, %v7460_v55   ;;  %2643 = vperm.xlu0 %4753, %v7483_v34   ;;  %v6655_v55 = vpop.permute.xlu1 %3279  ;;  %v6724_v34 = vld [vmem:[%s7296_s7] sm:$0x7] }
 0xd68   : > { %7485 = vst [vmem:[#allocation16_spill] sm:$0xff] %v6655_v55  ;;  %7490 = vst [vmem:[#allocation5_spill] sm:$0xff] %v6724_v34 }
 0xd6b   : > { %1971 = vperm.xlu1 %4754, %v7470_v59   ;;  %2648 = vperm.xlu0 %4753, %v7484_v56   ;;  %v2299_v59 = vsel %vm2279_vm14, %v6469_v8, %v6433_v53 }
 0xd6f   : > { %4756 = vset.pattern.permute.xlu1 %v7452_v61  ;;  %4755 = vset.pattern.permute.xlu0 %v7452_v61 }
 0xd70   : > { %2662 = vperm.xlu1 %4756, %v7446_v10   ;;  %1871 = vperm.xlu0 %4755, %v7456_v30   ;;  %v1595_v10 = vsel %vm1575_vm12, %v6447_v63, %v6420_v62  ;;  %v6664_v30 = vpop.permute.xlu1 %1244 }
 0xd74   : > { %4757 = vset.pattern.permute.xlu1 %v7451_v12  ;;  %1875 = vperm.xlu0 %4755, %v7458_v18   ;;  %v7487_v18 = vld [vmem:[#allocation33_spill] sm:$0xff] }
 0xd75   : > { %2671 = vperm.xlu1 %4757, %v7471_v13   ;;  %v7488_v13 = vld [vmem:[#allocation23_spill] sm:$0xff] }
 0xd76   : > { %vm3109_vm12 = vcmp.lt.f32.partialorder %v7488_v13, 0.0 }
 0xd78   : > { %2576 = vperm.xlu0 %4755, %v5264_v39   ;;  %v6671_v39 = vpop.permute.xlu1 %2606 }
 0xd79   : > { %4758 = vset.pattern.permute.xlu1 %v7453_v27 }
 0xd7a   : > { %3346 = vperm.xlu1 %4758, %v7479_v25  }
 0xd7c   : > { %1901 = vperm.xlu0 %4755, %v1595_v10   ;;  %v6675_v27 = vpop.permute.xlu1 %3283  ;;  %v2558_v10 = vmul.f32 %v6499_v33, %v6719_v44 }
 0xd7e   : > { %3351 = vperm.xlu1 %4758, %v6087_v42  }
 0xd80   : > { %2601 = vperm.xlu0 %4755, %v2299_v59   ;;  %v6679_v62 = vpop.permute.xlu1 %1938 }
 0xd82   : > { %4759 = vset.pattern.permute.xlu1 %v7451_v12 }
 0xd84   : > { %1952 = vperm.xlu0 %4755, %v7443_v16  }
 0xd88   : > { %1957 = vperm.xlu0 %4755, %v7486_v32   ;;  %v6728_v32 = vrot.slane %v6712_v4, %v6715_v29 }
 0xd8c   : > { %2657 = vperm.xlu0 %4755, %v7487_v18   ;;  %v6733_v18 = vsub.s32 2, %v6702_v60 }
 0xd8e   : > { %7491 = vst [vmem:[#allocation27_spill] sm:$0xff] %v6733_v18 }
 0xd90   : > { %3360 = vperm.xlu0 %4755, %v7480_v26  }
 0xd92   : > { %v2999_v42 = vpop.permute.xlu1 %2998 }
 0xd94   : > { %v2991_v63 = vpop.permute.xlu0 %2990 }
 0xd95   : > { %v3003_v53 = vsel %vm2983_vm9, %v2991_v63, %v2999_v42  ;;  %v6737_v42 = vrot.slane %v6724_v34, %v6707_v6 }
 0xd96   : > { %3309 = vperm.xlu0 %4755, %v3003_v53   ;;  %v3125_v8 = vpop.permute.xlu1 %3124 }
 0xd98   : > { %v3117_v16 = vpop.permute.xlu0 %3116 }
 0xd99   : > { %v3129_v3 = vsel %vm3109_vm12, %v3117_v16, %v3125_v8  ;;  %v2560_v16 = vadd.f32 %v2558_v10, %v6737_v42 }
 0xd9a   : > { %3323 = vperm.xlu1 %4759, %v3129_v3   ;;  %4760 = vset.pattern.permute.xlu0 %v7451_v12  ;;  %v6746_v3 = vrot.slane %v6712_v4, %v6733_v18  ;;  %v1177_v18 = vsub.s32 4, %v6702_v60 }
 0xd9e   : > { %4761 = vset.pattern.permute.xlu1 %v7452_v61 }
 0xda5   : > { %v6689_v24 = vpop.permute.xlu0 %1262 }
 0xda9   : > { %v6691_v25 = vpop.permute.xlu0 %2620 }
 0xdae   : > { %v6693_v37 = vpop.permute.xlu0 %1095 }
 0xdb2   : > { %v1123_v11 = vpop.permute.xlu0 %1122 }
 0xdb3   : > { %v3245_v50 = vpop.permute.xlu1 %3244  ;;  %v1130_v14 = vmul.f32 %v6728_v32, %v1123_v11  ;;  %v1195_v11 = vsub.s32 5, %v6702_v60 }
 0xdb6   : > { %v6695_v45 = vpop.permute.xlu0 %1844 }
 0xdb7   : > { %v2997_v57 = vpop.permute.xlu1 %2996 }
 0xdba   : > { %v6697_v54 = vpop.permute.xlu0 %1849 }
 0xdbb   : > { %v3123_v1 = vpop.permute.xlu1 %3122 }
 0xdbe   : > { %v6699_v35 = vpop.permute.xlu0 %1858 }
 0xdbf   : > { %v3243_v56 = vpop.permute.xlu1 %3242 }
 0xdc2   : > { %v6704_v7 = vpop.permute.xlu0 %1863 }
 0xdc6   : > { %v2569_v36 = vpop.permute.xlu0 %2568 }
 0xdc7   : > { %v2572_v63 = vmul.f32 %v2569_v36, %v6728_v32  ;;  %v1108_v36 = vmul.f32 %v6719_v44, %v6471_v19 }
 0xdc9   : > { %v2574_v55 = vadd.f32 %v2572_v63, %v2560_v16  ;;  %v6762_v63 = vrot.slane %v6712_v4, %v1159_v2  ;;  %v1114_v16 = vadd.f32 %v6737_v42, %v1108_v36 }
 0xdca   : > { %v3258_v59 = vpop.permute.xlu0 %3257 }
 0xdcb   : > { %v3261_v53 = vmul.f32 %v3258_v59, %v6719_v44  ;;  %v2584_v59 = vmul.f32 %v6567_v48, %v6746_v3  ;;  %v2596_v48 = vmul.f32 %v6638_v49, %v6762_v63 }
 0xdcc   : > { %v6741_v8 = vpop.permute.xlu1 %3291 }
 0xdcd   : > { %7492 = vst [vmem:[#allocation26_spill] sm:$0xff] %v6741_v8  ;;  %v3263_v47 = vadd.f32 %v3261_v53, %v6737_v42  ;;  %v2586_v53 = vadd.f32 %v2584_v59, %v2574_v55  ;;  %v1132_v55 = vadd.f32 %v1130_v14, %v1114_v16 }
 0xdce   : > { %v3272_v33 = vpop.permute.xlu0 %3271 }
 0xdcf   : > { %v3275_v34 = vmul.f32 %v3272_v33, %v6728_v32 }
 0xdd1   : > { %v3277_v8 = vadd.f32 %v3275_v34, %v3263_v47  ;;  %v6755_v10 = vpop.permute.xlu1 %1943  ;;  %v3287_v47 = vmul.f32 %v6675_v27, %v6746_v3  ;;  %v6775_v34 = vrot.slane %v6712_v4, %v1177_v18  ;;  %v1146_v27 = vmul.f32 %v6746_v3, %v6479_v5 }
 0xdd2   : > { %v3237_v0 = vpop.permute.xlu0 %3236  ;;  %v6794_v5 = vrot.slane %v6712_v4, %v1195_v11 }
 0xdd3   : > { %v3249_v19 = vsel %vm3109_vm12, %v3237_v0, %v3245_v50  ;;  %v2598_v0 = vadd.f32 %v2596_v48, %v2586_v53  ;;  %v3289_v36 = vadd.f32 %v3287_v47, %v3277_v8  ;;  %v2610_v14 = vmul.f32 %v6671_v39, %v6775_v34  ;;  %v7493_v48 = vld [vmem:[#allocation22_spill] sm:$0xff]  ;;  %v7494_v47 = vld [vmem:[#allocation25_spill] sm:$0xff] }
 0xdd4   : > { %3337 = vperm.xlu0 %4760, %v3249_v19   ;;  %v7384_v19 = vsub.s32 6, %v6702_v60  ;;  %v1148_v53 = vadd.f32 %v1146_v27, %v1132_v55  ;;  %vm3108_vm14 = vcmp.lt.f32.partialorder %v7493_v48, 0.0  ;;  %v2624_v55 = vmul.f32 %v6691_v25, %v6794_v5  ;;  %v7495_v27 = vld [vmem:[#allocation15_spill] sm:$0xff] }
 0xdd5   : > { %v2612_v8 = vadd.f32 %v2610_v14, %v2598_v0  ;;  %v1231_v14 = vsub.s32 7, %v6702_v60 }
 0xdd6   : > { %v2989_v33 = vpop.permute.xlu0 %2988  ;;  %v3296_v59 = vpop.permute.xlu1 %3295  ;;  %v6803_v39 = vrot.slane %v6712_v4, %v7384_v19 }
 0xdd7   : > { %v3002_v50 = vsel %vm2982_vm8, %v2989_v33, %v2997_v57  ;;  %v3299_v49 = vmul.f32 %v3296_v59, %v6762_v63  ;;  %v1162_v33 = vmul.f32 %v6762_v63, %v7494_v47 }
 0xdd8   : > { %2676 = vperm.xlu0 %4760, %v7474_v58   ;;  %3304 = vperm.xlu1 %4761, %v3002_v50  }
 0xdd9   : > { %v6786_v16 = vadd.f32 %v3299_v49, %v3289_v36  ;;  %v1164_v59 = vadd.f32 %v1162_v33, %v1148_v53  ;;  %v2626_v36 = vadd.f32 %v2624_v55, %v2612_v8 }
 0xdda   : > { %v3115_v26 = vpop.permute.xlu0 %3114  ;;  %v6789_v57 = vpop.permute.xlu1 %2629 }
 0xddb   : > { %v3128_v58 = vsel %vm3108_vm14, %v3115_v26, %v3123_v1  ;;  %v1107_v26 = vmul.f32 %v6719_v44, %v6693_v37  ;;  %v1852_v37 = vmul.f32 %v6695_v45, %v6719_v44  ;;  %v414_v45 = vld [vmem:[%s7291_s2 + $0x8] sm:$0x3] }
 0xddc   : > { %3379 = vperm.xlu0 %4760, %v7488_v13   ;;  %4762 = vset.pattern.permute.xlu1 %v7451_v12  ;;  %v1180_v13 = vmul.f32 %v6775_v34, %v7495_v27  ;;  %v7497_v27 = vld [vmem:[#allocation37_spill] sm:$0xff] }
 0xddd   : > { %3318 = vperm.xlu1 %4762, %v3128_v58   ;;  %v6820_v58 = vrot.slane %v6712_v4, %v1231_v14  ;;  %v1113_v8 = vadd.f32 %v6737_v42, %v1107_v26  ;;  %v1216_v4 = vmul.f32 %v6803_v39, %v6565_v22  ;;  %v1145_v22 = vmul.f32 %v6746_v3, %v7497_v27 }
 0xdde   : > { %v3235_v50 = vpop.permute.xlu0 %3234  ;;  %v2635_v1 = vpop.permute.xlu1 %2634  ;;  %v1182_v19 = vadd.f32 %v1180_v13, %v1164_v59 }
 0xddf   : > { %v3248_v0 = vsel %vm3108_vm14, %v3235_v50, %v3243_v56  ;;  %v2638_v49 = vmul.f32 %v2635_v1, %v6803_v39  ;;  %v1198_v56 = vmul.f32 %v6794_v5, %v6573_v9  ;;  %v7496_v50 = vld [vmem:[#allocation38_spill] sm:$0xff]  ;;  %v1234_v14 = vmul.f32 %v6820_v58, %v6630_v28 }
 0xde0   : > { %v1129_v1 = vmul.f32 %v6728_v32, %v7496_v50  ;;  %v7500_v28 = vld [vmem:[#allocation14_spill] sm:$0xff] }
 0xde1   : > { %v2640_v47 = vadd.f32 %v2638_v49, %v2626_v36  ;;  %3332 = vperm.xlu1 %4762, %v3248_v0   ;;  %v1200_v59 = vadd.f32 %v1198_v56, %v1182_v19  ;;  %v6840_v36 = vrot.slane %v414_v45, %v6707_v6  ;;  %v1854_v19 = vadd.f32 %v1852_v37, %v6737_v42 }
 0xde2   : > { %v6813_v25 = vpop.permute.xlu0 %2643  ;;  %v6815_v53 = vpop.permute.xlu1 %1966  ;;  %v1131_v0 = vadd.f32 %v1129_v1, %v1113_v8  ;;  %v7498_v8 = vld [vmem:[#allocation18_spill] sm:$0xff] }
 0xde3   : > { %v1218_v49 = vadd.f32 %v1216_v4, %v1200_v59  ;;  %v1890_v37 = vmul.f32 %v7498_v8, %v6762_v63  ;;  %v7499_v1 = vld [vmem:[#allocation34_spill] sm:$0xff]  ;;  %v2557_v4 = vmul.f32 %v7500_v28, %v6719_v44  ;;  %v1891_v28 = vmul.f32 %v6556_v23, %v6762_v63 }
 0xde5   : > { %4763 = vset.pattern.permute.xlu1 %v7452_v61  ;;  %v1866_v61 = vmul.f32 %v6699_v35, %v6728_v32 }
 0xde6   : > { %v2649_v33 = vpop.permute.xlu0 %2648  ;;  %3365 = vperm.xlu1 %4763, %v6114_v43   ;;  %v6827_v55 = vpop.permute.xlu1 %1971 }
 0xde7   : > { %v2652_v9 = vmul.f32 %v2649_v33, %v6820_v58  ;;  %v1868_v26 = vadd.f32 %v1866_v61, %v1854_v19  ;;  %v1853_v33 = vmul.f32 %v6697_v54, %v6719_v44  ;;  %v1252_v19 = vmul.f32 %v6840_v36, %v6664_v30  ;;  %v7501_v30 = vld [vmem:[#allocation24_spill] sm:$0xff] }
 0xde8   : > { %v2571_v54 = vmul.f32 %v6503_v40, %v6728_v32 }
 0xde9   : > { %v2654_v43 = vadd.f32 %v2652_v9, %v2640_v47  ;;  %v1161_v9 = vmul.f32 %v6762_v63, %v7499_v1 }
 0xdea   : > { %4764 = vset.pattern.permute.xlu1 %v7451_v12  ;;  %v1147_v12 = vadd.f32 %v1145_v22, %v1131_v0  ;;  %v1867_v0 = vmul.f32 %v6704_v7, %v6728_v32  ;;  %v1904_v22 = vmul.f32 %v6561_v38, %v6775_v34  ;;  %v2559_v7 = vadd.f32 %v2557_v4, %v6737_v42 }
 0xdeb   : > { %v1872_v13 = vpop.permute.xlu0 %1871  ;;  %3374 = vperm.xlu1 %4764, %v7493_v48   ;;  %v2663_v35 = vpop.permute.xlu1 %2662  ;;  %v1236_v48 = vadd.f32 %v1234_v14, %v1218_v49 }
 0xdec   : > { %v1878_v47 = vmul.f32 %v1872_v13, %v6746_v3  ;;  %v2666_v56 = vmul.f32 %v2663_v35, %v6840_v36  ;;  %v1163_v49 = vadd.f32 %v1161_v9, %v1147_v12  ;;  %v1855_v13 = vadd.f32 %v1853_v33, %v6737_v42 }
 0xded   : > { %v1254_v14 = vadd.f32 %v1252_v19, %v1236_v48  ;;  %v2573_v38 = vadd.f32 %v2571_v54, %v2559_v7  ;;  %v1918_v12 = vmul.f32 %v6571_v17, %v6794_v5  ;;  %v7502_v48 = vld [vmem:[#allocation28_spill] sm:$0xff]  ;;  %v1932_v17 = vmul.f32 %v6648_v46, %v6803_v39 }
 0xdee   : > { %v1880_v59 = vadd.f32 %v1878_v47, %v1868_v26  ;;  %v6855_v50 = vadd.f32 %v2666_v56, %v2654_v43  ;;  %v6868_v43 = vrot.slane %v414_v45, %v6715_v29  ;;  %v1179_v26 = vmul.f32 %v6775_v34, %v7501_v30 }
 0xdef   : > { %v1876_v61 = vpop.permute.xlu0 %1875  ;;  %v1869_v45 = vadd.f32 %v1867_v0, %v1855_v13  ;;  %v1197_v1 = vmul.f32 %v6794_v5, %v7502_v48  ;;  %v2595_v0 = vmul.f32 %v6577_v21, %v6762_v63  ;;  %v1919_v21 = vmul.f32 %v6590_v41, %v6794_v5 }
 0xdf0   : > { %v1892_v27 = vadd.f32 %v1890_v37, %v1880_v59  ;;  %v1879_v35 = vmul.f32 %v1876_v61, %v6746_v3  ;;  %v1270_v40 = vmul.f32 %v6868_v43, %v6689_v24  ;;  %v1181_v37 = vadd.f32 %v1179_v26, %v1163_v49 }
 0xdf1   : > { %v1215_v49 = vmul.f32 %v6803_v39, %v6559_v52  ;;  %v2623_v46 = vmul.f32 %v6599_v51, %v6794_v5  ;;  %v1946_v26 = vmul.f32 %v6679_v62, %v6820_v58  ;;  %v1233_v52 = vmul.f32 %v6820_v58, %v6569_v31 }
 0xdf2   : > { %v1906_v56 = vadd.f32 %v1904_v22, %v1892_v27  ;;  %v1881_v33 = vadd.f32 %v1879_v35, %v1869_v45  ;;  %v6882_v59 = vadd.f32 %v1270_v40, %v1254_v14  ;;  %v1199_v19 = vadd.f32 %v1197_v1, %v1181_v37 }
 0xdf3   : > { %v2577_v47 = vpop.permute.xlu0 %2576  ;;  %v1933_v41 = vmul.f32 %v6593_v20, %v6803_v39  ;;  %v2637_v51 = vmul.f32 %v6789_v57, %v6803_v39  ;;  %v1974_v62 = vmul.f32 %v6815_v53, %v6868_v43  ;;  %v1251_v31 = vmul.f32 %v6840_v36, %v6642_v15  ;;  %v7503_v15 = vld [vmem:[#allocation6_spill] sm:$0xff] }
 0xdf4   : > { %v2583_v8 = vmul.f32 %v2577_v47, %v6746_v3  ;;  %v1920_v61 = vadd.f32 %v1918_v12, %v1906_v56  ;;  %v1893_v27 = vadd.f32 %v1891_v28, %v1881_v33  ;;  %v3390_v54 = vsel %vm3386_vm10, %v6882_v59, 0.0 }
 0xdf5   : > { %v1217_v30 = vadd.f32 %v1215_v49, %v1199_v19  ;;  %v1947_v28 = vmul.f32 %v6755_v10, %v6820_v58  ;;  %v2651_v20 = vmul.f32 %v6813_v25, %v6820_v58  ;;  %v1975_v49 = vmul.f32 %v6827_v55, %v6868_v43 }
 0xdf6   : > { %v2585_v24 = vadd.f32 %v2583_v8, %v2573_v38  ;;  %v1934_v14 = vadd.f32 %v1932_v17, %v1920_v61  ;;  %v1269_v61 = vmul.f32 %v6868_v43, %v7503_v15 }
 0xdf7   : > { %v1902_v9 = vpop.permute.xlu0 %1901  ;;  %v1235_v37 = vadd.f32 %v1233_v52, %v1217_v30 }
 0xdf8   : > { %v1905_v4 = vmul.f32 %v1902_v9, %v6775_v34  ;;  %v2597_v13 = vadd.f32 %v2595_v0, %v2585_v24  ;;  %v1948_v56 = vadd.f32 %v1946_v26, %v1934_v14  ;;  %v2672_v24 = vpop.permute.xlu1 %2671  ;;  %v7504_v26 = vld [vmem:[#allocation31_spill] sm:$0xff] }
 0xdf9   : > { %v1253_v9 = vadd.f32 %v1251_v31, %v1235_v37  ;;  %v2679_v10 = vmul.f32 %v2672_v24, %v6868_v43  ;;  %v7507_v31 = vld [vmem:[#allocation26_spill] sm:$0xff] }
 0xdfa   : > { %v1907_v22 = vadd.f32 %v1905_v4, %v1893_v27 }
 0xdfb   : > { %v2602_v23 = vpop.permute.xlu0 %2601  ;;  %3391 = vadd.xlane.f32.xlu0 %v3390_v54  ;;  %v6928_v25 = vadd.f32 %v1269_v61, %v1253_v9 }
 0xdfc   : > { %v2609_v35 = vmul.f32 %v2602_v23, %v6775_v34  ;;  %v1921_v40 = vadd.f32 %v1919_v21, %v1907_v22  ;;  %v3347_v30 = vpop.permute.xlu1 %3346 }
 0xdfd   : > { %v3387_v22 = vsel %vm3386_vm10, %v6928_v25, 0.0 }
 0xdfe   : > { %v2611_v7 = vadd.f32 %v2609_v35, %v2597_v13  ;;  %v1935_v33 = vadd.f32 %v1933_v41, %v1921_v40  ;;  %v7505_v40 = vld [vmem:[#allocation11_spill] sm:$0xff] }
 0xdff   : > { %v1953_v47 = vpop.permute.xlu0 %1952 }
 0xe00   : > { %v2625_v45 = vadd.f32 %v2623_v46, %v2611_v7  ;;  %v1960_v8 = vmul.f32 %v1953_v47, %v6840_v36  ;;  %v1949_v19 = vadd.f32 %v1947_v28, %v1935_v33  ;;  %v3352_v46 = vpop.permute.xlu1 %3351  ;;  %v3260_v7 = vmul.f32 %v7504_v26, %v6719_v44 }
 0xe02   : > { %v1962_v38 = vadd.f32 %v1960_v8, %v1948_v56  ;;  %v2639_v48 = vadd.f32 %v2637_v51, %v2625_v45  ;;  %v3274_v45 = vmul.f32 %v7505_v40, %v6728_v32  ;;  %v3262_v56 = vadd.f32 %v3260_v7, %v6737_v42  ;;  %v7506_v8 = vld [vmem:[#allocation16_spill] sm:$0xff] }
 0xe03   : > { %v1958_v12 = vpop.permute.xlu0 %1957  ;;  %v3286_v37 = vmul.f32 %v7506_v8, %v6746_v3 }
 0xe04   : > { %v6915_v1 = vadd.f32 %v1974_v62, %v1962_v38  ;;  %v1961_v57 = vmul.f32 %v1958_v12, %v6840_v36  ;;  %v2653_v0 = vadd.f32 %v2651_v20, %v2639_v48  ;;  %v3276_v38 = vadd.f32 %v3274_v45, %v3262_v56 }
 0xe05   : > { %v3298_v12 = vmul.f32 %v7507_v31, %v6762_v63 }
 0xe06   : > { %v3393_v53 = vsel %vm3386_vm10, %v6915_v1, 0.0  ;;  %v1963_v27 = vadd.f32 %v1961_v57, %v1949_v19  ;;  %v3288_v48 = vadd.f32 %v3286_v37, %v3276_v38  ;;  %v3355_v19 = vmul.f32 %v3352_v46, %v6820_v58 }
 0xe07   : > { %v2658_v4 = vpop.permute.xlu0 %2657  ;;  %3394 = vadd.xlane.f32.xlu0 %v3393_v53 }
 0xe08   : > { %v2665_v17 = vmul.f32 %v2658_v4, %v6840_v36  ;;  %v6938_v35 = vadd.f32 %v1975_v49, %v1963_v27  ;;  %v3300_v28 = vadd.f32 %v3298_v12, %v3288_v48 }
 0xe0a   : > { %v2667_v54 = vadd.f32 %v2665_v17, %v2653_v0  ;;  %v3396_v14 = vsel %vm3386_vm10, %v6938_v35, 0.0  ;;  %v3354_v0 = vmul.f32 %v3347_v30, %v6820_v58 }
 0xe0b   : > { %v3361_v21 = vpop.permute.xlu0 %3360 }
 0xe0c   : > { %v6932_v23 = vadd.f32 %v2679_v10, %v2667_v54 }
 0xe0e   : > { %v3399_v13 = vsel %vm3386_vm10, %v6932_v23, 0.0 }
 0xe0f   : > { %3388 = vadd.xlane.f32.xlu1 %v3387_v22  ;;  %3400 = vadd.xlane.f32.xlu0 %v3399_v13  ;;  %v3368_v22 = vmul.f32 %v3361_v21, %v6840_v36 }
 0xe11   : > { %v3310_v55 = vpop.permute.xlu0 %3309 }
 0xe12   : > { %v3313_v44 = vmul.f32 %v3310_v55, %v6775_v34 }
 0xe13   : > { %3397 = vadd.xlane.f32.xlu1 %v3396_v14 }
 0xe14   : > { %v3315_v63 = vadd.f32 %v3313_v44, %v6786_v16 }
 0xe15   : > { %v3324_v52 = vpop.permute.xlu1 %3323 }
 0xe16   : > { %v3327_v42 = vmul.f32 %v3324_v52, %v6794_v5 }
 0xe4f   : > { %v3338_v47 = vpop.permute.xlu0 %3337 }
 0xe50   : > { %v3341_v57 = vmul.f32 %v3338_v47, %v6803_v39 }
 0xe53   : > { %v2677_v41 = vpop.permute.xlu0 %2676  ;;  %v3305_v51 = vpop.permute.xlu1 %3304 }
 0xe54   : > { %v2680_v62 = vmul.f32 %v2677_v41, %v6868_v43  ;;  %v3312_v32 = vmul.f32 %v3305_v51, %v6775_v34 }
 0xe56   : > { %v6954_v33 = vadd.f32 %v2680_v62, %v6855_v50  ;;  %v3314_v53 = vadd.f32 %v3312_v32, %v3300_v28  ;;  %v3329_v50 = vadd.f32 %v3327_v42, %v3315_v63  ;;  %v3524_v32 = vld [vmem:[%s7292_s3] sm:$0xff] }
 0xe57   : > { %v3380_v17 = vpop.permute.xlu0 %3379  ;;  %4611 = vmatprep.subr.mxu0 %v3524_v32 }
 0xe58   : > { %v3319_v9 = vpop.permute.xlu1 %3318  ;;  %v3402_v3 = vsel %vm3386_vm10, %v6954_v33, 0.0  ;;  %v3343_v15 = vadd.f32 %v3341_v57, %v3329_v50  ;;  %v3383_v54 = vmul.f32 %v3380_v17, %v6868_v43  ;;  %4612 = vmatpush3.msra.mxu0 %v3524_v32 }
 0xe59   : > { %v3326_v20 = vmul.f32 %v3319_v9, %v6794_v5  ;;  %3403 = vadd.xlane.f32.xlu1 %v3402_v3 }
 0xe5a   : > { %v3357_v5 = vadd.f32 %v3355_v19, %v3343_v15 }
 0xe5b   : > { %v3328_v4 = vadd.f32 %v3326_v20, %v3314_v53 }
 0xe5c   : > { %v3333_v24 = vpop.permute.xlu1 %3332 }
 0xe5d   : > { %v3340_v34 = vmul.f32 %v3333_v24, %v6803_v39 }
 0xe5f   : > { %v3342_v61 = vadd.f32 %v3340_v34, %v3328_v4 }
 0xe61   : > { %v3366_v10 = vpop.permute.xlu1 %3365  ;;  %v3356_v16 = vadd.f32 %v3354_v0, %v3342_v61 }
 0xe62   : > { %v3369_v27 = vmul.f32 %v3366_v10, %v6840_v36 }
 0xe63   : > { %v3370_v39 = vadd.f32 %v3368_v22, %v3356_v16 }
 0xe64   : > { %v3371_v49 = vadd.f32 %v3369_v27, %v3357_v5 }
 0xe66   : > { %v3375_v13 = vpop.permute.xlu1 %3374  ;;  %v3385_v14 = vadd.f32 %v3383_v54, %v3371_v49 }
 0xe67   : > { %v3382_v55 = vmul.f32 %v3375_v13, %v6868_v43 }
 0xe68   : > { %v3408_v46 = vsel %vm3386_vm10, %v3385_v14, 0.0 }
 0xe69   : > { %v3384_v26 = vadd.f32 %v3382_v55, %v3370_v39  ;;  %3409 = vadd.xlane.f32.xlu1 %v3408_v46 }
 0xe6b   : > { %v3405_v58 = vsel %vm3386_vm10, %v3384_v26, 0.0 }
 0xe6c   : > { %3406 = vadd.xlane.f32.xlu0 %v3405_v58  ;;  %v7508_v58 = vld [vmem:[#allocation5_spill] sm:$0xff] }
 0xe84   : > { %v3392_v30 = vpop.xlane.xlu0 %3391 }
 0xe85   : > { %v3413_v7 = vmul.f32 0.125, %v3392_v30  ;;  %v3495_v30 = vrot.slane %v7508_v58, %v6715_v29 }
 0xe87   : > { %v6973_v52 = vsub.f32 %v6882_v59, %v3413_v7 }
 0xe89   : > { %v3429_v36 = vmul.f32 %v6973_v52, %v6973_v52 }
 0xe8b   : > { %v3439_v21 = vsel %vm3386_vm10, %v3429_v36, 0.0 }
 0xe8c   : > { %3440 = vadd.xlane.f32.xlu1 %v3439_v21  ;;  %v7509_v21 = vld [vmem:[#allocation27_spill] sm:$0xff] }
 0xe90   : > { %v3395_v47 = vpop.xlane.xlu0 %3394 }
 0xe91   : > { %v3414_v43 = vmul.f32 0.125, %v3395_v47  ;;  %v3507_v47 = vrot.slane %v7508_v58, %v7509_v21 }
 0xe93   : > { %v6979_v8 = vsub.f32 %v6915_v1, %v3414_v43 }
 0xe95   : > { %v3430_v1 = vmul.f32 %v6979_v8, %v6979_v8 }
 0xe97   : > { %v3442_v44 = vsel %vm3386_vm10, %v3430_v1, 0.0 }
 0xe98   : > { %v3401_v40 = vpop.xlane.xlu0 %3400  ;;  %v3389_v45 = vpop.xlane.xlu1 %3388 }
 0xe99   : > { %v3412_v56 = vmul.f32 0.125, %v3389_v45  ;;  %v3416_v37 = vmul.f32 0.125, %v3401_v40 }
 0xe9b   : > { %v6982_v41 = vsub.f32 %v6928_v25, %v3412_v56  ;;  %v6987_v38 = vsub.f32 %v6932_v23, %v3416_v37 }
 0xe9c   : > { %v3398_v59 = vpop.xlane.xlu1 %3397 }
 0xe9d   : > { %v3415_v51 = vmul.f32 0.125, %v3398_v59  ;;  %v3428_v62 = vmul.f32 %v6982_v41, %v6982_v41  ;;  %v3432_v23 = vmul.f32 %v6987_v38, %v6987_v38 }
 0xe9f   : > { %v6990_v31 = vsub.f32 %v6938_v35, %v3415_v51  ;;  %v3436_v12 = vsel %vm3386_vm10, %v3428_v62, 0.0  ;;  %v3448_v35 = vsel %vm3386_vm10, %v3432_v23, 0.0 }
 0xea0   : > { %3437 = vadd.xlane.f32.xlu0 %v3436_v12 }
 0xea1   : > { %v3431_v25 = vmul.f32 %v6990_v31, %v6990_v31 }
 0xea3   : > { %v3445_v48 = vsel %vm3386_vm10, %v3431_v25, 0.0 }
 0xea4   : > { %3443 = vadd.xlane.f32.xlu0 %v3442_v44  ;;  %3446 = vadd.xlane.f32.xlu1 %v3445_v48 }
 0xea8   : > { %3449 = vadd.xlane.f32.xlu0 %v3448_v35 }
 0xee2   : > { %v3404_v42 = vpop.xlane.xlu1 %3403 }
 0xee3   : > { %v3417_v9 = vmul.f32 0.125, %v3404_v42 }
 0xee5   : > { %v7006_v3 = vsub.f32 %v6954_v33, %v3417_v9 }
 0xee7   : > { %v3433_v28 = vmul.f32 %v7006_v3, %v7006_v3 }
 0xee9   : > { %v3451_v20 = vsel %vm3386_vm10, %v3433_v28, 0.0 }
 0xeea   : > { %3452 = vadd.xlane.f32.xlu1 %v3451_v20 }
 0xef2   : > { %v3410_v63 = vpop.xlane.xlu1 %3409 }
 0xef3   : > { %v3419_v57 = vmul.f32 0.125, %v3410_v63 }
 0xef5   : > { %v7011_v53 = vsub.f32 %v3385_v14, %v3419_v57  ;;  %v3407_v50 = vpop.xlane.xlu0 %3406 }
 0xef6   : > { %v3418_v24 = vmul.f32 0.125, %v3407_v50 }
 0xef7   : > { %v3435_v4 = vmul.f32 %v7011_v53, %v7011_v53 }
 0xef8   : > { %v7015_v34 = vsub.f32 %v3384_v26, %v3418_v24 }
 0xef9   : > { %v3457_v33 = vsel %vm3386_vm10, %v3435_v4, 0.0 }
 0xefa   : > { %3458 = vadd.xlane.f32.xlu1 %v3457_v33  ;;  %v3434_v15 = vmul.f32 %v7015_v34, %v7015_v34 }
 0xefc   : > { %v3454_v61 = vsel %vm3386_vm10, %v3434_v15, 0.0 }
 0xefd   : > { %3455 = vadd.xlane.f32.xlu0 %v3454_v61 }
 0xf15   : > { %v3441_v19 = vpop.xlane.xlu1 %3440 }
 0xf16   : > { %v3461_v0 = vmul.f32 0.125, %v3441_v19 }
 0xf18   : > { %v3469_v17 = vadd.f32 1e-05, %v3461_v0 }
 0xf1a   : > { %4893 = vrsqrt.f32 %v3469_v17 }
 0xf27   : > { %v4894_v46 = vpop.eup %4893 }
 0xf28   : > { %v3485_v7 = vmul.f32 %v4894_v46, %v6973_v52 }
 0xf29   : > { %v3438_v10 = vpop.xlane.xlu0 %3437 }
 0xf2a   : > { %v3460_v5 = vmul.f32 0.125, %v3438_v10  ;;  %v3497_v43 = vmul.f32 %v3495_v30, %v3485_v7 }
 0xf2c   : > { %v3468_v27 = vadd.f32 1e-05, %v3460_v5  ;;  %v3509_v37 = vadd.f32 %v3507_v47, %v3497_v43 }
 0xf2d   : > { %v3444_v16 = vpop.xlane.xlu0 %3443  ;;  %v3447_v54 = vpop.xlane.xlu1 %3446 }
 0xf2e   : > { %4895 = vrsqrt.f32 %v3468_v27  ;;  %v3462_v49 = vmul.f32 0.125, %v3444_v16  ;;  %v3463_v22 = vmul.f32 0.125, %v3447_v54  ;;  %v3517_v52 = vmax.f32 %v3509_v37, 0.0 }
 0xf30   : > { %v3470_v13 = vadd.f32 1e-05, %v3462_v49  ;;  %v3471_v14 = vadd.f32 1e-05, %v3463_v22 }
 0xf31   : > { %v3450_v39 = vpop.xlane.xlu0 %3449 }
 0xf32   : > { %4897 = vrsqrt.f32 %v3470_v13  ;;  %v3464_v55 = vmul.f32 0.125, %v3450_v39  ;;  %v7044_v39 = vld [vmem:[%s7297_s8] sm:$0x7] }
 0xf33   : > { %4899 = vrsqrt.f32 %v3471_v14 }
 0xf34   : > { %v3472_v26 = vadd.f32 1e-05, %v3464_v55 }
 0xf36   : > { %4901 = vrsqrt.f32 %v3472_v26 }
 0xf3b   : > { %v4896_v36 = vpop.eup %4895 }
 0xf3c   : > { %v3484_v40 = vmul.f32 %v4896_v36, %v6982_v41 }
 0xf3e   : > { %v3496_v45 = vmul.f32 %v3495_v30, %v3484_v40 }
 0xf3f   : > { %v4898_v56 = vpop.eup %4897 }
 0xf40   : > { %v4900_v59 = vpop.eup %4899  ;;  %v3508_v51 = vadd.f32 %v3507_v47, %v3496_v45  ;;  %v3486_v62 = vmul.f32 %v4898_v56, %v6979_v8 }
 0xf41   : > { %v3487_v12 = vmul.f32 %v4900_v59, %v6990_v31 }
 0xf42   : > { %v3516_v1 = vmax.f32 %v3508_v51, 0.0  ;;  %v3498_v25 = vmul.f32 %v3495_v30, %v3486_v62 }
 0xf43   : > { %v4902_v44 = vpop.eup %4901  ;;  %v3499_v48 = vmul.f32 %v3495_v30, %v3487_v12 }
 0xf44   : > { %4613 = vmatprep.mubr.msk.f32.mxu0 %vm3386_vm10, %v3516_v1  ;;  %v3510_v23 = vadd.f32 %v3507_v47, %v3498_v25  ;;  %v3488_v35 = vmul.f32 %v4902_v44, %v6987_v38 }
 0xf45   : > { %4614 = vmatmul.mubr.msk.f32.vlgmr.msra.gmra.mxu0 %vm3386_vm10, %v3517_v52  ;;  %v3511_v41 = vadd.f32 %v3507_v47, %v3499_v48 }
 0xf46   : > { %v3518_v32 = vmax.f32 %v3510_v23, 0.0  ;;  %v3500_v42 = vmul.f32 %v3495_v30, %v3488_v35 }
 0xf47   : > { %v3519_v9 = vmax.f32 %v3511_v41, 0.0 }
 0xf48   : > { %4616 = vmatprep.mubr.msk.f32.mxu0 %vm3386_vm10, %v3518_v32  ;;  %v3512_v8 = vadd.f32 %v3507_v47, %v3500_v42 }
 0xf49   : > { %4617 = vmatmul.mubr.msk.f32.gmra.mxu0 %vm3386_vm10, %v3519_v9 }
 0xf4a   : > { %v3520_v31 = vmax.f32 %v3512_v8, 0.0 }
 0xf4c   : > { %4619 = vmatprep.mubr.msk.f32.mxu0 %vm3386_vm10, %v3520_v31 }
 0xf73   : > { %v3453_v28 = vpop.xlane.xlu1 %3452 }
 0xf74   : > { %v3465_v20 = vmul.f32 0.125, %v3453_v28 }
 0xf76   : > { %v3473_v63 = vadd.f32 1e-05, %v3465_v20 }
 0xf78   : > { %4903 = vrsqrt.f32 %v3473_v63 }
 0xf83   : > { %v3459_v57 = vpop.xlane.xlu1 %3458 }
 0xf84   : > { %v3467_v38 = vmul.f32 0.125, %v3459_v57 }
 0xf85   : > { %v4904_v50 = vpop.eup %4903 }
 0xf86   : > { %v3475_v24 = vadd.f32 1e-05, %v3467_v38  ;;  %v3456_v4 = vpop.xlane.xlu0 %3455  ;;  %v3489_v33 = vmul.f32 %v4904_v50, %v7006_v3 }
 0xf87   : > { %v3466_v15 = vmul.f32 0.125, %v3456_v4 }
 0xf88   : > { %4905 = vrsqrt.f32 %v3475_v24  ;;  %v3501_v61 = vmul.f32 %v3495_v30, %v3489_v33 }
 0xf89   : > { %v3474_v19 = vadd.f32 1e-05, %v3466_v15 }
 0xf8a   : > { %v3513_v0 = vadd.f32 %v3507_v47, %v3501_v61 }
 0xf8b   : > { %4907 = vrsqrt.f32 %v3474_v19 }
 0xf8c   : > { %v3521_v17 = vmax.f32 %v3513_v0, 0.0 }
 0xf8e   : > { %4620 = vmatmul.mubr.msk.f32.gmra.mxu0 %vm3386_vm10, %v3521_v17  ;;  %v3796_v17 = vld [vmem:[%s7293_s4 + $0x8] sm:$0xff] }
 0xf8f   : > { %4625 = vmatprep.subr.mxu1 %v3796_v17 }
 0xf90   : > { %4626 = vmatpush3.msra.mxu1 %v3796_v17 }
 0xf95   : > { %v4906_v10 = vpop.eup %4905 }
 0xf96   : > { %v3491_v5 = vmul.f32 %v4906_v10, %v7011_v53  ;;  %v3528_v53 = vrot.slane %v7044_v39, %v6707_v6  ;;  %v3795_v10 = vld [vmem:[%s7293_s4] sm:$0xff] }
 0xf97   : > { %4627 = vmatprep.subr.mxu1 %v3795_v10 }
 0xf98   : > { %v4908_v27 = vpop.eup %4907  ;;  %v3503_v16 = vmul.f32 %v3495_v30, %v3491_v5  ;;  %4628 = vmatpush3.msra.mxu1 %v3795_v10 }
 0xf99   : > { %v3490_v54 = vmul.f32 %v4908_v27, %v7015_v34 }
 0xf9a   : > { %v3515_v22 = vadd.f32 %v3507_v47, %v3503_v16 }
 0xf9b   : > { %v3502_v49 = vmul.f32 %v3495_v30, %v3490_v54 }
 0xf9c   : > { %v3523_v14 = vmax.f32 %v3515_v22, 0.0 }
 0xf9d   : > { %v3514_v13 = vadd.f32 %v3507_v47, %v3502_v49 }
 0xf9f   : > { %v3522_v3 = vmax.f32 %v3514_v13, 0.0 }
 0xfa1   : > { %4622 = vmatprep.mubr.msk.f32.mxu0 %vm3386_vm10, %v3522_v3 }
 0xfa2   : > { %4623 = vmatmul.mubr.msk.f32.gmra.mxu0 %vm3386_vm10, %v3523_v14 }
0x1005   : > { %v4615_v55 = vpop.f32.mrf.mxu0 }
0x1006   : > { %v3625_v46 = vadd.f32 %v4615_v55, %v3528_v53 }
0x1007   : > { %v3619_v34 = vpop.f32.mrf.mxu0 }
0x1008   : > { %v3620_v26 = vadd.f32 %v3619_v34, %v3528_v53  ;;  %v3661_v58 = vsel %vm523_vm2, %v3625_v46, 0.0 }
0x1009   : > { %3662 = vadd.xlane.f32.xlu1 %v3661_v58  ;;  %v4618_v30 = vpop.f32.mrf.mxu0 }
0x100a   : > { %v3635_v7 = vadd.f32 %v4618_v30, %v3528_v53  ;;  %v3658_v36 = vsel %vm523_vm2, %v3620_v26, 0.0 }
0x100b   : > { %3659 = vadd.xlane.f32.xlu0 %v3658_v36  ;;  %v3629_v47 = vpop.f32.mrf.mxu0 }
0x100c   : > { %v3630_v43 = vadd.f32 %v3629_v47, %v3528_v53  ;;  %v3667_v40 = vsel %vm523_vm2, %v3635_v7, 0.0 }
0x100d   : > { %3668 = vadd.xlane.f32.xlu1 %v3667_v40 }
0x100e   : > { %v3664_v45 = vsel %vm523_vm2, %v3630_v43, 0.0 }
0x100f   : > { %3665 = vadd.xlane.f32.xlu0 %v3664_v45 }
0x104e   : > { %v4621_v56 = vpop.f32.mrf.mxu0 }
0x104f   : > { %v3645_v37 = vadd.f32 %v4621_v56, %v3528_v53 }
0x1050   : > { %v3639_v59 = vpop.f32.mrf.mxu0 }
0x1051   : > { %v3640_v51 = vadd.f32 %v3639_v59, %v3528_v53  ;;  %v3673_v62 = vsel %vm523_vm2, %v3645_v37, 0.0 }
0x1052   : > { %3674 = vadd.xlane.f32.xlu1 %v3673_v62 }
0x1053   : > { %v3670_v12 = vsel %vm523_vm2, %v3640_v51, 0.0 }
0x1054   : > { %3671 = vadd.xlane.f32.xlu0 %v3670_v12 }
0x1062   : > { %v4624_v1 = vpop.f32.mrf.mxu0 }
0x1063   : > { %v3655_v25 = vadd.f32 %v4624_v1, %v3528_v53 }
0x1064   : > { %v3649_v44 = vpop.f32.mrf.mxu0 }
0x1065   : > { %v3650_v52 = vadd.f32 %v3649_v44, %v3528_v53  ;;  %v3679_v48 = vsel %vm523_vm2, %v3655_v25, 0.0 }
0x1066   : > { %3680 = vadd.xlane.f32.xlu1 %v3679_v48  ;;  %v3766_v48 = vrot.slane %v7044_v39, %v6715_v29 }
0x1067   : > { %v3676_v23 = vsel %vm523_vm2, %v3650_v52, 0.0 }
0x1068   : > { %3677 = vadd.xlane.f32.xlu0 %v3676_v23 }
0x1092   : > { %v3663_v35 = vpop.xlane.xlu1 %3662 }
0x1093   : > { %v3684_v41 = vmul.f32 0.0625, %v3663_v35 }
0x1094   : > { %v3660_v32 = vpop.xlane.xlu0 %3659 }
0x1095   : > { %v7056_v42 = vsub.f32 %v3625_v46, %v3684_v41  ;;  %v3683_v9 = vmul.f32 0.0625, %v3660_v32  ;;  %v3778_v32 = vrot.slane %v7044_v39, %v7509_v21 }
0x1096   : > { %v3669_v8 = vpop.xlane.xlu1 %3668 }
0x1097   : > { %v7058_v31 = vsub.f32 %v3620_v26, %v3683_v9  ;;  %v3686_v28 = vmul.f32 0.0625, %v3669_v8  ;;  %v3700_v20 = vmul.f32 %v7056_v42, %v7056_v42 }
0x1098   : > { %v3666_v63 = vpop.xlane.xlu0 %3665 }
0x1099   : > { %v7062_v57 = vsub.f32 %v3635_v7, %v3686_v28  ;;  %v3685_v38 = vmul.f32 0.0625, %v3666_v63  ;;  %v3710_v50 = vsel %vm523_vm2, %v3700_v20, 0.0  ;;  %v3699_v24 = vmul.f32 %v7058_v31, %v7058_v31 }
0x109a   : > { %3711 = vadd.xlane.f32.xlu1 %v3710_v50 }
0x109b   : > { %v7067_v4 = vsub.f32 %v3630_v43, %v3685_v38  ;;  %v3707_v33 = vsel %vm523_vm2, %v3699_v24, 0.0  ;;  %v3702_v15 = vmul.f32 %v7062_v57, %v7062_v57 }
0x109c   : > { %3708 = vadd.xlane.f32.xlu0 %v3707_v33 }
0x109d   : > { %v3716_v61 = vsel %vm523_vm2, %v3702_v15, 0.0  ;;  %v3701_v19 = vmul.f32 %v7067_v4, %v7067_v4 }
0x109e   : > { %3717 = vadd.xlane.f32.xlu1 %v3716_v61 }
0x109f   : > { %v3713_v0 = vsel %vm523_vm2, %v3701_v19, 0.0 }
0x10a0   : > { %3714 = vadd.xlane.f32.xlu0 %v3713_v0 }
0x10db   : > { %v3675_v5 = vpop.xlane.xlu1 %3674 }
0x10dc   : > { %v3688_v27 = vmul.f32 0.0625, %v3675_v5 }
0x10dd   : > { %v3672_v16 = vpop.xlane.xlu0 %3671 }
0x10de   : > { %v7082_v54 = vsub.f32 %v3645_v37, %v3688_v27  ;;  %v3687_v49 = vmul.f32 0.0625, %v3672_v16 }
0x10e0   : > { %v7084_v22 = vsub.f32 %v3640_v51, %v3687_v49  ;;  %v3704_v13 = vmul.f32 %v7082_v54, %v7082_v54 }
0x10e2   : > { %v3722_v3 = vsel %vm523_vm2, %v3704_v13, 0.0  ;;  %v3703_v14 = vmul.f32 %v7084_v22, %v7084_v22 }
0x10e3   : > { %3723 = vadd.xlane.f32.xlu1 %v3722_v3 }
0x10e4   : > { %v3719_v53 = vsel %vm523_vm2, %v3703_v14, 0.0 }
0x10e5   : > { %3720 = vadd.xlane.f32.xlu0 %v3719_v53 }
0x10ef   : > { %v3681_v55 = vpop.xlane.xlu1 %3680 }
0x10f0   : > { %v3690_v46 = vmul.f32 0.0625, %v3681_v55 }
0x10f1   : > { %v3678_v34 = vpop.xlane.xlu0 %3677 }
0x10f2   : > { %v7092_v26 = vsub.f32 %v3655_v25, %v3690_v46  ;;  %v3689_v58 = vmul.f32 0.0625, %v3678_v34 }
0x10f4   : > { %v7094_v30 = vsub.f32 %v3650_v52, %v3689_v58  ;;  %v3706_v7 = vmul.f32 %v7092_v26, %v7092_v26 }
0x10f6   : > { %v3728_v36 = vsel %vm523_vm2, %v3706_v7, 0.0  ;;  %v3705_v47 = vmul.f32 %v7094_v30, %v7094_v30 }
0x10f7   : > { %3729 = vadd.xlane.f32.xlu1 %v3728_v36 }
0x10f8   : > { %v3725_v43 = vsel %vm523_vm2, %v3705_v47, 0.0 }
0x10f9   : > { %3726 = vadd.xlane.f32.xlu0 %v3725_v43 }
0x1123   : > { %v3712_v40 = vpop.xlane.xlu1 %3711 }
0x1124   : > { %v3732_v45 = vmul.f32 0.0625, %v3712_v40 }
0x1125   : > { %v3709_v56 = vpop.xlane.xlu0 %3708 }
0x1126   : > { %v3740_v37 = vadd.f32 1e-05, %v3732_v45  ;;  %v3731_v59 = vmul.f32 0.0625, %v3709_v56 }
0x1127   : > { %v3718_v51 = vpop.xlane.xlu1 %3717 }
0x1128   : > { %4909 = vrsqrt.f32 %v3740_v37  ;;  %v3739_v62 = vadd.f32 1e-05, %v3731_v59  ;;  %v3734_v12 = vmul.f32 0.0625, %v3718_v51 }
0x1129   : > { %v3715_v1 = vpop.xlane.xlu0 %3714 }
0x112a   : > { %4911 = vrsqrt.f32 %v3739_v62  ;;  %v3742_v25 = vadd.f32 1e-05, %v3734_v12  ;;  %v3733_v44 = vmul.f32 0.0625, %v3715_v1 }
0x112c   : > { %4913 = vrsqrt.f32 %v3742_v25  ;;  %v3741_v52 = vadd.f32 1e-05, %v3733_v44 }
0x112e   : > { %4915 = vrsqrt.f32 %v3741_v52  ;;  %v7125_v52 = vld [vmem:[%s7298_s9] sm:$0x7f] }
0x1135   : > { %v4910_v23 = vpop.eup %4909 }
0x1136   : > { %v3756_v35 = vmul.f32 %v4910_v23, %v7056_v42 }
0x1137   : > { %v4912_v41 = vpop.eup %4911 }
0x1138   : > { %v3755_v9 = vmul.f32 %v4912_v41, %v7058_v31  ;;  %v3768_v8 = vmul.f32 %v3766_v48, %v3756_v35 }
0x1139   : > { %v4914_v28 = vpop.eup %4913 }
0x113a   : > { %v3767_v20 = vmul.f32 %v3766_v48, %v3755_v9  ;;  %v3758_v63 = vmul.f32 %v4914_v28, %v7062_v57  ;;  %v3780_v50 = vadd.f32 %v3778_v32, %v3768_v8 }
0x113b   : > { %v4916_v38 = vpop.eup %4915 }
0x113c   : > { %v3779_v24 = vadd.f32 %v3778_v32, %v3767_v20  ;;  %v3757_v33 = vmul.f32 %v4916_v38, %v7067_v4  ;;  %v3770_v15 = vmul.f32 %v3766_v48, %v3758_v63  ;;  %v3788_v42 = vmax.f32 %v3780_v50, 0.0 }
0x113e   : > { %v3787_v61 = vmax.f32 %v3779_v24, 0.0  ;;  %v3769_v19 = vmul.f32 %v3766_v48, %v3757_v33  ;;  %v3782_v0 = vadd.f32 %v3778_v32, %v3770_v15 }
0x1140   : > { %4629 = vmatprep.mubr.msk.f32.mxu1 %vm523_vm2, %v3787_v61  ;;  %v3781_v39 = vadd.f32 %v3778_v32, %v3769_v19  ;;  %v3790_v17 = vmax.f32 %v3782_v0, 0.0 }
0x1141   : > { %4630 = vmatmul.mubr.msk.f32.vlgmr.msra.gmra.mxu1 %vm523_vm2, %v3788_v42 }
0x1142   : > { %v3789_v31 = vmax.f32 %v3781_v39, 0.0 }
0x1144   : > { %4632 = vmatprep.mubr.msk.f32.mxu1 %vm523_vm2, %v3789_v31 }
0x1145   : > { %4633 = vmatmul.mubr.msk.f32.gmra.mxu1 %vm523_vm2, %v3790_v17 }
0x116c   : > { %v3724_v57 = vpop.xlane.xlu1 %3723 }
0x116d   : > { %v3736_v10 = vmul.f32 0.0625, %v3724_v57 }
0x116e   : > { %v3721_v5 = vpop.xlane.xlu0 %3720 }
0x116f   : > { %v3744_v4 = vadd.f32 1e-05, %v3736_v10  ;;  %v3735_v27 = vmul.f32 0.0625, %v3721_v5 }
0x1171   : > { %4917 = vrsqrt.f32 %v3744_v4  ;;  %v3743_v16 = vadd.f32 1e-05, %v3735_v27 }
0x1173   : > { %4919 = vrsqrt.f32 %v3743_v16 }
0x117e   : > { %v4918_v49 = vpop.eup %4917 }
0x117f   : > { %v3760_v13 = vmul.f32 %v4918_v49, %v7082_v54 }
0x1180   : > { %v4920_v3 = vpop.eup %4919  ;;  %v3730_v14 = vpop.xlane.xlu1 %3729 }
0x1181   : > { %v3738_v53 = vmul.f32 0.0625, %v3730_v14  ;;  %v3759_v55 = vmul.f32 %v4920_v3, %v7084_v22  ;;  %v3772_v46 = vmul.f32 %v3766_v48, %v3760_v13 }
0x1182   : > { %v3727_v34 = vpop.xlane.xlu0 %3726 }
0x1183   : > { %v3746_v58 = vadd.f32 1e-05, %v3738_v53  ;;  %v3737_v7 = vmul.f32 0.0625, %v3727_v34  ;;  %v3771_v36 = vmul.f32 %v3766_v48, %v3759_v55  ;;  %v3784_v47 = vadd.f32 %v3778_v32, %v3772_v46 }
0x1185   : > { %4921 = vrsqrt.f32 %v3746_v58  ;;  %v3745_v43 = vadd.f32 1e-05, %v3737_v7  ;;  %v3783_v40 = vadd.f32 %v3778_v32, %v3771_v36  ;;  %v3792_v56 = vmax.f32 %v3784_v47, 0.0 }
0x1187   : > { %4923 = vrsqrt.f32 %v3745_v43  ;;  %v3791_v45 = vmax.f32 %v3783_v40, 0.0 }
0x1189   : > { %4635 = vmatprep.mubr.msk.f32.mxu1 %vm523_vm2, %v3791_v45 }
0x118a   : > { %4636 = vmatmul.mubr.msk.f32.gmra.mxu1 %vm523_vm2, %v3792_v56 }
0x1192   : > { %v4922_v54 = vpop.eup %4921 }
0x1193   : > { %v3762_v37 = vmul.f32 %v4922_v54, %v7092_v26  ;;  %v3800_v26 = vrot.slane %v7125_v52, %v6707_v6 }
0x1194   : > { %v4924_v22 = vpop.eup %4923 }
0x1195   : > { %v3761_v59 = vmul.f32 %v4924_v22, %v7094_v30  ;;  %v3774_v51 = vmul.f32 %v3766_v48, %v3762_v37 }
0x1197   : > { %v3773_v62 = vmul.f32 %v3766_v48, %v3761_v59  ;;  %v3786_v12 = vadd.f32 %v3778_v32, %v3774_v51 }
0x1199   : > { %v3785_v1 = vadd.f32 %v3778_v32, %v3773_v62  ;;  %v3794_v44 = vmax.f32 %v3786_v12, 0.0 }
0x119b   : > { %v3793_v25 = vmax.f32 %v3785_v1, 0.0 }
0x119d   : > { %4638 = vmatprep.mubr.msk.f32.mxu1 %vm523_vm2, %v3793_v25 }
0x119e   : > { %4639 = vmatmul.mubr.msk.f32.gmra.mxu1 %vm523_vm2, %v3794_v44 }
0x1201   : > { %v4631_v23 = vpop.f32.mrf.mxu1 }
0x1202   : > { %v3897_v41 = vadd.f32 %v4631_v23, %v3800_v26 }
0x1203   : > { %v3891_v30 = vpop.f32.mrf.mxu1 }
0x1204   : > { %v3892_v35 = vadd.f32 %v3891_v30, %v3800_v26  ;;  %v3934_v20 = vsel %vm3930_vm11, %v3897_v41, 0.0 }
0x1205   : > { %v4634_v48 = vpop.f32.mrf.mxu1 }
0x1206   : > { %v3931_v32 = vsel %vm3930_vm11, %v3892_v35, 0.0  ;;  %v3907_v28 = vadd.f32 %v4634_v48, %v3800_v26 }
0x1207   : > { %3932 = vadd.xlane.f32.xlu0 %v3931_v32  ;;  %v3901_v9 = vpop.f32.mrf.mxu1 }
0x1208   : > { %v3902_v8 = vadd.f32 %v3901_v9, %v3800_v26  ;;  %v3940_v38 = vsel %vm3930_vm11, %v3907_v28, 0.0 }
0x120a   : > { %v3937_v63 = vsel %vm3930_vm11, %v3902_v8, 0.0 }
0x120b   : > { %3935 = vadd.xlane.f32.xlu0 %v3934_v20  ;;  %3938 = vadd.xlane.f32.xlu1 %v3937_v63  ;;  %v4069_v20 = vld [vmem:[%s7294_s5 + $0x8] sm:$0xff]  ;;  %v4068_v63 = vld [vmem:[%s7294_s5] sm:$0xff] }
0x120f   : > { %3941 = vadd.xlane.f32.xlu1 %v3940_v38 }
0x124a   : > { %v4637_v6 = vpop.f32.mrf.mxu1 }
0x124b   : > { %v3917_v50 = vadd.f32 %v4637_v6, %v3800_v26 }
0x124c   : > { %v3911_v24 = vpop.f32.mrf.mxu1 }
0x124d   : > { %v3912_v33 = vadd.f32 %v3911_v24, %v3800_v26  ;;  %v3946_v15 = vsel %vm3930_vm11, %v3917_v50, 0.0 }
0x124e   : > { %3947 = vadd.xlane.f32.xlu1 %v3946_v15 }
0x124f   : > { %v3943_v61 = vsel %vm3930_vm11, %v3912_v33, 0.0 }
0x1250   : > { %3944 = vadd.xlane.f32.xlu0 %v3943_v61 }
0x125e   : > { %v4640_v19 = vpop.f32.mrf.mxu1 }
0x125f   : > { %v3927_v42 = vadd.f32 %v4640_v19, %v3800_v26 }
0x1260   : > { %v3921_v0 = vpop.f32.mrf.mxu1 }
0x1261   : > { %v3922_v39 = vadd.f32 %v3921_v0, %v3800_v26  ;;  %v3952_v31 = vsel %vm3930_vm11, %v3927_v42, 0.0 }
0x1262   : > { %3953 = vadd.xlane.f32.xlu1 %v3952_v31 }
0x1263   : > { %v3949_v17 = vsel %vm3930_vm11, %v3922_v39, 0.0 }
0x1264   : > { %3950 = vadd.xlane.f32.xlu0 %v3949_v17 }
0x1290   : > { %v3933_v57 = vpop.xlane.xlu0 %3932 }
0x1291   : > { %v3956_v10 = vmul.f32 0.03125, %v3933_v57 }
0x1293   : > { %v7137_v5 = vsub.f32 %v3892_v35, %v3956_v10 }
0x1294   : > { %v3936_v4 = vpop.xlane.xlu0 %3935  ;;  %v3939_v27 = vpop.xlane.xlu1 %3938 }
0x1295   : > { %v3957_v16 = vmul.f32 0.03125, %v3936_v4  ;;  %v3958_v49 = vmul.f32 0.03125, %v3939_v27  ;;  %v3972_v13 = vmul.f32 %v7137_v5, %v7137_v5 }
0x1297   : > { %v7141_v3 = vsub.f32 %v3897_v41, %v3957_v16  ;;  %v7143_v14 = vsub.f32 %v3902_v8, %v3958_v49  ;;  %v3980_v53 = vsel %vm3930_vm11, %v3972_v13, 0.0  ;;  %v4071_v8 = vld [vmem:[%s7294_s5 + $0x18] sm:$0xff] }
0x1298   : > { %3981 = vadd.xlane.f32.xlu0 %v3980_v53  ;;  %v3942_v55 = vpop.xlane.xlu1 %3941  ;;  %4641 = vmatprep.subr.mxu0 %v4071_v8 }
0x1299   : > { %v3959_v46 = vmul.f32 0.03125, %v3942_v55  ;;  %v3973_v34 = vmul.f32 %v7141_v3, %v7141_v3  ;;  %v3974_v58 = vmul.f32 %v7143_v14, %v7143_v14  ;;  %4642 = vmatpush3.msra.mxu0 %v4071_v8 }
0x129b   : > { %v7150_v7 = vsub.f32 %v3907_v28, %v3959_v46  ;;  %v3983_v36 = vsel %vm3930_vm11, %v3973_v34, 0.0  ;;  %v3986_v47 = vsel %vm3930_vm11, %v3974_v58, 0.0  ;;  %v4070_v28 = vld [vmem:[%s7294_s5 + $0x10] sm:$0xff] }
0x129c   : > { %3984 = vadd.xlane.f32.xlu0 %v3983_v36  ;;  %3987 = vadd.xlane.f32.xlu1 %v3986_v47 }
0x129d   : > { %v3975_v43 = vmul.f32 %v7150_v7, %v7150_v7  ;;  %4643 = vmatprep.subr.mxu0 %v4070_v28 }
0x129e   : > { %4644 = vmatpush3.msra.mxu0 %v4070_v28 }
0x129f   : > { %v3989_v40 = vsel %vm3930_vm11, %v3975_v43, 0.0  ;;  %4645 = vmatprep.subr.mxu0 %v4069_v20 }
0x12a0   : > { %3990 = vadd.xlane.f32.xlu1 %v3989_v40  ;;  %4646 = vmatpush3.msra.mxu0 %v4069_v20 }
0x12a1   : > { %4647 = vmatprep.subr.mxu0 %v4068_v63 }
0x12a2   : > { %4648 = vmatpush3.msra.mxu0 %v4068_v63 }
0x12d7   : > { %v3948_v45 = vpop.xlane.xlu1 %3947 }
0x12d8   : > { %v3961_v56 = vmul.f32 0.03125, %v3948_v45 }
0x12d9   : > { %v3945_v54 = vpop.xlane.xlu0 %3944 }
0x12da   : > { %v7157_v37 = vsub.f32 %v3917_v50, %v3961_v56  ;;  %v3960_v22 = vmul.f32 0.03125, %v3945_v54 }
0x12dc   : > { %v7159_v59 = vsub.f32 %v3912_v33, %v3960_v22  ;;  %v3977_v51 = vmul.f32 %v7157_v37, %v7157_v37  ;;  %v4039_v22 = vrot.slane %v7125_v52, %v6715_v29 }
0x12de   : > { %v3995_v62 = vsel %vm3930_vm11, %v3977_v51, 0.0  ;;  %v3976_v12 = vmul.f32 %v7159_v59, %v7159_v59 }
0x12df   : > { %3996 = vadd.xlane.f32.xlu1 %v3995_v62 }
0x12e0   : > { %v3992_v1 = vsel %vm3930_vm11, %v3976_v12, 0.0 }
0x12e1   : > { %3993 = vadd.xlane.f32.xlu0 %v3992_v1 }
0x12eb   : > { %v3954_v25 = vpop.xlane.xlu1 %3953 }
0x12ec   : > { %v3963_v44 = vmul.f32 0.03125, %v3954_v25 }
0x12ed   : > { %v3951_v23 = vpop.xlane.xlu0 %3950 }
0x12ee   : > { %v7167_v26 = vsub.f32 %v3927_v42, %v3963_v44  ;;  %v3962_v30 = vmul.f32 0.03125, %v3951_v23  ;;  %v4051_v23 = vrot.slane %v7125_v52, %v7509_v21 }
0x12f0   : > { %v7169_v35 = vsub.f32 %v3922_v39, %v3962_v30  ;;  %v3979_v48 = vmul.f32 %v7167_v26, %v7167_v26 }
0x12f2   : > { %v4001_v41 = vsel %vm3930_vm11, %v3979_v48, 0.0  ;;  %v3978_v32 = vmul.f32 %v7169_v35, %v7169_v35 }
0x12f3   : > { %4002 = vadd.xlane.f32.xlu1 %v4001_v41 }
0x12f4   : > { %v3998_v9 = vsel %vm3930_vm11, %v3978_v32, 0.0 }
0x12f5   : > { %3999 = vadd.xlane.f32.xlu0 %v3998_v9 }
0x1321   : > { %v3982_v6 = vpop.xlane.xlu0 %3981 }
0x1322   : > { %v4004_v33 = vmul.f32 0.03125, %v3982_v6 }
0x1324   : > { %v4012_v39 = vadd.f32 1e-05, %v4004_v33 }
0x1325   : > { %v3988_v38 = vpop.xlane.xlu1 %3987  ;;  %v3985_v24 = vpop.xlane.xlu0 %3984 }
0x1326   : > { %v4005_v15 = vmul.f32 0.03125, %v3985_v24  ;;  %v4006_v0 = vmul.f32 0.03125, %v3988_v38  ;;  %4925 = vrsqrt.f32 %v4012_v39 }
0x1328   : > { %v4013_v17 = vadd.f32 1e-05, %v4005_v15  ;;  %v4014_v4 = vadd.f32 1e-05, %v4006_v0 }
0x1329   : > { %v3991_v50 = vpop.xlane.xlu1 %3990 }
0x132a   : > { %v4007_v19 = vmul.f32 0.03125, %v3991_v50  ;;  %4927 = vrsqrt.f32 %v4013_v17 }
0x132c   : > { %v4015_v10 = vadd.f32 1e-05, %v4007_v19 }
0x132e   : > { %4929 = vrsqrt.f32 %v4015_v10 }
0x132f   : > { %4931 = vrsqrt.f32 %v4014_v4 }
0x1333   : > { %v4926_v34 = vpop.eup %4925 }
0x1334   : > { %v4028_v12 = vmul.f32 %v4926_v34, %v7137_v5  ;;  %v4200_v34 = vld [vmem:[%s7295_s6 + $0x18] sm:$0xff] }
0x1335   : > { %4652 = vmatprep.subr.mxu1 %v4200_v34 }
0x1336   : > { %v4040_v48 = vmul.f32 %v4039_v22, %v4028_v12  ;;  %4653 = vmatpush3.msra.mxu1 %v4200_v34 }
0x1337   : > { %v4928_v36 = vpop.eup %4927 }
0x1338   : > { %v4029_v51 = vmul.f32 %v4928_v36, %v7141_v3  ;;  %v4052_v28 = vadd.f32 %v4051_v23, %v4040_v48  ;;  %v4198_v36 = vld [vmem:[%s7295_s6 + $0x8] sm:$0xff] }
0x133a   : > { %v4041_v30 = vmul.f32 %v4039_v22, %v4029_v51  ;;  %v4186_v51 = vrot.slane %v7125_v52, %v1177_v18  ;;  %v7510_v18 = vsub.s32 6, %v6702_v60 }
0x133b   : > { %v4930_v47 = vpop.eup %4929 }
0x133c   : > { %v4932_v43 = vpop.eup %4931  ;;  %v4031_v56 = vmul.f32 %v4930_v47, %v7150_v7  ;;  %v4197_v47 = vld [vmem:[%s7295_s6] sm:$0xff] }
0x133d   : > { %v4030_v54 = vmul.f32 %v4932_v43, %v7143_v14 }
0x133e   : > { %v4043_v25 = vmul.f32 %v4039_v22, %v4031_v56 }
0x133f   : > { %v4042_v44 = vmul.f32 %v4039_v22, %v4030_v54 }
0x1340   : > { %v4055_v32 = vadd.f32 %v4051_v23, %v4043_v25  ;;  %v4192_v25 = vrot.slane %v7125_v52, %v1195_v11 }
0x1341   : > { %v4054_v3 = vadd.f32 %v4051_v23, %v4042_v44 }
0x1343   : > { %v4060_v6 = vadd.f32 %v4054_v3, %v4052_v28 }
0x1368   : > { %v3997_v61 = vpop.xlane.xlu1 %3996 }
0x1369   : > { %v4009_v31 = vmul.f32 0.03125, %v3997_v61 }
0x136a   : > { %v3994_v42 = vpop.xlane.xlu0 %3993 }
0x136b   : > { %v4008_v57 = vmul.f32 0.03125, %v3994_v42  ;;  %v4017_v27 = vadd.f32 1e-05, %v4009_v31 }
0x136d   : > { %v4016_v16 = vadd.f32 1e-05, %v4008_v57  ;;  %4933 = vrsqrt.f32 %v4017_v27 }
0x136f   : > { %4935 = vrsqrt.f32 %v4016_v16 }
0x137a   : > { %v4934_v40 = vpop.eup %4933 }
0x137b   : > { %v4033_v62 = vmul.f32 %v4934_v40, %v7157_v37  ;;  %v4053_v37 = vadd.f32 %v4051_v23, %v4041_v30 }
0x137c   : > { %v4003_v49 = vpop.xlane.xlu1 %4002  ;;  %v4936_v45 = vpop.eup %4935 }
0x137d   : > { %v4011_v13 = vmul.f32 0.03125, %v4003_v49  ;;  %v4032_v1 = vmul.f32 %v4936_v45, %v7159_v59  ;;  %v4045_v7 = vmul.f32 %v4039_v22, %v4033_v62  ;;  %v4061_v63 = vadd.f32 %v4055_v32, %v4053_v37 }
0x137e   : > { %v4000_v53 = vpop.xlane.xlu0 %3999  ;;  %v4204_v32 = vrot.slane %v7125_v52, %v7510_v18 }
0x137f   : > { %v4019_v55 = vadd.f32 1e-05, %v4011_v13  ;;  %v4010_v46 = vmul.f32 0.03125, %v4000_v53  ;;  %v4044_v14 = vmul.f32 %v4039_v22, %v4032_v1  ;;  %v4057_v8 = vadd.f32 %v4051_v23, %v4045_v7 }
0x1381   : > { %4937 = vrsqrt.f32 %v4019_v55  ;;  %v4018_v58 = vadd.f32 1e-05, %v4010_v46  ;;  %v4056_v20 = vadd.f32 %v4051_v23, %v4044_v14  ;;  %v4063_v50 = vadd.f32 %v4061_v63, %v4057_v8 }
0x1383   : > { %4939 = vrsqrt.f32 %v4018_v58  ;;  %v4062_v33 = vadd.f32 %v4060_v6, %v4056_v20  ;;  %v4199_v58 = vld [vmem:[%s7295_s6 + $0x10] sm:$0xff] }
0x1384   : > { %4654 = vmatprep.subr.mxu1 %v4199_v58 }
0x1385   : > { %4655 = vmatpush3.msra.mxu1 %v4199_v58 }
0x1386   : > { %4656 = vmatprep.subr.mxu1 %v4198_v36 }
0x1387   : > { %4657 = vmatpush3.msra.mxu1 %v4198_v36 }
0x1388   : > { %4658 = vmatprep.subr.mxu1 %v4197_v47 }
0x1389   : > { %4659 = vmatpush3.msra.mxu1 %v4197_v47 }
0x138e   : > { %v4938_v41 = vpop.eup %4937 }
0x138f   : > { %v4035_v29 = vmul.f32 %v4938_v41, %v7167_v26 }
0x1390   : > { %v4940_v9 = vpop.eup %4939 }
0x1391   : > { %v4047_v5 = vmul.f32 %v4039_v22, %v4035_v29  ;;  %v4034_v59 = vmul.f32 %v4940_v9, %v7169_v35  ;;  %v4075_v35 = vrot.slane %v7125_v52, %v1159_v2 }
0x1393   : > { %v4059_v38 = vadd.f32 %v4051_v23, %v4047_v5  ;;  %v4046_v21 = vmul.f32 %v4039_v22, %v4034_v59 }
0x1395   : > { %v4058_v24 = vadd.f32 %v4051_v23, %v4046_v21  ;;  %v4065_v15 = vadd.f32 %v4063_v50, %v4059_v38 }
0x1397   : > { %v4064_v61 = vadd.f32 %v4062_v33, %v4058_v24  ;;  %v4067_v26 = vmul.f32 0.25, %v4065_v15 }
0x1399   : > { %v4066_v19 = vmul.f32 0.25, %v4064_v61 }
0x139b   : > { %4649 = vmatprep.mubr.msk.f32.mxu0 %vm3930_vm11, %v4066_v19 }
0x139c   : > { %4650 = vmatmul.mubr.msk.f32.vlgmr.msra.gmra.mxu0 %vm3930_vm11, %v4067_v26 }
0x145c   : > { %v4651_v42 = vpop.f32.mrf.mxu0 }
0x145d   : > { %v4154_v0 = vadd.f32 %v4651_v42, %v4075_v35 }
0x145e   : > { %v4148_v39 = vpop.f32.mrf.mxu0 }
0x145f   : > { %v4149_v31 = vadd.f32 %v4148_v39, %v4075_v35  ;;  %v4160_v17 = vsel %vm3930_vm11, %v4154_v0, 0.0 }
0x1460   : > { %4161 = vadd.xlane.f32.xlu1 %v4160_v17 }
0x1461   : > { %v4157_v57 = vsel %vm3930_vm11, %v4149_v31, 0.0 }
0x1462   : > { %4158 = vadd.xlane.f32.xlu0 %v4157_v57 }
0x14e9   : > { %v4162_v10 = vpop.xlane.xlu1 %4161 }
0x14ea   : > { %v4164_v4 = vmul.f32 0.03125, %v4162_v10 }
0x14eb   : > { %v4159_v27 = vpop.xlane.xlu0 %4158 }
0x14ec   : > { %v4166_v16 = vsub.f32 %v4154_v0, %v4164_v4  ;;  %v4163_v49 = vmul.f32 0.03125, %v4159_v27 }
0x14ee   : > { %v4165_v13 = vsub.f32 %v4149_v31, %v4163_v49  ;;  %v4168_v53 = vmul.f32 %v4166_v16, %v4166_v16 }
0x14f0   : > { %v4172_v55 = vsel %vm3930_vm11, %v4168_v53, 0.0  ;;  %v4167_v2 = vmul.f32 %v4165_v13, %v4165_v13 }
0x14f1   : > { %4173 = vadd.xlane.f32.xlu1 %v4172_v55 }
0x14f2   : > { %v4169_v46 = vsel %vm3930_vm11, %v4167_v2, 0.0 }
0x14f3   : > { %4170 = vadd.xlane.f32.xlu0 %v4169_v46 }
0x157a   : > { %v4174_v43 = vpop.xlane.xlu1 %4173 }
0x157b   : > { %v4176_v40 = vmul.f32 0.03125, %v4174_v43 }
0x157c   : > { %v4171_v45 = vpop.xlane.xlu0 %4170 }
0x157d   : > { %v4178_v56 = vadd.f32 1e-05, %v4176_v40  ;;  %v4175_v54 = vmul.f32 0.03125, %v4171_v45 }
0x157f   : > { %4941 = vrsqrt.f32 %v4178_v56  ;;  %v4177_v22 = vadd.f32 1e-05, %v4175_v54 }
0x1581   : > { %4943 = vrsqrt.f32 %v4177_v22 }
0x158c   : > { %v4942_v62 = vpop.eup %4941 }
0x158d   : > { %v4182_v12 = vmul.f32 %v4942_v62, %v4166_v16 }
0x158e   : > { %v4944_v1 = vpop.eup %4943 }
0x158f   : > { %v4181_v44 = vmul.f32 %v4944_v1, %v4165_v13  ;;  %v4188_v23 = vmul.f32 %v4186_v51, %v4182_v12 }
0x1591   : > { %v4187_v30 = vmul.f32 %v4186_v51, %v4181_v44  ;;  %v4194_v7 = vadd.f32 %v4192_v25, %v4188_v23 }
0x1593   : > { %v4193_v48 = vadd.f32 %v4192_v25, %v4187_v30  ;;  %v4196_v41 = vmax.f32 %v4194_v7, 0.0 }
0x1595   : > { %v4195_v14 = vmax.f32 %v4193_v48, 0.0 }
0x1597   : > { %4660 = vmatprep.mubr.msk.f32.mxu1 %vm3930_vm11, %v4195_v14 }
0x1598   : > { %4661 = vmatmul.mubr.msk.f32.vlgmr.msra.gmra.mxu1 %vm3930_vm11, %v4196_v41 }
0x1658   : > { %v4662_v11 = vpop.f32.mrf.mxu1 }
0x1659   : > { %v4283_v29 = vadd.f32 %v4662_v11, %v4204_v32 }
0x165a   : > { %v4277_v3 = vpop.f32.mrf.mxu1 }
0x165b   : > { %4287 = vst.msk [vmem:[%s392_s19 + $0x8] sm:$0xff] %vm3930_vm11, %v4283_v29  ;;  %v4278_v9 = vadd.f32 %v4277_v3, %v4204_v32 }
0x165d   : > { %4286 = vst.msk [vmem:[%s392_s19] sm:$0xff] %vm3930_vm11, %v4278_v9 }
0x165e   : > { %4960 = shalt.err (!%p4957_p5)
}
0x165f   : > { %s4961_s11 = scalar_lea.hbm %s7241_s28, 256  ;;  %s4965_s24 = scalar_lea.hbm %s7299_s10, 512 }
0x1660   : > { %p4962_p6 = scmp.ne.s32.totalorder %s7241_s28, %s4961_s11  ;;  %p4966_p10 = scmp.lt.s32.totalorder %s7241_s28, %s7299_s10 }
0x1661   : > { %p4967_p11 = scmp.lt.s32.totalorder %s4965_s24, %s4961_s11 }
0x1662   : > { %p4963_p7 = pnand %p4962_p6, %p5131_p4 }
0x1663   : > { %p4968_p12 = por %p4967_p11, %p4966_p10 }
0x1664   : > { %p4964_p9 = pneg %p4963_p7 }
0x1666   : > { %p4969_p13 = pnand %p4968_p12, %p4964_p9 }
0x1668   : > { %4972 = shalt.err (!%p4969_p13)
}
0x1669   : > { %s5034_s0 = smov 128   ;;  %s5035_s16 = smov 8  }
0x166a   : > { %4663 = dma.vmem_to_hbm [thread:$0]  (%p5131_p4), %s7235_s20, 256, %s7241_s28, %s7244_s29, %s5034_s0, %s5034_s0, %s5035_s16  }
0x166b PF: > { %p4669_p0 = scmp.ge.s32.totalorder %s5023_s18, 2  ;;  %s4319_s12 = sand.u32 1, %s5003_s13  }
0x166c   : > { %s4320_s11 = scalar_lea.sflag [#allocation3], %s4319_s12 }
0x166d   : > { %p4666_p1 = pnand %p4669_p0, %p5138_p8 }
0x166f   : > { %p4667_p2 = pneg %p4666_p1 }
0x1671   : > { %4998 = dma.done.wait (%p4667_p2), %s4320_s11, 256  }
0x1672   : > { %5000 = vsyncadd (%p4667_p2), %s4320_s11, 4294967040  ;;  %s23_s18 = sadd.s32 1, %s5023_s18   ;;  %s7511_s13 = smov %s5007_s14 }
0x1673   : > { %p20_p3 = scmp.ge.s32.totalorder %s23_s18, 4   ;;  %s7512_s14 = smov %s5011_s15 }
0x1674   : > { %s7513_s15 = smov %s5144_s26  ;;  %s7514_s16 = smov %s5019_s17 }
0x1675   : > { %s7515_s17 = smov %s7517_s21  ;;  %22 = sbr.rel (!%p20_p3) target bundleno = 6 (0x6), region = 98 }
0x167a   :  { %4325 = vsyncpa [#allocation3], 1 }
0x167b   :  { %4327 = vsyncpa [#allocation3 + $0x1], 1 }

</bundles_post_ra>
